<compile_context>
chip_gen: v6e
topology: v6e:2x2x1
jax: 0.10.0
libtpu: 0.0.40
codegen_flags: <defaults>
</compile_context>

<pallas_src>
import functools

import jax
import jax.numpy as jnp
from jax.experimental import pallas as pl
from jax.experimental.pallas import tpu as pltpu

BN_EPS = 1e-5
LANE = 128        # channel dims are zero-padded to a multiple of this
LEFT = 8          # sublane-tile-aligned left halo of the conv scratch


def _round_up(x, m):
    return (x + m - 1) // m * m


# ---------------------------------------------------------------------------
# in-kernel helpers
# ---------------------------------------------------------------------------
def _conv3x3_taps(pad_ref, w_ref, b, h, w):
    """3x3 conv (padding=1, no bias) as 9 shifted bf16 MXU matmuls.

    pad_ref: (b, h+2, W_PAD, c) f32 scratch; interior [1:h+1, LEFT:LEFT+w]
    holds the input, halo (row 0, row h+1, col LEFT-1, col LEFT+w) is zero.
    w_ref: (9, c, cout) bf16.  Returns (b*h*w, cout) f32.
    """
    m = b * h * w
    c = pad_ref.shape[-1]
    cout = w_ref.shape[-1]
    acc = jnp.zeros((m, cout), jnp.float32)
    for dy in range(3):
        for dx in range(3):
            col0 = LEFT - 1 + dx                    # {7, 8, 9}; dx=1 is aligned
            lhs = pad_ref[:, dy:dy + h, col0:col0 + w, :]
            lhs = lhs.reshape(m, c).astype(jnp.bfloat16)
            acc = acc + jnp.dot(lhs, w_ref[dy * 3 + dx],
                                preferred_element_type=jnp.float32)
    return acc


def _bn_scale_shift(stats, gb, inv_count):
    """stats: (2, cout) = [sum; sum_sq] over (N, H, W); gb = [gamma; beta]."""
    mean = stats[0:1, :] * inv_count
    var = stats[1:2, :] * inv_count - mean * mean            # biased variance
    scale = gb[0:1, :] * jax.lax.rsqrt(var + BN_EPS)         # EUP rsqrt
    shift = gb[1:2, :] - mean * scale
    return scale, shift


def _write_partial_stats(acc, s_ref):
    """acc: (M, cout) conv output of this batch block; s_ref: (1, 2, cout)."""
    cout = s_ref.shape[-1]
    s_ref[:, 0:1, :] = jnp.sum(acc, axis=0, keepdims=True).reshape(1, 1, cout)
    s_ref[:, 1:2, :] = jnp.sum(acc * acc, axis=0,
                               keepdims=True).reshape(1, 1, cout)


# ---------------------------------------------------------------------------
# kernels (grid over batch blocks)
# ---------------------------------------------------------------------------
def pool_conv1_kernel(x_ref, w1_ref, y1_ref, s1_ref, pad_ref):
    """MaxPool2d(2) + conv1 (bias-free) + per-block BN1 partial stats."""
    b, h, _, w, two_cin = x_ref.shape
    cin = two_cin // 2
    cout = y1_ref.shape[-1]

    @pl.when(pl.program_id(0) == 0)      # zero halo persists across grid steps
    def _():
        pad_ref[...] = jnp.zeros_like(pad_ref)

    x = x_ref[...]                                         # (b, h, 2, w, 2*cin)
    xm = jnp.maximum(x[:, :, 0, :, :], x[:, :, 1, :, :])   # max over H offset
    pooled = jnp.maximum(xm[..., :cin], xm[..., cin:])     # max over W offset
    pad_ref[:, 1:h + 1, LEFT:LEFT + w, :] = pooled         # aligned interior

    acc = _conv3x3_taps(pad_ref, w1_ref, b, h, w)          # (b*h*w, cout) f32
    y1_ref[...] = acc.reshape(b, h, w, cout)
    _write_partial_stats(acc, s1_ref)


def bn_relu_conv2_kernel(y1_ref, s1_ref, gb1_ref, w2_ref, y2_ref, s2_ref,
                         pad_ref, *, inv_count):
    """BN1 (train batch stats) + ReLU + conv2 + per-block BN2 partial stats."""
    b, h, w, cout = y1_ref.shape

    @pl.when(pl.program_id(0) == 0)
    def _():
        pad_ref[...] = jnp.zeros_like(pad_ref)

    stats = jnp.sum(s1_ref[...], axis=0)                   # reduce block partials
    scale, shift = _bn_scale_shift(stats, gb1_ref[...], inv_count)
    a = jnp.maximum(y1_ref[...].reshape(b * h * w, cout) * scale + shift, 0.0)
    pad_ref[:, 1:h + 1, LEFT:LEFT + w, :] = a.reshape(b, h, w, cout)

    acc = _conv3x3_taps(pad_ref, w2_ref, b, h, w)
    y2_ref[...] = acc.reshape(b, h, w, cout)
    _write_partial_stats(acc, s2_ref)


# ---------------------------------------------------------------------------
# wrapper
# ---------------------------------------------------------------------------
def _pick_batch_tile(n, hw):
    """Largest divisor of n keeping the matmul M dim (tile*hw) <= 1024."""
    best = 1
    for b in range(1, n + 1):
        if n % b == 0 and b * hw <= 1024:
            best = b
    return best


def _vmem_limit_bytes():
    try:
        cap = pltpu.get_tpu_info().vmem_capacity_bytes
    except Exception:
        cap = 64 * 1024 * 1024
    lim = int(cap * 3 // 4)
    return max(32 * 1024 * 1024, min(lim, 96 * 1024 * 1024))


def down_forward(x_nchw, params):
    """Forward of `down(in_ch, out_ch)` (train-mode BN).
    x_nchw: (N, Cin, H, W) f32 -> (N, Cout, H//2, W//2) f32."""
    # b1/b2 intentionally unused: a conv bias is exactly cancelled by the mean
    # subtraction of the train-mode BatchNorm that immediately follows it.
    w1, b1, g1, be1, w2, b2, g2, be2 = params
    cin, cout = w1.shape[2], w1.shape[3]
    cin_p, cout_p = _round_up(cin, LANE), _round_up(cout, LANE)

    x = jnp.transpose(x_nchw, (0, 2, 3, 1)).astype(jnp.float32)   # NHWC
    n, H, W, _ = x.shape
    assert H % 2 == 0 and W % 2 == 0, "MaxPool2d(2) path assumes even H, W"
    h, w = H // 2, W // 2
    inv_count = 1.0 / float(n * h * w)

    bt = _pick_batch_tile(n, h * w)
    nb = n // bt
    w_pad = LEFT + _round_up(w + 1, 8)        # scratch width, aligned halo

    # ---- lane-dense operands (zero-pad channels to multiples of 128) -------
    x_p = jnp.pad(x, ((0, 0), (0, 0), (0, 0), (0, cin_p - cin)))
    # free row-major reshape: (n, H, W, cin_p) -> (n, h, 2, w, 2*cin_p)
    x5 = x_p.reshape(n, h, 2, w, 2 * cin_p)
    w1p = jnp.pad(w1, ((0, 0), (0, 0), (0, cin_p - cin), (0, cout_p - cout)))
    w2p = jnp.pad(w2, ((0, 0), (0, 0), (0, cout_p - cout), (0, cout_p - cout)))
    w1f = w1p.reshape(9, cin_p, cout_p).astype(jnp.bfloat16)
    w2f = w2p.reshape(9, cout_p, cout_p).astype(jnp.bfloat16)
    g1p = jnp.pad(g1.astype(jnp.float32), (0, cout_p - cout))
    be1p = jnp.pad(be1.astype(jnp.float32), (0, cout_p - cout))
    g2p = jnp.pad(g2.astype(jnp.float32), (0, cout_p - cout))
    be2p = jnp.pad(be2.astype(jnp.float32), (0, cout_p - cout))
    gb1 = jnp.stack([g1p, be1p])                                  # (2, cout_p)

    par = pltpu.CompilerParams(
        # "arbitrary": the zero halo of the conv scratch is written once on
        # step 0 and reused, which requires sequential grid execution (also
        # the only correct choice on multi-TensorCore chips).
        dimension_semantics=("arbitrary",),
        vmem_limit_bytes=_vmem_limit_bytes())

    # ---- pass 1: pool + conv1 (raw) + per-block BN1 stats ------------------
    y1, s1 = pl.pallas_call(
        pool_conv1_kernel,
        grid=(nb,),
        in_specs=[
            pl.BlockSpec((bt, h, 2, w, 2 * cin_p), lambda i: (i, 0, 0, 0, 0)),
            pl.BlockSpec((9, cin_p, cout_p), lambda i: (0, 0, 0)),
        ],
        out_specs=[
            pl.BlockSpec((bt, h, w, cout_p), lambda i: (i, 0, 0, 0)),
            pl.BlockSpec((1, 2, cout_p), lambda i: (i, 0, 0)),
        ],
        out_shape=[
            jax.ShapeDtypeStruct((n, h, w, cout_p), jnp.float32),
            jax.ShapeDtypeStruct((nb, 2, cout_p), jnp.float32),
        ],
        scratch_shapes=[pltpu.VMEM((bt, h + 2, w_pad, cin_p), jnp.float32)],
        compiler_params=par,
        cost_estimate=pl.CostEstimate(
            flops=2 * n * h * w * 9 * cin_p * cout_p,
            transcendentals=0,
            bytes_accessed=4 * (n * H * W * cin_p + n * h * w * cout_p)),
    )(x5, w1f)

    # ---- pass 2: BN1 + ReLU + conv2 (raw) + per-block BN2 stats ------------
    y2, s2 = pl.pallas_call(
        functools.partial(bn_relu_conv2_kernel, inv_count=inv_count),
        grid=(nb,),
        in_specs=[
            pl.BlockSpec((bt, h, w, cout_p), lambda i: (i, 0, 0, 0)),
            pl.BlockSpec((nb, 2, cout_p), lambda i: (0, 0, 0)),
            pl.BlockSpec((2, cout_p), lambda i: (0, 0)),
            pl.BlockSpec((9, cout_p, cout_p), lambda i: (0, 0, 0)),
        ],
        out_specs=[
            pl.BlockSpec((bt, h, w, cout_p), lambda i: (i, 0, 0, 0)),
            pl.BlockSpec((1, 2, cout_p), lambda i: (i, 0, 0)),
        ],
        out_shape=[
            jax.ShapeDtypeStruct((n, h, w, cout_p), jnp.float32),
            jax.ShapeDtypeStruct((nb, 2, cout_p), jnp.float32),
        ],
        scratch_shapes=[pltpu.VMEM((bt, h + 2, w_pad, cout_p), jnp.float32)],
        compiler_params=par,
        cost_estimate=pl.CostEstimate(
            flops=2 * n * h * w * 9 * cout_p * cout_p,
            transcendentals=cout_p,
            bytes_accessed=4 * 2 * n * h * w * cout_p),
    )(y1, s1, gb1, w2f)

    # ---- BN2 + ReLU + channel slice + NCHW transpose -----------------------
    # Deliberately left to XLA (per perf review): pure elementwise work that
    # fuses with the transpose, avoiding an extra HBM round trip.
    stats2 = jnp.sum(s2, axis=0)                                  # (2, cout_p)
    mean2 = stats2[0] * inv_count
    var2 = stats2[1] * inv_count - mean2 * mean2
    scale2 = g2p * jax.lax.rsqrt(var2 + BN_EPS)
    shift2 = be2p - mean2 * scale2
    out = jnp.maximum(y2 * scale2 + shift2, 0.0)[..., :cout]      # (n,h,w,cout)
    return jnp.transpose(out, (0, 3, 1, 2))                       # NCHW


# ---------------------------------------------------------------------------
# pure-JAX reference (mirrors the PyTorch forward, train-mode BN, with bias)
# ---------------------------------------------------------------------------
def down_reference(x_nchw, params):
    w1, b1, g1, be1, w2, b2, g2, be2 = params
    x = jnp.transpose(x_nchw, (0, 2, 3, 1)).astype(jnp.float32)
    n, H, W, c = x.shape
    pooled = jnp.max(x.reshape(n, H // 2, 2, W // 2, 2, c), axis=(2, 4))

    def conv_bn_relu(y, wgt, b, g, be):
        y = jax.lax.conv_general_dilated(
            y, wgt, window_strides=(1, 1), padding="SAME",
            dimension_numbers=("NHWC", "HWIO", "NHWC"),
            precision=jax.lax.Precision.HIGHEST)
        y = y + b
        mean = jnp.mean(y, axis=(0, 1, 2), keepdims=True)
        var = jnp.mean((y - mean) ** 2, axis=(0, 1, 2), keepdims=True)
        y = (y - mean) * jax.lax.rsqrt(var + BN_EPS) * g + be
        return jnp.maximum(y, 0.0)

    y = conv_bn_relu(pooled, w1, b1, g1, be1)
    y = conv_bn_relu(y, w2, b2, g2, be2)
    return jnp.transpose(y, (0, 3, 1, 2))


if __name__ == "__main__":
    in_ch, out_ch = 4, 8
    key = jax.random.PRNGKey(0)
    k = jax.random.split(key, 5)

    # deterministic synthetic parameters (shapes from the module's __init__)
    x = jax.random.normal(k[0], (2, in_ch, 16, 16), jnp.float32)
    w1 = 0.1 * jax.random.normal(k[1], (3, 3, in_ch, out_ch), jnp.float32)   # HWIO
    b1 = 0.1 * jax.random.normal(k[2], (out_ch,), jnp.float32)
    w2 = 0.1 * jax.random.normal(k[3], (3, 3, out_ch, out_ch), jnp.float32)  # HWIO
    b2 = 0.1 * jax.random.normal(k[4], (out_ch,), jnp.float32)
    # BatchNorm affine params at PyTorch defaults (weight=1, bias=0)
    g1 = jnp.ones((out_ch,), jnp.float32)
    be1 = jnp.zeros((out_ch,), jnp.float32)
    g2 = jnp.ones((out_ch,), jnp.float32)
    be2 = jnp.zeros((out_ch,), jnp.float32)
    params = (w1, b1, g1, be1, w2, b2, g2, be2)

    down_fn = jax.jit(down_forward)
    out = down_fn(x, params)
    jax.block_until_ready(out)

    assert out.shape == (2, out_ch, 8, 8), out.shape
    ref = down_reference(x, params)
    # Tolerance widened vs the f32-only version because the conv matmul
    # operands are bf16 (MXU-native); accumulation and BN math remain f32.
    if not jnp.allclose(out, ref, atol=2e-2, rtol=2e-2):
        raise AssertionError(
            f"mismatch vs reference, max abs err = {float(jnp.max(jnp.abs(out - ref)))}")
    print("KERNEL_OK")
</pallas_src>

<mosaic_0001>
module attributes {stable_mosaic.version = 11 : i64} {
  func.func @bn_relu_conv2_kernel(%arg0: i32, %arg1: memref<2x8x8x128xf32, #tpu.memory_space<vmem>>, %arg2: memref<1x2x128xf32, #tpu.memory_space<vmem>>, %arg3: memref<2x128xf32, #tpu.memory_space<vmem>>, %arg4: memref<9x128x128xbf16, #tpu.memory_space<vmem>>, %arg5: memref<2x8x8x128xf32, #tpu.memory_space<vmem>>, %arg6: memref<1x2x128xf32, #tpu.memory_space<vmem>>, %arg7: memref<2x10x24x128xf32, #tpu.memory_space<vmem>>) attributes {dimension_semantics = [#tpu.dimension_semantics<arbitrary>], iteration_bounds = array<i64: 1>, scalar_prefetch = 0 : i64, scratch_operands = 1 : i64, tpu.core_type = #tpu.core_type<tc>, window_params = [{transform_indices = @transform_0, window_bounds = array<i64: 2, 8, 8, 128>}, {pipeline_mode = #tpu.pipeline_mode<synchronous>, transform_indices = @transform_1, window_bounds = array<i64: 1, 2, 128>}, {pipeline_mode = #tpu.pipeline_mode<synchronous>, transform_indices = @transform_2, window_bounds = array<i64: 2, 128>}, {pipeline_mode = #tpu.pipeline_mode<synchronous>, transform_indices = @transform_3, window_bounds = array<i64: 9, 128, 128>}, {transform_indices = @transform_4, window_bounds = array<i64: 2, 8, 8, 128>}, {transform_indices = @transform_5, window_bounds = array<i64: 1, 2, 128>}]} {
    %c0_i32 = arith.constant 0 : i32
    %0 = arith.cmpi eq, %arg0, %c0_i32 : i32
    %1 = arith.extui %0 : i1 to i32
    %c0_i32_0 = arith.constant 0 : i32
    %2 = arith.cmpi ne, %1, %c0_i32_0 : i32
    scf.if %2 {
      %cst_93 = arith.constant 0.000000e+00 : f32
      %107 = vector.broadcast %cst_93 : f32 to vector<2x10x24x128xf32>
      %c0_94 = arith.constant 0 : index
      %c0_95 = arith.constant 0 : index
      %c0_96 = arith.constant 0 : index
      %c0_97 = arith.constant 0 : index
      %108 = vector.load %arg7[%c0_94, %c0_95, %c0_96, %c0_97] : memref<2x10x24x128xf32, #tpu.memory_space<vmem>>, vector<2x10x24x128xf32>
      tpu.vector_store %arg7[%c0_94, %c0_95, %c0_96, %c0_97], %107 {strides = array<i32>} : memref<2x10x24x128xf32, #tpu.memory_space<vmem>>, vector<2x10x24x128xf32>,
    } else {
    }
    %c0 = arith.constant 0 : index
    %c0_1 = arith.constant 0 : index
    %c0_2 = arith.constant 0 : index
    %3 = vector.load %arg2[%c0, %c0_1, %c0_2] : memref<1x2x128xf32, #tpu.memory_space<vmem>>, vector<1x2x128xf32>
    %cst = arith.constant dense<0.000000e+00> : vector<2x128xf32>
    %4 = vector.multi_reduction <add>, %3, %cst [0] : vector<1x2x128xf32> to vector<2x128xf32>
    %c0_3 = arith.constant 0 : index
    %c0_4 = arith.constant 0 : index
    %5 = vector.load %arg3[%c0_3, %c0_4] : memref<2x128xf32, #tpu.memory_space<vmem>>, vector<2x128xf32>
    %6 = vector.extract_strided_slice %4 {offsets = [0, 0], sizes = [1, 128], strides = [1, 1]} : vector<2x128xf32> to vector<1x128xf32>
    %cst_5 = arith.constant 7.812500e-03 : f32
    %7 = vector.broadcast %cst_5 : f32 to vector<1x128xf32>
    %8 = arith.mulf %6, %7 : vector<1x128xf32>
    %9 = vector.extract_strided_slice %4 {offsets = [1, 0], sizes = [1, 128], strides = [1, 1]} : vector<2x128xf32> to vector<1x128xf32>
    %cst_6 = arith.constant 7.812500e-03 : f32
    %10 = vector.broadcast %cst_6 : f32 to vector<1x128xf32>
    %11 = arith.mulf %9, %10 : vector<1x128xf32>
    %12 = arith.mulf %8, %8 : vector<1x128xf32>
    %13 = arith.subf %11, %12 : vector<1x128xf32>
    %14 = vector.extract_strided_slice %5 {offsets = [0, 0], sizes = [1, 128], strides = [1, 1]} : vector<2x128xf32> to vector<1x128xf32>
    %cst_7 = arith.constant 9.99999974E-6 : f32
    %15 = vector.broadcast %cst_7 : f32 to vector<1x128xf32>
    %16 = arith.addf %13, %15 : vector<1x128xf32>
    %17 = math.rsqrt %16 : vector<1x128xf32>
    %18 = arith.mulf %14, %17 : vector<1x128xf32>
    %19 = vector.extract_strided_slice %5 {offsets = [1, 0], sizes = [1, 128], strides = [1, 1]} : vector<2x128xf32> to vector<1x128xf32>
    %20 = arith.mulf %8, %18 : vector<1x128xf32>
    %21 = arith.subf %19, %20 : vector<1x128xf32>
    %c0_8 = arith.constant 0 : index
    %c0_9 = arith.constant 0 : index
    %c0_10 = arith.constant 0 : index
    %c0_11 = arith.constant 0 : index
    %22 = vector.load %arg1[%c0_8, %c0_9, %c0_10, %c0_11] : memref<2x8x8x128xf32, #tpu.memory_space<vmem>>, vector<2x8x8x128xf32>
    %23 = vector.shape_cast %22 : vector<2x8x8x128xf32> to vector<128x128xf32>
    %24 = vector.broadcast %18 : vector<1x128xf32> to vector<128x128xf32>
    %25 = arith.mulf %23, %24 : vector<128x128xf32>
    %26 = vector.broadcast %21 : vector<1x128xf32> to vector<128x128xf32>
    %27 = arith.addf %25, %26 : vector<128x128xf32>
    %cst_12 = arith.constant 0.000000e+00 : f32
    %28 = vector.broadcast %cst_12 : f32 to vector<128x128xf32>
    %29 = arith.maximumf %27, %28 : vector<128x128xf32>
    %30 = vector.shape_cast %29 : vector<128x128xf32> to vector<2x8x8x128xf32>
    %c0_13 = arith.constant 0 : index
    %c1 = arith.constant 1 : index
    %c8 = arith.constant 8 : index
    %c0_14 = arith.constant 0 : index
    %31 = vector.load %arg7[%c0_13, %c1, %c8, %c0_14] : memref<2x10x24x128xf32, #tpu.memory_space<vmem>>, vector<2x8x8x128xf32>
    tpu.vector_store %arg7[%c0_13, %c1, %c8, %c0_14], %30 {strides = array<i32>} : memref<2x10x24x128xf32, #tpu.memory_space<vmem>>, vector<2x8x8x128xf32>,
    %cst_15 = arith.constant 0.000000e+00 : f32
    %32 = vector.broadcast %cst_15 : f32 to vector<128x128xf32>
    %c0_16 = arith.constant 0 : index
    %c0_17 = arith.constant 0 : index
    %c7 = arith.constant 7 : index
    %c0_18 = arith.constant 0 : index
    %33 = vector.load %arg7[%c0_16, %c0_17, %c7, %c0_18] : memref<2x10x24x128xf32, #tpu.memory_space<vmem>>, vector<2x8x8x128xf32>
    %34 = vector.shape_cast %33 : vector<2x8x8x128xf32> to vector<128x128xf32>
    %35 = arith.truncf %34 : vector<128x128xf32> to vector<128x128xbf16>
    %c0_19 = arith.constant 0 : index
    %c0_20 = arith.constant 0 : index
    %c0_21 = arith.constant 0 : index
    %36 = vector.load %arg4[%c0_19, %c0_20, %c0_21] : memref<9x128x128xbf16, #tpu.memory_space<vmem>>, vector<1x128x128xbf16>
    %37 = vector.shape_cast %36 : vector<1x128x128xbf16> to vector<128x128xbf16>
    %cst_22 = arith.constant dense<0.000000e+00> : vector<128x128xf32>
    %38 = tpu.matmul %35, %37, %cst_22 {dimension_numbers = #tpu.dot_dimension_numbers<[1], [0], [0], [1], [0, 0, 1, 1], [], []>} : vector<128x128xbf16>, vector<128x128xbf16>, vector<128x128xf32> -> vector<128x128xf32>
    %39 = arith.addf %32, %38 : vector<128x128xf32>
    %c0_23 = arith.constant 0 : index
    %c0_24 = arith.constant 0 : index
    %c8_25 = arith.constant 8 : index
    %c0_26 = arith.constant 0 : index
    %40 = vector.load %arg7[%c0_23, %c0_24, %c8_25, %c0_26] : memref<2x10x24x128xf32, #tpu.memory_space<vmem>>, vector<2x8x8x128xf32>
    %41 = vector.shape_cast %40 : vector<2x8x8x128xf32> to vector<128x128xf32>
    %42 = arith.truncf %41 : vector<128x128xf32> to vector<128x128xbf16>
    %c1_27 = arith.constant 1 : index
    %c0_28 = arith.constant 0 : index
    %c0_29 = arith.constant 0 : index
    %43 = vector.load %arg4[%c1_27, %c0_28, %c0_29] : memref<9x128x128xbf16, #tpu.memory_space<vmem>>, vector<1x128x128xbf16>
    %44 = vector.shape_cast %43 : vector<1x128x128xbf16> to vector<128x128xbf16>
    %cst_30 = arith.constant dense<0.000000e+00> : vector<128x128xf32>
    %45 = tpu.matmul %42, %44, %cst_30 {dimension_numbers = #tpu.dot_dimension_numbers<[1], [0], [0], [1], [0, 0, 1, 1], [], []>} : vector<128x128xbf16>, vector<128x128xbf16>, vector<128x128xf32> -> vector<128x128xf32>
    %46 = arith.addf %39, %45 : vector<128x128xf32>
    %c0_31 = arith.constant 0 : index
    %c0_32 = arith.constant 0 : index
    %c9 = arith.constant 9 : index
    %c0_33 = arith.constant 0 : index
    %47 = vector.load %arg7[%c0_31, %c0_32, %c9, %c0_33] : memref<2x10x24x128xf32, #tpu.memory_space<vmem>>, vector<2x8x8x128xf32>
    %48 = vector.shape_cast %47 : vector<2x8x8x128xf32> to vector<128x128xf32>
    %49 = arith.truncf %48 : vector<128x128xf32> to vector<128x128xbf16>
    %c2 = arith.constant 2 : index
    %c0_34 = arith.constant 0 : index
    %c0_35 = arith.constant 0 : index
    %50 = vector.load %arg4[%c2, %c0_34, %c0_35] : memref<9x128x128xbf16, #tpu.memory_space<vmem>>, vector<1x128x128xbf16>
    %51 = vector.shape_cast %50 : vector<1x128x128xbf16> to vector<128x128xbf16>
    %cst_36 = arith.constant dense<0.000000e+00> : vector<128x128xf32>
    %52 = tpu.matmul %49, %51, %cst_36 {dimension_numbers = #tpu.dot_dimension_numbers<[1], [0], [0], [1], [0, 0, 1, 1], [], []>} : vector<128x128xbf16>, vector<128x128xbf16>, vector<128x128xf32> -> vector<128x128xf32>
    %53 = arith.addf %46, %52 : vector<128x128xf32>
    %c0_37 = arith.constant 0 : index
    %c1_38 = arith.constant 1 : index
    %c7_39 = arith.constant 7 : index
    %c0_40 = arith.constant 0 : index
    %54 = vector.load %arg7[%c0_37, %c1_38, %c7_39, %c0_40] : memref<2x10x24x128xf32, #tpu.memory_space<vmem>>, vector<2x8x8x128xf32>
    %55 = vector.shape_cast %54 : vector<2x8x8x128xf32> to vector<128x128xf32>
    %56 = arith.truncf %55 : vector<128x128xf32> to vector<128x128xbf16>
    %c3 = arith.constant 3 : index
    %c0_41 = arith.constant 0 : index
    %c0_42 = arith.constant 0 : index
    %57 = vector.load %arg4[%c3, %c0_41, %c0_42] : memref<9x128x128xbf16, #tpu.memory_space<vmem>>, vector<1x128x128xbf16>
    %58 = vector.shape_cast %57 : vector<1x128x128xbf16> to vector<128x128xbf16>
    %cst_43 = arith.constant dense<0.000000e+00> : vector<128x128xf32>
    %59 = tpu.matmul %56, %58, %cst_43 {dimension_numbers = #tpu.dot_dimension_numbers<[1], [0], [0], [1], [0, 0, 1, 1], [], []>} : vector<128x128xbf16>, vector<128x128xbf16>, vector<128x128xf32> -> vector<128x128xf32>
    %60 = arith.addf %53, %59 : vector<128x128xf32>
    %c0_44 = arith.constant 0 : index
    %c1_45 = arith.constant 1 : index
    %c8_46 = arith.constant 8 : index
    %c0_47 = arith.constant 0 : index
    %61 = vector.load %arg7[%c0_44, %c1_45, %c8_46, %c0_47] : memref<2x10x24x128xf32, #tpu.memory_space<vmem>>, vector<2x8x8x128xf32>
    %62 = vector.shape_cast %61 : vector<2x8x8x128xf32> to vector<128x128xf32>
    %63 = arith.truncf %62 : vector<128x128xf32> to vector<128x128xbf16>
    %c4 = arith.constant 4 : index
    %c0_48 = arith.constant 0 : index
    %c0_49 = arith.constant 0 : index
    %64 = vector.load %arg4[%c4, %c0_48, %c0_49] : memref<9x128x128xbf16, #tpu.memory_space<vmem>>, vector<1x128x128xbf16>
    %65 = vector.shape_cast %64 : vector<1x128x128xbf16> to vector<128x128xbf16>
    %cst_50 = arith.constant dense<0.000000e+00> : vector<128x128xf32>
    %66 = tpu.matmul %63, %65, %cst_50 {dimension_numbers = #tpu.dot_dimension_numbers<[1], [0], [0], [1], [0, 0, 1, 1], [], []>} : vector<128x128xbf16>, vector<128x128xbf16>, vector<128x128xf32> -> vector<128x128xf32>
    %67 = arith.addf %60, %66 : vector<128x128xf32>
    %c0_51 = arith.constant 0 : index
    %c1_52 = arith.constant 1 : index
    %c9_53 = arith.constant 9 : index
    %c0_54 = arith.constant 0 : index
    %68 = vector.load %arg7[%c0_51, %c1_52, %c9_53, %c0_54] : memref<2x10x24x128xf32, #tpu.memory_space<vmem>>, vector<2x8x8x128xf32>
    %69 = vector.shape_cast %68 : vector<2x8x8x128xf32> to vector<128x128xf32>
    %70 = arith.truncf %69 : vector<128x128xf32> to vector<128x128xbf16>
    %c5 = arith.constant 5 : index
    %c0_55 = arith.constant 0 : index
    %c0_56 = arith.constant 0 : index
    %71 = vector.load %arg4[%c5, %c0_55, %c0_56] : memref<9x128x128xbf16, #tpu.memory_space<vmem>>, vector<1x128x128xbf16>
    %72 = vector.shape_cast %71 : vector<1x128x128xbf16> to vector<128x128xbf16>
    %cst_57 = arith.constant dense<0.000000e+00> : vector<128x128xf32>
    %73 = tpu.matmul %70, %72, %cst_57 {dimension_numbers = #tpu.dot_dimension_numbers<[1], [0], [0], [1], [0, 0, 1, 1], [], []>} : vector<128x128xbf16>, vector<128x128xbf16>, vector<128x128xf32> -> vector<128x128xf32>
    %74 = arith.addf %67, %73 : vector<128x128xf32>
    %c0_58 = arith.constant 0 : index
    %c2_59 = arith.constant 2 : index
    %c7_60 = arith.constant 7 : index
    %c0_61 = arith.constant 0 : index
    %75 = vector.load %arg7[%c0_58, %c2_59, %c7_60, %c0_61] : memref<2x10x24x128xf32, #tpu.memory_space<vmem>>, vector<2x8x8x128xf32>
    %76 = vector.shape_cast %75 : vector<2x8x8x128xf32> to vector<128x128xf32>
    %77 = arith.truncf %76 : vector<128x128xf32> to vector<128x128xbf16>
    %c6 = arith.constant 6 : index
    %c0_62 = arith.constant 0 : index
    %c0_63 = arith.constant 0 : index
    %78 = vector.load %arg4[%c6, %c0_62, %c0_63] : memref<9x128x128xbf16, #tpu.memory_space<vmem>>, vector<1x128x128xbf16>
    %79 = vector.shape_cast %78 : vector<1x128x128xbf16> to vector<128x128xbf16>
    %cst_64 = arith.constant dense<0.000000e+00> : vector<128x128xf32>
    %80 = tpu.matmul %77, %79, %cst_64 {dimension_numbers = #tpu.dot_dimension_numbers<[1], [0], [0], [1], [0, 0, 1, 1], [], []>} : vector<128x128xbf16>, vector<128x128xbf16>, vector<128x128xf32> -> vector<128x128xf32>
    %81 = arith.addf %74, %80 : vector<128x128xf32>
    %c0_65 = arith.constant 0 : index
    %c2_66 = arith.constant 2 : index
    %c8_67 = arith.constant 8 : index
    %c0_68 = arith.constant 0 : index
    %82 = vector.load %arg7[%c0_65, %c2_66, %c8_67, %c0_68] : memref<2x10x24x128xf32, #tpu.memory_space<vmem>>, vector<2x8x8x128xf32>
    %83 = vector.shape_cast %82 : vector<2x8x8x128xf32> to vector<128x128xf32>
    %84 = arith.truncf %83 : vector<128x128xf32> to vector<128x128xbf16>
    %c7_69 = arith.constant 7 : index
    %c0_70 = arith.constant 0 : index
    %c0_71 = arith.constant 0 : index
    %85 = vector.load %arg4[%c7_69, %c0_70, %c0_71] : memref<9x128x128xbf16, #tpu.memory_space<vmem>>, vector<1x128x128xbf16>
    %86 = vector.shape_cast %85 : vector<1x128x128xbf16> to vector<128x128xbf16>
    %cst_72 = arith.constant dense<0.000000e+00> : vector<128x128xf32>
    %87 = tpu.matmul %84, %86, %cst_72 {dimension_numbers = #tpu.dot_dimension_numbers<[1], [0], [0], [1], [0, 0, 1, 1], [], []>} : vector<128x128xbf16>, vector<128x128xbf16>, vector<128x128xf32> -> vector<128x128xf32>
    %88 = arith.addf %81, %87 : vector<128x128xf32>
    %c0_73 = arith.constant 0 : index
    %c2_74 = arith.constant 2 : index
    %c9_75 = arith.constant 9 : index
    %c0_76 = arith.constant 0 : index
    %89 = vector.load %arg7[%c0_73, %c2_74, %c9_75, %c0_76] : memref<2x10x24x128xf32, #tpu.memory_space<vmem>>, vector<2x8x8x128xf32>
    %90 = vector.shape_cast %89 : vector<2x8x8x128xf32> to vector<128x128xf32>
    %91 = arith.truncf %90 : vector<128x128xf32> to vector<128x128xbf16>
    %c8_77 = arith.constant 8 : index
    %c0_78 = arith.constant 0 : index
    %c0_79 = arith.constant 0 : index
    %92 = vector.load %arg4[%c8_77, %c0_78, %c0_79] : memref<9x128x128xbf16, #tpu.memory_space<vmem>>, vector<1x128x128xbf16>
    %93 = vector.shape_cast %92 : vector<1x128x128xbf16> to vector<128x128xbf16>
    %cst_80 = arith.constant dense<0.000000e+00> : vector<128x128xf32>
    %94 = tpu.matmul %91, %93, %cst_80 {dimension_numbers = #tpu.dot_dimension_numbers<[1], [0], [0], [1], [0, 0, 1, 1], [], []>} : vector<128x128xbf16>, vector<128x128xbf16>, vector<128x128xf32> -> vector<128x128xf32>
    %95 = arith.addf %88, %94 : vector<128x128xf32>
    %96 = vector.shape_cast %95 : vector<128x128xf32> to vector<2x8x8x128xf32>
    %c0_81 = arith.constant 0 : index
    %c0_82 = arith.constant 0 : index
    %c0_83 = arith.constant 0 : index
    %c0_84 = arith.constant 0 : index
    %97 = vector.load %arg5[%c0_81, %c0_82, %c0_83, %c0_84] : memref<2x8x8x128xf32, #tpu.memory_space<vmem>>, vector<2x8x8x128xf32>
    tpu.vector_store %arg5[%c0_81, %c0_82, %c0_83, %c0_84], %96 {strides = array<i32>} : memref<2x8x8x128xf32, #tpu.memory_space<vmem>>, vector<2x8x8x128xf32>,
    %cst_85 = arith.constant dense<0.000000e+00> : vector<128xf32>
    %98 = vector.multi_reduction <add>, %95, %cst_85 [0] : vector<128x128xf32> to vector<128xf32>
    %99 = vector.shape_cast %98 : vector<128xf32> to vector<1x128xf32>
    %100 = vector.shape_cast %99 : vector<1x128xf32> to vector<1x1x128xf32>
    %c0_86 = arith.constant 0 : index
    %c0_87 = arith.constant 0 : index
    %c0_88 = arith.constant 0 : index
    %101 = vector.load %arg6[%c0_86, %c0_87, %c0_88] : memref<1x2x128xf32, #tpu.memory_space<vmem>>, vector<1x1x128xf32>
    tpu.vector_store %arg6[%c0_86, %c0_87, %c0_88], %100 {strides = array<i32>} : memref<1x2x128xf32, #tpu.memory_space<vmem>>, vector<1x1x128xf32>,
    %102 = arith.mulf %95, %95 : vector<128x128xf32>
    %cst_89 = arith.constant dense<0.000000e+00> : vector<128xf32>
    %103 = vector.multi_reduction <add>, %102, %cst_89 [0] : vector<128x128xf32> to vector<128xf32>
    %104 = vector.shape_cast %103 : vector<128xf32> to vector<1x128xf32>
    %105 = vector.shape_cast %104 : vector<1x128xf32> to vector<1x1x128xf32>
    %c0_90 = arith.constant 0 : index
    %c1_91 = arith.constant 1 : index
    %c0_92 = arith.constant 0 : index
    %106 = vector.load %arg6[%c0_90, %c1_91, %c0_92] : memref<1x2x128xf32, #tpu.memory_space<vmem>>, vector<1x1x128xf32>
    tpu.vector_store %arg6[%c0_90, %c1_91, %c0_92], %105 {strides = array<i32>} : memref<1x2x128xf32, #tpu.memory_space<vmem>>, vector<1x1x128xf32>,
    return
  }
  func.func @transform_0(%arg0: i32) -> (i32, i32, i32, i32) {
    %c0_i32 = arith.constant 0 : i32
    %c0_i32_0 = arith.constant 0 : i32
    %c0_i32_1 = arith.constant 0 : i32
    %c0_i32_2 = arith.constant 0 : i32
    return %arg0, %c0_i32, %c0_i32_0, %c0_i32_1 : i32, i32, i32, i32
  }
  func.func @transform_1(%arg0: i32) -> (i32, i32, i32) {
    %c0_i32 = arith.constant 0 : i32
    %c0_i32_0 = arith.constant 0 : i32
    %c0_i32_1 = arith.constant 0 : i32
    %c0_i32_2 = arith.constant 0 : i32
    return %c0_i32, %c0_i32_0, %c0_i32_1 : i32, i32, i32
  }
  func.func @transform_2(%arg0: i32) -> (i32, i32) {
    %c0_i32 = arith.constant 0 : i32
    %c0_i32_0 = arith.constant 0 : i32
    %c0_i32_1 = arith.constant 0 : i32
    return %c0_i32, %c0_i32_0 : i32, i32
  }
  func.func @transform_3(%arg0: i32) -> (i32, i32, i32) {
    %c0_i32 = arith.constant 0 : i32
    %c0_i32_0 = arith.constant 0 : i32
    %c0_i32_1 = arith.constant 0 : i32
    %c0_i32_2 = arith.constant 0 : i32
    return %c0_i32, %c0_i32_0, %c0_i32_1 : i32, i32, i32
  }
  func.func @transform_4(%arg0: i32) -> (i32, i32, i32, i32) {
    %c0_i32 = arith.constant 0 : i32
    %c0_i32_0 = arith.constant 0 : i32
    %c0_i32_1 = arith.constant 0 : i32
    %c0_i32_2 = arith.constant 0 : i32
    return %arg0, %c0_i32, %c0_i32_0, %c0_i32_1 : i32, i32, i32, i32
  }
  func.func @transform_5(%arg0: i32) -> (i32, i32, i32) {
    %c0_i32 = arith.constant 0 : i32
    %c0_i32_0 = arith.constant 0 : i32
    %c0_i32_1 = arith.constant 0 : i32
    return %arg0, %c0_i32, %c0_i32_0 : i32, i32, i32
  }
}

module attributes {stable_mosaic.version = 11 : i64} {
  func.func @pool_conv1_kernel(%arg0: i32, %arg1: memref<2x8x2x8x256xf32, #tpu.memory_space<vmem>>, %arg2: memref<9x128x128xbf16, #tpu.memory_space<vmem>>, %arg3: memref<2x8x8x128xf32, #tpu.memory_space<vmem>>, %arg4: memref<1x2x128xf32, #tpu.memory_space<vmem>>, %arg5: memref<2x10x24x128xf32, #tpu.memory_space<vmem>>) attributes {dimension_semantics = [#tpu.dimension_semantics<arbitrary>], iteration_bounds = array<i64: 1>, scalar_prefetch = 0 : i64, scratch_operands = 1 : i64, tpu.core_type = #tpu.core_type<tc>, window_params = [{transform_indices = @transform_0, window_bounds = array<i64: 2, 8, 2, 8, 256>}, {pipeline_mode = #tpu.pipeline_mode<synchronous>, transform_indices = @transform_1, window_bounds = array<i64: 9, 128, 128>}, {transform_indices = @transform_2, window_bounds = array<i64: 2, 8, 8, 128>}, {transform_indices = @transform_3, window_bounds = array<i64: 1, 2, 128>}]} {
    %c0_i32 = arith.constant 0 : i32
    %0 = arith.cmpi eq, %arg0, %c0_i32 : i32
    %1 = arith.extui %0 : i1 to i32
    %c0_i32_0 = arith.constant 0 : i32
    %2 = arith.cmpi ne, %1, %c0_i32_0 : i32
    scf.if %2 {
      %cst_84 = arith.constant 0.000000e+00 : f32
      %88 = vector.broadcast %cst_84 : f32 to vector<2x10x24x128xf32>
      %c0_85 = arith.constant 0 : index
      %c0_86 = arith.constant 0 : index
      %c0_87 = arith.constant 0 : index
      %c0_88 = arith.constant 0 : index
      %89 = vector.load %arg5[%c0_85, %c0_86, %c0_87, %c0_88] : memref<2x10x24x128xf32, #tpu.memory_space<vmem>>, vector<2x10x24x128xf32>
      tpu.vector_store %arg5[%c0_85, %c0_86, %c0_87, %c0_88], %88 {strides = array<i32>} : memref<2x10x24x128xf32, #tpu.memory_space<vmem>>, vector<2x10x24x128xf32>,
    } else {
    }
    %c0 = arith.constant 0 : index
    %c0_1 = arith.constant 0 : index
    %c0_2 = arith.constant 0 : index
    %c0_3 = arith.constant 0 : index
    %c0_4 = arith.constant 0 : index
    %3 = vector.load %arg1[%c0, %c0_1, %c0_2, %c0_3, %c0_4] : memref<2x8x2x8x256xf32, #tpu.memory_space<vmem>>, vector<2x8x2x8x256xf32>
    %4 = vector.extract_strided_slice %3 {offsets = [0, 0, 0, 0, 0], sizes = [2, 8, 1, 8, 256], strides = [1, 1, 1, 1, 1]} : vector<2x8x2x8x256xf32> to vector<2x8x1x8x256xf32>
    %5 = vector.shape_cast %4 : vector<2x8x1x8x256xf32> to vector<2x8x8x256xf32>
    %6 = vector.extract_strided_slice %3 {offsets = [0, 0, 1, 0, 0], sizes = [2, 8, 1, 8, 256], strides = [1, 1, 1, 1, 1]} : vector<2x8x2x8x256xf32> to vector<2x8x1x8x256xf32>
    %7 = vector.shape_cast %6 : vector<2x8x1x8x256xf32> to vector<2x8x8x256xf32>
    %8 = arith.maximumf %5, %7 : vector<2x8x8x256xf32>
    %9 = vector.extract_strided_slice %8 {offsets = [0, 0, 0, 0], sizes = [2, 8, 8, 128], strides = [1, 1, 1, 1]} : vector<2x8x8x256xf32> to vector<2x8x8x128xf32>
    %10 = vector.extract_strided_slice %8 {offsets = [0, 0, 0, 128], sizes = [2, 8, 8, 128], strides = [1, 1, 1, 1]} : vector<2x8x8x256xf32> to vector<2x8x8x128xf32>
    %11 = arith.maximumf %9, %10 : vector<2x8x8x128xf32>
    %c0_5 = arith.constant 0 : index
    %c1 = arith.constant 1 : index
    %c8 = arith.constant 8 : index
    %c0_6 = arith.constant 0 : index
    %12 = vector.load %arg5[%c0_5, %c1, %c8, %c0_6] : memref<2x10x24x128xf32, #tpu.memory_space<vmem>>, vector<2x8x8x128xf32>
    tpu.vector_store %arg5[%c0_5, %c1, %c8, %c0_6], %11 {strides = array<i32>} : memref<2x10x24x128xf32, #tpu.memory_space<vmem>>, vector<2x8x8x128xf32>,
    %cst = arith.constant 0.000000e+00 : f32
    %13 = vector.broadcast %cst : f32 to vector<128x128xf32>
    %c0_7 = arith.constant 0 : index
    %c0_8 = arith.constant 0 : index
    %c7 = arith.constant 7 : index
    %c0_9 = arith.constant 0 : index
    %14 = vector.load %arg5[%c0_7, %c0_8, %c7, %c0_9] : memref<2x10x24x128xf32, #tpu.memory_space<vmem>>, vector<2x8x8x128xf32>
    %15 = vector.shape_cast %14 : vector<2x8x8x128xf32> to vector<128x128xf32>
    %16 = arith.truncf %15 : vector<128x128xf32> to vector<128x128xbf16>
    %c0_10 = arith.constant 0 : index
    %c0_11 = arith.constant 0 : index
    %c0_12 = arith.constant 0 : index
    %17 = vector.load %arg2[%c0_10, %c0_11, %c0_12] : memref<9x128x128xbf16, #tpu.memory_space<vmem>>, vector<1x128x128xbf16>
    %18 = vector.shape_cast %17 : vector<1x128x128xbf16> to vector<128x128xbf16>
    %cst_13 = arith.constant dense<0.000000e+00> : vector<128x128xf32>
    %19 = tpu.matmul %16, %18, %cst_13 {dimension_numbers = #tpu.dot_dimension_numbers<[1], [0], [0], [1], [0, 0, 1, 1], [], []>} : vector<128x128xbf16>, vector<128x128xbf16>, vector<128x128xf32> -> vector<128x128xf32>
    %20 = arith.addf %13, %19 : vector<128x128xf32>
    %c0_14 = arith.constant 0 : index
    %c0_15 = arith.constant 0 : index
    %c8_16 = arith.constant 8 : index
    %c0_17 = arith.constant 0 : index
    %21 = vector.load %arg5[%c0_14, %c0_15, %c8_16, %c0_17] : memref<2x10x24x128xf32, #tpu.memory_space<vmem>>, vector<2x8x8x128xf32>
    %22 = vector.shape_cast %21 : vector<2x8x8x128xf32> to vector<128x128xf32>
    %23 = arith.truncf %22 : vector<128x128xf32> to vector<128x128xbf16>
    %c1_18 = arith.constant 1 : index
    %c0_19 = arith.constant 0 : index
    %c0_20 = arith.constant 0 : index
    %24 = vector.load %arg2[%c1_18, %c0_19, %c0_20] : memref<9x128x128xbf16, #tpu.memory_space<vmem>>, vector<1x128x128xbf16>
    %25 = vector.shape_cast %24 : vector<1x128x128xbf16> to vector<128x128xbf16>
    %cst_21 = arith.constant dense<0.000000e+00> : vector<128x128xf32>
    %26 = tpu.matmul %23, %25, %cst_21 {dimension_numbers = #tpu.dot_dimension_numbers<[1], [0], [0], [1], [0, 0, 1, 1], [], []>} : vector<128x128xbf16>, vector<128x128xbf16>, vector<128x128xf32> -> vector<128x128xf32>
    %27 = arith.addf %20, %26 : vector<128x128xf32>
    %c0_22 = arith.constant 0 : index
    %c0_23 = arith.constant 0 : index
    %c9 = arith.constant 9 : index
    %c0_24 = arith.constant 0 : index
    %28 = vector.load %arg5[%c0_22, %c0_23, %c9, %c0_24] : memref<2x10x24x128xf32, #tpu.memory_space<vmem>>, vector<2x8x8x128xf32>
    %29 = vector.shape_cast %28 : vector<2x8x8x128xf32> to vector<128x128xf32>
    %30 = arith.truncf %29 : vector<128x128xf32> to vector<128x128xbf16>
    %c2 = arith.constant 2 : index
    %c0_25 = arith.constant 0 : index
    %c0_26 = arith.constant 0 : index
    %31 = vector.load %arg2[%c2, %c0_25, %c0_26] : memref<9x128x128xbf16, #tpu.memory_space<vmem>>, vector<1x128x128xbf16>
    %32 = vector.shape_cast %31 : vector<1x128x128xbf16> to vector<128x128xbf16>
    %cst_27 = arith.constant dense<0.000000e+00> : vector<128x128xf32>
    %33 = tpu.matmul %30, %32, %cst_27 {dimension_numbers = #tpu.dot_dimension_numbers<[1], [0], [0], [1], [0, 0, 1, 1], [], []>} : vector<128x128xbf16>, vector<128x128xbf16>, vector<128x128xf32> -> vector<128x128xf32>
    %34 = arith.addf %27, %33 : vector<128x128xf32>
    %c0_28 = arith.constant 0 : index
    %c1_29 = arith.constant 1 : index
    %c7_30 = arith.constant 7 : index
    %c0_31 = arith.constant 0 : index
    %35 = vector.load %arg5[%c0_28, %c1_29, %c7_30, %c0_31] : memref<2x10x24x128xf32, #tpu.memory_space<vmem>>, vector<2x8x8x128xf32>
    %36 = vector.shape_cast %35 : vector<2x8x8x128xf32> to vector<128x128xf32>
    %37 = arith.truncf %36 : vector<128x128xf32> to vector<128x128xbf16>
    %c3 = arith.constant 3 : index
    %c0_32 = arith.constant 0 : index
    %c0_33 = arith.constant 0 : index
    %38 = vector.load %arg2[%c3, %c0_32, %c0_33] : memref<9x128x128xbf16, #tpu.memory_space<vmem>>, vector<1x128x128xbf16>
    %39 = vector.shape_cast %38 : vector<1x128x128xbf16> to vector<128x128xbf16>
    %cst_34 = arith.constant dense<0.000000e+00> : vector<128x128xf32>
    %40 = tpu.matmul %37, %39, %cst_34 {dimension_numbers = #tpu.dot_dimension_numbers<[1], [0], [0], [1], [0, 0, 1, 1], [], []>} : vector<128x128xbf16>, vector<128x128xbf16>, vector<128x128xf32> -> vector<128x128xf32>
    %41 = arith.addf %34, %40 : vector<128x128xf32>
    %c0_35 = arith.constant 0 : index
    %c1_36 = arith.constant 1 : index
    %c8_37 = arith.constant 8 : index
    %c0_38 = arith.constant 0 : index
    %42 = vector.load %arg5[%c0_35, %c1_36, %c8_37, %c0_38] : memref<2x10x24x128xf32, #tpu.memory_space<vmem>>, vector<2x8x8x128xf32>
    %43 = vector.shape_cast %42 : vector<2x8x8x128xf32> to vector<128x128xf32>
    %44 = arith.truncf %43 : vector<128x128xf32> to vector<128x128xbf16>
    %c4 = arith.constant 4 : index
    %c0_39 = arith.constant 0 : index
    %c0_40 = arith.constant 0 : index
    %45 = vector.load %arg2[%c4, %c0_39, %c0_40] : memref<9x128x128xbf16, #tpu.memory_space<vmem>>, vector<1x128x128xbf16>
    %46 = vector.shape_cast %45 : vector<1x128x128xbf16> to vector<128x128xbf16>
    %cst_41 = arith.constant dense<0.000000e+00> : vector<128x128xf32>
    %47 = tpu.matmul %44, %46, %cst_41 {dimension_numbers = #tpu.dot_dimension_numbers<[1], [0], [0], [1], [0, 0, 1, 1], [], []>} : vector<128x128xbf16>, vector<128x128xbf16>, vector<128x128xf32> -> vector<128x128xf32>
    %48 = arith.addf %41, %47 : vector<128x128xf32>
    %c0_42 = arith.constant 0 : index
    %c1_43 = arith.constant 1 : index
    %c9_44 = arith.constant 9 : index
    %c0_45 = arith.constant 0 : index
    %49 = vector.load %arg5[%c0_42, %c1_43, %c9_44, %c0_45] : memref<2x10x24x128xf32, #tpu.memory_space<vmem>>, vector<2x8x8x128xf32>
    %50 = vector.shape_cast %49 : vector<2x8x8x128xf32> to vector<128x128xf32>
    %51 = arith.truncf %50 : vector<128x128xf32> to vector<128x128xbf16>
    %c5 = arith.constant 5 : index
    %c0_46 = arith.constant 0 : index
    %c0_47 = arith.constant 0 : index
    %52 = vector.load %arg2[%c5, %c0_46, %c0_47] : memref<9x128x128xbf16, #tpu.memory_space<vmem>>, vector<1x128x128xbf16>
    %53 = vector.shape_cast %52 : vector<1x128x128xbf16> to vector<128x128xbf16>
    %cst_48 = arith.constant dense<0.000000e+00> : vector<128x128xf32>
    %54 = tpu.matmul %51, %53, %cst_48 {dimension_numbers = #tpu.dot_dimension_numbers<[1], [0], [0], [1], [0, 0, 1, 1], [], []>} : vector<128x128xbf16>, vector<128x128xbf16>, vector<128x128xf32> -> vector<128x128xf32>
    %55 = arith.addf %48, %54 : vector<128x128xf32>
    %c0_49 = arith.constant 0 : index
    %c2_50 = arith.constant 2 : index
    %c7_51 = arith.constant 7 : index
    %c0_52 = arith.constant 0 : index
    %56 = vector.load %arg5[%c0_49, %c2_50, %c7_51, %c0_52] : memref<2x10x24x128xf32, #tpu.memory_space<vmem>>, vector<2x8x8x128xf32>
    %57 = vector.shape_cast %56 : vector<2x8x8x128xf32> to vector<128x128xf32>
    %58 = arith.truncf %57 : vector<128x128xf32> to vector<128x128xbf16>
    %c6 = arith.constant 6 : index
    %c0_53 = arith.constant 0 : index
    %c0_54 = arith.constant 0 : index
    %59 = vector.load %arg2[%c6, %c0_53, %c0_54] : memref<9x128x128xbf16, #tpu.memory_space<vmem>>, vector<1x128x128xbf16>
    %60 = vector.shape_cast %59 : vector<1x128x128xbf16> to vector<128x128xbf16>
    %cst_55 = arith.constant dense<0.000000e+00> : vector<128x128xf32>
    %61 = tpu.matmul %58, %60, %cst_55 {dimension_numbers = #tpu.dot_dimension_numbers<[1], [0], [0], [1], [0, 0, 1, 1], [], []>} : vector<128x128xbf16>, vector<128x128xbf16>, vector<128x128xf32> -> vector<128x128xf32>
    %62 = arith.addf %55, %61 : vector<128x128xf32>
    %c0_56 = arith.constant 0 : index
    %c2_57 = arith.constant 2 : index
    %c8_58 = arith.constant 8 : index
    %c0_59 = arith.constant 0 : index
    %63 = vector.load %arg5[%c0_56, %c2_57, %c8_58, %c0_59] : memref<2x10x24x128xf32, #tpu.memory_space<vmem>>, vector<2x8x8x128xf32>
    %64 = vector.shape_cast %63 : vector<2x8x8x128xf32> to vector<128x128xf32>
    %65 = arith.truncf %64 : vector<128x128xf32> to vector<128x128xbf16>
    %c7_60 = arith.constant 7 : index
    %c0_61 = arith.constant 0 : index
    %c0_62 = arith.constant 0 : index
    %66 = vector.load %arg2[%c7_60, %c0_61, %c0_62] : memref<9x128x128xbf16, #tpu.memory_space<vmem>>, vector<1x128x128xbf16>
    %67 = vector.shape_cast %66 : vector<1x128x128xbf16> to vector<128x128xbf16>
    %cst_63 = arith.constant dense<0.000000e+00> : vector<128x128xf32>
    %68 = tpu.matmul %65, %67, %cst_63 {dimension_numbers = #tpu.dot_dimension_numbers<[1], [0], [0], [1], [0, 0, 1, 1], [], []>} : vector<128x128xbf16>, vector<128x128xbf16>, vector<128x128xf32> -> vector<128x128xf32>
    %69 = arith.addf %62, %68 : vector<128x128xf32>
    %c0_64 = arith.constant 0 : index
    %c2_65 = arith.constant 2 : index
    %c9_66 = arith.constant 9 : index
    %c0_67 = arith.constant 0 : index
    %70 = vector.load %arg5[%c0_64, %c2_65, %c9_66, %c0_67] : memref<2x10x24x128xf32, #tpu.memory_space<vmem>>, vector<2x8x8x128xf32>
    %71 = vector.shape_cast %70 : vector<2x8x8x128xf32> to vector<128x128xf32>
    %72 = arith.truncf %71 : vector<128x128xf32> to vector<128x128xbf16>
    %c8_68 = arith.constant 8 : index
    %c0_69 = arith.constant 0 : index
    %c0_70 = arith.constant 0 : index
    %73 = vector.load %arg2[%c8_68, %c0_69, %c0_70] : memref<9x128x128xbf16, #tpu.memory_space<vmem>>, vector<1x128x128xbf16>
    %74 = vector.shape_cast %73 : vector<1x128x128xbf16> to vector<128x128xbf16>
    %cst_71 = arith.constant dense<0.000000e+00> : vector<128x128xf32>
    %75 = tpu.matmul %72, %74, %cst_71 {dimension_numbers = #tpu.dot_dimension_numbers<[1], [0], [0], [1], [0, 0, 1, 1], [], []>} : vector<128x128xbf16>, vector<128x128xbf16>, vector<128x128xf32> -> vector<128x128xf32>
    %76 = arith.addf %69, %75 : vector<128x128xf32>
    %77 = vector.shape_cast %76 : vector<128x128xf32> to vector<2x8x8x128xf32>
    %c0_72 = arith.constant 0 : index
    %c0_73 = arith.constant 0 : index
    %c0_74 = arith.constant 0 : index
    %c0_75 = arith.constant 0 : index
    %78 = vector.load %arg3[%c0_72, %c0_73, %c0_74, %c0_75] : memref<2x8x8x128xf32, #tpu.memory_space<vmem>>, vector<2x8x8x128xf32>
    tpu.vector_store %arg3[%c0_72, %c0_73, %c0_74, %c0_75], %77 {strides = array<i32>} : memref<2x8x8x128xf32, #tpu.memory_space<vmem>>, vector<2x8x8x128xf32>,
    %cst_76 = arith.constant dense<0.000000e+00> : vector<128xf32>
    %79 = vector.multi_reduction <add>, %76, %cst_76 [0] : vector<128x128xf32> to vector<128xf32>
    %80 = vector.shape_cast %79 : vector<128xf32> to vector<1x128xf32>
    %81 = vector.shape_cast %80 : vector<1x128xf32> to vector<1x1x128xf32>
    %c0_77 = arith.constant 0 : index
    %c0_78 = arith.constant 0 : index
    %c0_79 = arith.constant 0 : index
    %82 = vector.load %arg4[%c0_77, %c0_78, %c0_79] : memref<1x2x128xf32, #tpu.memory_space<vmem>>, vector<1x1x128xf32>
    tpu.vector_store %arg4[%c0_77, %c0_78, %c0_79], %81 {strides = array<i32>} : memref<1x2x128xf32, #tpu.memory_space<vmem>>, vector<1x1x128xf32>,
    %83 = arith.mulf %76, %76 : vector<128x128xf32>
    %cst_80 = arith.constant dense<0.000000e+00> : vector<128xf32>
    %84 = vector.multi_reduction <add>, %83, %cst_80 [0] : vector<128x128xf32> to vector<128xf32>
    %85 = vector.shape_cast %84 : vector<128xf32> to vector<1x128xf32>
    %86 = vector.shape_cast %85 : vector<1x128xf32> to vector<1x1x128xf32>
    %c0_81 = arith.constant 0 : index
    %c1_82 = arith.constant 1 : index
    %c0_83 = arith.constant 0 : index
    %87 = vector.load %arg4[%c0_81, %c1_82, %c0_83] : memref<1x2x128xf32, #tpu.memory_space<vmem>>, vector<1x1x128xf32>
    tpu.vector_store %arg4[%c0_81, %c1_82, %c0_83], %86 {strides = array<i32>} : memref<1x2x128xf32, #tpu.memory_space<vmem>>, vector<1x1x128xf32>,
    return
  }
  func.func @transform_0(%arg0: i32) -> (i32, i32, i32, i32, i32) {
    %c0_i32 = arith.constant 0 : i32
    %c0_i32_0 = arith.constant 0 : i32
    %c0_i32_1 = arith.constant 0 : i32
    %c0_i32_2 = arith.constant 0 : i32
    %c0_i32_3 = arith.constant 0 : i32
    return %arg0, %c0_i32, %c0_i32_0, %c0_i32_1, %c0_i32_2 : i32, i32, i32, i32, i32
  }
  func.func @transform_1(%arg0: i32) -> (i32, i32, i32) {
    %c0_i32 = arith.constant 0 : i32
    %c0_i32_0 = arith.constant 0 : i32
    %c0_i32_1 = arith.constant 0 : i32
    %c0_i32_2 = arith.constant 0 : i32
    return %c0_i32, %c0_i32_0, %c0_i32_1 : i32, i32, i32
  }
  func.func @transform_2(%arg0: i32) -> (i32, i32, i32, i32) {
    %c0_i32 = arith.constant 0 : i32
    %c0_i32_0 = arith.constant 0 : i32
    %c0_i32_1 = arith.constant 0 : i32
    %c0_i32_2 = arith.constant 0 : i32
    return %arg0, %c0_i32, %c0_i32_0, %c0_i32_1 : i32, i32, i32, i32
  }
  func.func @transform_3(%arg0: i32) -> (i32, i32, i32) {
    %c0_i32 = arith.constant 0 : i32
    %c0_i32_0 = arith.constant 0 : i32
    %c0_i32_1 = arith.constant 0 : i32
    return %arg0, %c0_i32, %c0_i32_0 : i32, i32, i32
  }
}

</mosaic_0001>

<bundles_post_ra>
// kernel: down_forward.3
= control target key start
LH: loop header
LB: loop body
LE: loop exit
PB: predicated region body
PF: predicated region fallthrough
CT: control target
= control target key end

     0   :  { %v2787_v1 = vmov 0.0   ;;  %v120_v25 = vlaneseq  ;;  %s3689_s3 = inlined_call_operand.vmem [shape: bf16[9,128,128], index: 3, kind: input, shape index: {}]   ;;  %s3690_s1 = inlined_call_operand.vmem [shape: f32[1,2,128], index: 1, kind: input, shape index: {}]   ;;  %s3691_s2 = inlined_call_operand.vmem [shape: f32[2,128], index: 2, kind: input, shape index: {}]   ;;  %s3692_s0 = inlined_call_operand.vmem [shape: f32[2,8,8,128], index: 0, kind: input, shape index: {}]   ;;  %s3693_s4 = inlined_call_operand.vmem [shape: f32[2,8,8,128], index: 4, kind: output, shape index: {0}]   ;;  %s3694_s5 = inlined_call_operand.vmem [shape: f32[1,2,128], index: 5, kind: output, shape index: {1}]  }
   0x1   :  { %v2712_v0 = vld [vmem:[%s3689_s3 + $0x78] sm:$0xff]   ;;  %25 = vst [vmem:[#allocation2 + $0x8] sm:$0xff] %v2787_v1  ;;  %24 = vst [vmem:[#allocation2] sm:$0xff] %v2787_v1  ;;  %v2714_v3 = vld [vmem:[%s3689_s3 + $0x70] sm:$0xff]  }
   0x2   :  { %26 = vst [vmem:[#allocation2 + $0x10] sm:$0xff] %v2787_v1  ;;  %27 = vst [vmem:[#allocation2 + $0x18] sm:$0xff] %v2787_v1  ;;  %v2713_v2 = vld [vmem:[%s3689_s3 + $0x38] sm:$0xff]   ;;  %2407 = vmatprep.subr.bf16.mxu0 %v2712_v0  ;;  %v2715_v4 = vld [vmem:[%s3689_s3 + $0x30] sm:$0xff]   ;;  %v121_v26 = vshrl.u32 %v120_v25, 7 }
   0x3   :  { %29 = vst [vmem:[#allocation2 + $0x28] sm:$0xff] %v2787_v1  ;;  %30 = vst [vmem:[#allocation2 + $0x30] sm:$0xff] %v2787_v1  ;;  %2408 = vmatpush3.bf16.msra.mxu0 %v2712_v0  ;;  %2439 = vmatprep.subr.bf16.mxu1 %v2713_v2  ;;  %v2716_v5 = vld [vmem:[%s3689_s3 + $0x68] sm:$0xff]   ;;  %v2718_v7 = vld [vmem:[%s3689_s3 + $0x60] sm:$0xff]  }
   0x4   :  { %32 = vst [vmem:[#allocation2 + $0x40] sm:$0xff] %v2787_v1  ;;  %33 = vst [vmem:[#allocation2 + $0x48] sm:$0xff] %v2787_v1  ;;  %2440 = vmatpush3.bf16.msra.mxu1 %v2713_v2  ;;  %2409 = vmatprep.subr.bf16.mxu0 %v2714_v3  ;;  %v2717_v6 = vld [vmem:[%s3689_s3 + $0x28] sm:$0xff]   ;;  %v2719_v8 = vld [vmem:[%s3689_s3 + $0x20] sm:$0xff]   ;;  %v122_v30 = vsub.s32 0, %v121_v26  ;;  %v142_v42 = vsub.s32 1, %v121_v26 }
   0x5   :  { %35 = vst [vmem:[#allocation2 + $0x58] sm:$0xff] %v2787_v1  ;;  %36 = vst [vmem:[#allocation2 + $0x60] sm:$0xff] %v2787_v1  ;;  %2441 = vmatprep.subr.bf16.mxu1 %v2715_v4  ;;  %v2720_v9 = vld [vmem:[%s3689_s3 + $0x58] sm:$0xff]   ;;  %v2722_v11 = vld [vmem:[%s3689_s3 + $0x50] sm:$0xff]  }
   0x6   :  { %38 = vst [vmem:[#allocation2 + $0x70] sm:$0xff] %v2787_v1  ;;  %39 = vst [vmem:[#allocation2 + $0x78] sm:$0xff] %v2787_v1  ;;  %v2721_v10 = vld [vmem:[%s3689_s3 + $0x18] sm:$0xff]   ;;  %v84_v12 = vld [vmem:[%s3690_s1] sm:$0x3] }
   0x7   :  { %41 = vst [vmem:[#allocation2 + $0x88] sm:$0xff] %v2787_v1  ;;  %42 = vst [vmem:[#allocation2 + $0x90] sm:$0xff] %v2787_v1  ;;  %2410 = vmatpush3.bf16.msra.mxu0 %v2714_v3  ;;  %v2723_v13 = vld [vmem:[%s3689_s3 + $0x10] sm:$0xff]   ;;  %v87_v14 = vmul.f32 0.0078125, %v84_v12  ;;  %v2724_v16 = vld [vmem:[%s3689_s3 + $0x48] sm:$0xff]  }
   0x8   :  { %44 = vst [vmem:[#allocation2 + $0xa0] sm:$0xff] %v2787_v1  ;;  %45 = vst [vmem:[#allocation2 + $0xa8] sm:$0xff] %v2787_v1  ;;  %2442 = vmatpush3.bf16.msra.mxu1 %v2715_v4  ;;  %2411 = vmatprep.subr.bf16.mxu0 %v2716_v5  ;;  %v2725_v17 = vld [vmem:[%s3689_s3 + $0x8] sm:$0xff]   ;;  %v2726_v20 = vld [vmem:[%s3689_s3 + $0x40] sm:$0xff]  }
   0x9   :  { %47 = vst [vmem:[#allocation2 + $0xb8] sm:$0xff] %v2787_v1  ;;  %48 = vst [vmem:[#allocation2 + $0xc0] sm:$0xff] %v2787_v1  ;;  %2443 = vmatprep.subr.bf16.mxu1 %v2717_v6  ;;  %v88_v15 = vmul.f32 %v87_v14, %v87_v14  ;;  %v2727_v21 = vld [vmem:[%s3689_s3] sm:$0xff]   ;;  %v2916_v23 = vld [vmem:[%s3689_s3 + $0xb8] sm:$0xff]  }
   0xa   :  { %50 = vst [vmem:[#allocation2 + $0xd0] sm:$0xff] %v2787_v1  ;;  %51 = vst [vmem:[#allocation2 + $0xd8] sm:$0xff] %v2787_v1  ;;  %v2921_v24 = vld [vmem:[%s3689_s3 + $0xf8] sm:$0xff]   ;;  %v86_v28 = vld [vmem:[%s3691_s2] sm:$0x3] }
   0xb   :  { %52 = vst [vmem:[#allocation2 + $0xe0] sm:$0xff] %v2787_v1  ;;  %53 = vst [vmem:[#allocation2 + $0xe8] sm:$0xff] %v2787_v1  ;;  %2412 = vmatpush3.bf16.msra.mxu0 %v2716_v5  ;;  %v90_v18 = vrot.slane %v88_v15, 7  ;;  %v104_v32 = vld [vmem:[%s3692_s0] sm:$0xff]  ;;  %v105_v33 = vld [vmem:[%s3692_s0 + $0x8] sm:$0xff] }
   0xc   :  { %54 = vst [vmem:[#allocation2 + $0xf0] sm:$0xff] %v2787_v1  ;;  %55 = vst [vmem:[#allocation2 + $0xf8] sm:$0xff] %v2787_v1  ;;  %2444 = vmatpush3.bf16.msra.mxu1 %v2717_v6  ;;  %2413 = vmatprep.subr.bf16.mxu0 %v2718_v7  ;;  %v106_v34 = vld [vmem:[%s3692_s0 + $0x10] sm:$0xff]  ;;  %v107_v35 = vld [vmem:[%s3692_s0 + $0x18] sm:$0xff] }
   0xd   :  { %56 = vst [vmem:[#allocation2 + $0x100] sm:$0xff] %v2787_v1  ;;  %57 = vst [vmem:[#allocation2 + $0x108] sm:$0xff] %v2787_v1  ;;  %2445 = vmatprep.subr.bf16.mxu1 %v2719_v8  ;;  %v92_v19 = vsub.f32 %v87_v14, %v90_v18  ;;  %v108_v38 = vld [vmem:[%s3692_s0 + $0x20] sm:$0xff]  ;;  %v109_v39 = vld [vmem:[%s3692_s0 + $0x28] sm:$0xff] }
   0xe   :  { %59 = vst [vmem:[#allocation2 + $0x118] sm:$0xff] %v2787_v1  ;;  %60 = vst [vmem:[#allocation2 + $0x120] sm:$0xff] %v2787_v1  ;;  %v110_v40 = vld [vmem:[%s3692_s0 + $0x30] sm:$0xff]  ;;  %v112_v41 = vld [vmem:[%s3692_s0 + $0x40] sm:$0xff] }
   0xf   :  { %62 = vst [vmem:[#allocation2 + $0x130] sm:$0xff] %v2787_v1  ;;  %63 = vst [vmem:[#allocation2 + $0x138] sm:$0xff] %v2787_v1  ;;  %2414 = vmatpush3.bf16.msra.mxu0 %v2718_v7  ;;  %v93_v22 = vadd.f32 1e-05, %v92_v19  ;;  %v113_v43 = vld [vmem:[%s3692_s0 + $0x48] sm:$0xff]  ;;  %v114_v44 = vld [vmem:[%s3692_s0 + $0x50] sm:$0xff] }
  0x10   :  { %65 = vst [vmem:[#allocation2 + $0x148] sm:$0xff] %v2787_v1  ;;  %66 = vst [vmem:[#allocation2 + $0x150] sm:$0xff] %v2787_v1  ;;  %2446 = vmatpush3.bf16.msra.mxu1 %v2719_v8  ;;  %2415 = vmatprep.subr.bf16.mxu0 %v2720_v9  ;;  %v115_v45 = vld [vmem:[%s3692_s0 + $0x58] sm:$0xff]  ;;  %v116_v47 = vld [vmem:[%s3692_s0 + $0x60] sm:$0xff] }
  0x11   :  { %68 = vst [vmem:[#allocation2 + $0x160] sm:$0xff] %v2787_v1  ;;  %69 = vst [vmem:[#allocation2 + $0x168] sm:$0xff] %v2787_v1  ;;  %2447 = vmatprep.subr.bf16.mxu1 %v2721_v10  ;;  %2784 = vrsqrt.f32 %v93_v22  ;;  %v117_v48 = vld [vmem:[%s3692_s0 + $0x68] sm:$0xff]  ;;  %v118_v50 = vld [vmem:[%s3692_s0 + $0x70] sm:$0xff] }
  0x12   :  { %71 = vst [vmem:[#allocation2 + $0x178] sm:$0xff] %v2787_v1  ;;  %72 = vst [vmem:[#allocation2 + $0x180] sm:$0xff] %v2787_v1  ;;  %v111_v55 = vld [vmem:[%s3692_s0 + $0x38] sm:$0xff] }
  0x13   :  { %74 = vst [vmem:[#allocation2 + $0x190] sm:$0xff] %v2787_v1  ;;  %75 = vst [vmem:[#allocation2 + $0x198] sm:$0xff] %v2787_v1  ;;  %2416 = vmatpush3.bf16.msra.mxu0 %v2720_v9 }
  0x14   :  { %77 = vst [vmem:[#allocation2 + $0x1a8] sm:$0xff] %v2787_v1  ;;  %78 = vst [vmem:[#allocation2 + $0x1b0] sm:$0xff] %v2787_v1  ;;  %2448 = vmatpush3.bf16.msra.mxu1 %v2721_v10  ;;  %2417 = vmatprep.subr.bf16.mxu0 %v2722_v11 }
  0x15   :  { %80 = vst [vmem:[#allocation2 + $0x1c0] sm:$0xff] %v2787_v1  ;;  %81 = vst [vmem:[#allocation2 + $0x1c8] sm:$0xff] %v2787_v1  ;;  %2449 = vmatprep.subr.bf16.mxu1 %v2723_v13 }
  0x16   :  { %82 = vst [vmem:[#allocation2 + $0x1d0] sm:$0xff] %v2787_v1  ;;  %83 = vst [vmem:[#allocation2 + $0x1d8] sm:$0xff] %v2787_v1 }
  0x17   :  { %2418 = vmatpush3.bf16.msra.mxu0 %v2722_v11 }
  0x18   :  { %2450 = vmatpush3.bf16.msra.mxu1 %v2723_v13  ;;  %2419 = vmatprep.subr.bf16.mxu0 %v2724_v16 }
  0x19   :  { %2451 = vmatprep.subr.bf16.mxu1 %v2725_v17 }
  0x1b   :  { %2420 = vmatpush3.bf16.msra.mxu0 %v2724_v16 }
  0x1c   :  { %2452 = vmatpush3.bf16.msra.mxu1 %v2725_v17  ;;  %2421 = vmatprep.subr.bf16.mxu0 %v2726_v20  ;;  %v119_v17 = vld [vmem:[%s3692_s0 + $0x78] sm:$0xff] }
  0x1d   :  { %2453 = vmatprep.subr.bf16.mxu1 %v2727_v21 }
  0x1e   :  { %v2785_v27 = vpop.eup %2784 }
  0x1f   :  { %2422 = vmatpush3.bf16.msra.mxu0 %v2726_v20  ;;  %v96_v29 = vrot.slane %v2785_v27, 1 }
  0x20   :  { %2454 = vmatpush3.bf16.msra.mxu1 %v2727_v21  ;;  %2471 = vmatprep.subr.bf16.mxu0 %v2916_v23 }
  0x21   :  { %2503 = vmatprep.subr.bf16.mxu1 %v2921_v24  ;;  %v98_v31 = vmul.f32 %v96_v29, %v86_v28 }
  0x23   :  { %v99_v36 = vmul.f32 %v98_v31, %v87_v14  ;;  %v2940_v37 = vrot.slane %v98_v31, %v122_v30 }
  0x25   :  { %v101_v46 = vrot.slane %v99_v36, 7  ;;  %v124_v49 = vmul.f32 %v2940_v37, %v104_v32  ;;  %v125_v52 = vmul.f32 %v2940_v37, %v105_v33  ;;  %v126_v53 = vmul.f32 %v2940_v37, %v106_v34 }
  0x26   :  { %v127_v54 = vmul.f32 %v2940_v37, %v107_v35  ;;  %v128_v56 = vmul.f32 %v2940_v37, %v108_v38  ;;  %v129_v57 = vmul.f32 %v2940_v37, %v109_v39  ;;  %v130_v58 = vmul.f32 %v2940_v37, %v110_v40 }
  0x27   :  { %v103_v51 = vsub.f32 %v86_v28, %v101_v46  ;;  %v132_v59 = vmul.f32 %v2940_v37, %v112_v41  ;;  %v133_v61 = vmul.f32 %v2940_v37, %v113_v43  ;;  %v134_v62 = vmul.f32 %v2940_v37, %v114_v44  ;;  %v2730_v28 = vld [vmem:[%s3689_s3 + $0xb0] sm:$0xff]   ;;  %v2732_v43 = vld [vmem:[%s3689_s3 + $0xa8] sm:$0xff]  }
  0x28   :  { %v135_v63 = vmul.f32 %v2940_v37, %v115_v45  ;;  %v136_v0 = vmul.f32 %v2940_v37, %v116_v47  ;;  %v137_v2 = vmul.f32 %v2940_v37, %v117_v48  ;;  %v138_v3 = vmul.f32 %v2940_v37, %v118_v50 }
  0x29   :  { %v143_v60 = vrot.slane %v103_v51, %v142_v42  ;;  %v131_v4 = vmul.f32 %v2940_v37, %v111_v55  ;;  %v139_v39 = vmul.f32 %v2940_v37, %v119_v17  ;;  %v193_v42 = vld [vmem:[#allocation2 + $0x7] sm:$0xff] }
  0x2b   :  { %v144_v5 = vadd.f32 %v143_v60, %v124_v49  ;;  %v145_v6 = vadd.f32 %v143_v60, %v125_v52  ;;  %v146_v7 = vadd.f32 %v143_v60, %v126_v53  ;;  %v147_v8 = vadd.f32 %v143_v60, %v127_v54 }
  0x2c   :  { %v148_v9 = vadd.f32 %v143_v60, %v128_v56  ;;  %v149_v10 = vadd.f32 %v143_v60, %v129_v57  ;;  %v150_v11 = vadd.f32 %v143_v60, %v130_v58  ;;  %v152_v12 = vadd.f32 %v143_v60, %v132_v59 }
  0x2d   :  { %v2990_v13 = vmax.f32 %v144_v5, 0.0  ;;  %v2992_v14 = vmax.f32 %v145_v6, 0.0  ;;  %v2994_v15 = vmax.f32 %v146_v7, 0.0  ;;  %v2996_v16 = vmax.f32 %v147_v8, 0.0  ;;  %v201_v5 = vld [vmem:[#allocation2 + $0xf7] sm:$0xff] }
  0x2e   :  { %v3001_v18 = vmax.f32 %v148_v9, 0.0  ;;  %v3003_v19 = vmax.f32 %v149_v10, 0.0  ;;  %v3005_v20 = vmax.f32 %v150_v11, 0.0  ;;  %v3007_v21 = vmax.f32 %v152_v12, 0.0  ;;  %v2735_v9 = vld [vmem:[%s3689_s3 + $0xe0] sm:$0xff]   ;;  %v2738_v10 = vld [vmem:[%s3689_s3 + $0x90] sm:$0xff]  }
  0x2f   :  { %177 = vst [vmem:[#allocation2 + $0x20] sm:$0xff] %v2990_v13  ;;  %v249_v22 = vpack.c.bf16 %v2990_v13, %v2787_v1  ;;  %178 = vst [vmem:[#allocation2 + $0x38] sm:$0xff] %v2992_v14  ;;  %v3016_v25 = vpack.c.bf16 %v2994_v15, %v2992_v14  ;;  %v153_v26 = vadd.f32 %v143_v60, %v133_v61 }
  0x30   :  { %179 = vst [vmem:[#allocation2 + $0x50] sm:$0xff] %v2994_v15  ;;  %180 = vst [vmem:[#allocation2 + $0x68] sm:$0xff] %v2996_v16  ;;  %v154_v27 = vadd.f32 %v143_v60, %v134_v62  ;;  %v3025_v29 = vpack.c.bf16 %v3001_v18, %v2996_v16  ;;  %v155_v30 = vadd.f32 %v143_v60, %v135_v63  ;;  %v2734_v63 = vld [vmem:[%s3689_s3 + $0xa0] sm:$0xff]   ;;  %v2747_v62 = vld [vmem:[%s3689_s3 + $0x170] sm:$0xff]  }
  0x31   :  { %181 = vst [vmem:[#allocation2 + $0x80] sm:$0xff] %v3001_v18  ;;  %182 = vst [vmem:[#allocation2 + $0x98] sm:$0xff] %v3003_v19  ;;  %2423 = vmatprep.mubr.bf16.mxu0 %v249_v22  ;;  %v3030_v31 = vmax.f32 %v153_v26, 0.0  ;;  %v156_v33 = vadd.f32 %v143_v60, %v136_v0  ;;  %v157_v34 = vadd.f32 %v143_v60, %v137_v2  ;;  %v2737_v22 = vld [vmem:[%s3689_s3 + $0xd8] sm:$0xff]  }
  0x32   :  { %183 = vst [vmem:[#allocation2 + $0xb0] sm:$0xff] %v3005_v20  ;;  %185 = vst [vmem:[#allocation2 + $0x110] sm:$0xff] %v3007_v21  ;;  %v3032_v32 = vmax.f32 %v154_v27, 0.0  ;;  %2424 = vmatmul.mubr.bf16.vlgmr.msra.gmra.mxu0 %v3016_v25  ;;  %v3035_v35 = vmax.f32 %v155_v30, 0.0  ;;  %v158_v36 = vadd.f32 %v143_v60, %v138_v3  ;;  %v151_v38 = vadd.f32 %v143_v60, %v131_v4  ;;  %v2733_v4 = vld [vmem:[%s3689_s3 + $0xe8] sm:$0xff]  }
  0x33   :  { %2472 = vmatpush3.bf16.msra.mxu0 %v2916_v23  ;;  %2427 = vmatprep.mubr.bf16.mxu0 %v3025_v29  ;;  %186 = vst [vmem:[#allocation2 + $0x128] sm:$0xff] %v3030_v31  ;;  %v3042_v40 = vmax.f32 %v156_v33, 0.0  ;;  %v3044_v41 = vmax.f32 %v157_v34, 0.0  ;;  %v159_v44 = vadd.f32 %v143_v60, %v139_v39  ;;  %v985_v45 = vpack.c.bf16 %v2996_v16, %v2994_v15  ;;  %v2731_v60 = vld [vmem:[%s3689_s3 + $0xf0] sm:$0xff]   ;;  %v2740_v27 = vld [vmem:[%s3689_s3 + $0x88] sm:$0xff]  }
  0x34   :  { %187 = vst [vmem:[#allocation2 + $0x140] sm:$0xff] %v3032_v32  ;;  %2473 = vmatprep.subr.bf16.mxu0 %v2730_v28  ;;  %188 = vst [vmem:[#allocation2 + $0x158] sm:$0xff] %v3035_v35  ;;  %v3050_v37 = vmax.f32 %v158_v36, 0.0  ;;  %v3052_v23 = vmax.f32 %v151_v38, 0.0  ;;  %v986_v46 = vpack.c.bf16 %v3003_v19, %v3001_v18  ;;  %v3072_v52 = vpack.c.bf16 %v3005_v20, %v3003_v19  ;;  %v564_v30 = vld [vmem:[#allocation2 + $0x9] sm:$0xff]  ;;  %v2766_v18 = vld [vmem:[%s3689_s3 + $0x1a0] sm:$0xff]  }
  0x35   :  { %189 = vst [vmem:[#allocation2 + $0x170] sm:$0xff] %v3042_v40  ;;  %190 = vst [vmem:[#allocation2 + $0x188] sm:$0xff] %v3044_v41  ;;  %v3076_v53 = vmax.f32 %v159_v44, 0.0  ;;  %v253_v0 = vpack.c.bf16 %v3007_v21, %v2787_v1  ;;  %v3128_v7 = vpack.c.bf16 %v3032_v32, %v3030_v31  ;;  %v3141_v12 = vpack.c.bf16 %v3042_v40, %v3035_v35  ;;  %v2739_v39 = vld [vmem:[%s3689_s3 + $0xd0] sm:$0xff]  }
  0x36   :  { %v3064_v49 = vld [vmem:[#allocation2 + $0x1f] sm:$0xff]  ;;  %v3066_v50 = vld [vmem:[#allocation2 + $0x37] sm:$0xff]  ;;  %191 = vst [vmem:[#allocation2 + $0x1a0] sm:$0xff] %v3050_v37  ;;  %184 = vst [vmem:[#allocation2 + $0xc8] sm:$0xff] %v3052_v23  ;;  %v987_v54 = vpack.c.bf16 %v3052_v23, %v3005_v20  ;;  %v3164_v34 = vpack.c.bf16 %v3050_v37, %v3044_v41 }
  0x37   :  { %v3068_v51 = vld [vmem:[#allocation2 + $0x4f] sm:$0xff]  ;;  %v209_v56 = vpack.c.bf16 %v3064_v49, %v193_v42  ;;  %2474 = vmatpush3.bf16.msra.mxu0 %v2730_v28  ;;  %v3087_v58 = vld [vmem:[#allocation2 + $0x67] sm:$0xff]  ;;  %192 = vst [vmem:[#allocation2 + $0x1b8] sm:$0xff] %v3076_v53 }
  0x38   :  { %v3085_v57 = vpack.c.bf16 %v3068_v51, %v3066_v50  ;;  %v3089_v59 = vld [vmem:[#allocation2 + $0x7f] sm:$0xff]  ;;  %2475 = vmatprep.subr.bf16.mxu0 %v2732_v43  ;;  %v3110_v2 = vld [vmem:[#allocation2 + $0x97] sm:$0xff] }
  0x39   :  { %v3096_v61 = vpack.c.bf16 %v3089_v59, %v3087_v58  ;;  %2455 = vmatprep.mubr.bf16.mxu1 %v209_v56  ;;  %v3112_v3 = vld [vmem:[#allocation2 + $0xaf] sm:$0xff]  ;;  %v3166_v36 = vld [vmem:[#allocation2 + $0x21] sm:$0xff] }
  0x3a   :  { %2456 = vmatmul.mubr.bf16.vlgmr.msra.gmra.mxu1 %v3085_v57  ;;  %2428 = vmatmul.mubr.bf16.gmra.mxu0 %v3072_v52  ;;  %v3117_v1 = vld [vmem:[#allocation2 + $0x10f] sm:$0xff]  ;;  %v3124_v6 = vpack.c.bf16 %v3112_v3, %v3110_v2  ;;  %v3137_v11 = vld [vmem:[#allocation2 + $0x127] sm:$0xff] }
  0x3b   :  { %2504 = vmatpush3.bf16.msra.mxu1 %v2921_v24  ;;  %2459 = vmatprep.mubr.bf16.mxu1 %v3096_v61  ;;  %v2736_v24 = vld [vmem:[%s3689_s3 + $0x98] sm:$0xff]   ;;  %v213_v8 = vpack.c.bf16 %v3117_v1, %v201_v5  ;;  %v2742_v42 = vld [vmem:[%s3689_s3 + $0x80] sm:$0xff]   ;;  %v2741_v56 = vld [vmem:[%s3689_s3 + $0xc8] sm:$0xff]  }
  0x3c   :  { %2505 = vmatprep.subr.bf16.mxu1 %v2731_v60  ;;  %2476 = vmatpush3.bf16.msra.mxu0 %v2732_v43  ;;  %v3145_v17 = vld [vmem:[#allocation2 + $0x13f] sm:$0xff]  ;;  %v3150_v26 = vld [vmem:[#allocation2 + $0x157] sm:$0xff]  ;;  %v3155_v28 = vld [vmem:[#allocation2 + $0x16f] sm:$0xff]  ;;  %v580_v43 = vpack.c.bf16 %v3166_v36, %v564_v30 }
  0x3d   :  { %2477 = vmatprep.subr.bf16.mxu0 %v2734_v63  ;;  %2431 = vmatprep.mubr.bf16.mxu0 %v253_v0  ;;  %v3160_v33 = vpack.c.bf16 %v3145_v17, %v3137_v11  ;;  %v3170_v38 = vpack.c.bf16 %v3155_v28, %v3150_v26  ;;  %v3181_v44 = vld [vmem:[#allocation2 + $0x187] sm:$0xff]  ;;  %v3192_v0 = vld [vmem:[#allocation2 + $0x39] sm:$0xff]  ;;  %v3267_v55 = vld [vmem:[#allocation2 + $0x171] sm:$0xff] }
  0x3e   :  { %v3196_v5 = vld [vmem:[#allocation2 + $0x69] sm:$0xff]  ;;  %v3226_v30 = vld [vmem:[#allocation2 + $0x99] sm:$0xff] }
  0x3f   :  { %2506 = vmatpush3.bf16.msra.mxu1 %v2731_v60  ;;  %v3187_v60 = vld [vmem:[#allocation2 + $0x19f] sm:$0xff]  ;;  %v2763_v16 = vld [vmem:[%s3689_s3 + $0x1f0] sm:$0xff]  }
  0x40   :  { %2507 = vmatprep.subr.bf16.mxu1 %v2733_v4  ;;  %2478 = vmatpush3.bf16.msra.mxu0 %v2734_v63  ;;  %v2744_v63 = vld [vmem:[%s3689_s3 + $0x138] sm:$0xff]   ;;  %v3354_v19 = vld [vmem:[#allocation2 + $0xc9] sm:$0xff] }
  0x41   :  { %2479 = vmatprep.subr.bf16.mxu0 %v2736_v24 }
  0x42   :  { %2460 = vmatmul.mubr.bf16.gmra.mxu1 %v3124_v6  ;;  %2432 = vmatmul.mubr.bf16.gmra.mxu0 %v3128_v7 }
  0x43   :  { %2508 = vmatpush3.bf16.msra.mxu1 %v2733_v4  ;;  %2463 = vmatprep.mubr.bf16.mxu1 %v213_v8  ;;  %v3194_v4 = vld [vmem:[#allocation2 + $0x51] sm:$0xff]  ;;  %v3202_v8 = vld [vmem:[#allocation2 + $0x81] sm:$0xff] }
  0x44   :  { %2509 = vmatprep.subr.bf16.mxu1 %v2735_v9  ;;  %2480 = vmatpush3.bf16.msra.mxu0 %v2736_v24  ;;  %v3200_v24 = vpack.c.bf16 %v3187_v60, %v3181_v44  ;;  %v1188_v15 = vpack.c.bf16 %v3226_v30, %v3202_v8 }
  0x45   :  { %2481 = vmatprep.subr.bf16.mxu0 %v2738_v10  ;;  %2435 = vmatprep.mubr.bf16.mxu0 %v3141_v12 }
  0x47   :  { %2510 = vmatpush3.bf16.msra.mxu1 %v2735_v9  ;;  %v782_v9 = vpack.c.bf16 %v3066_v50, %v3064_v49  ;;  %v2746_v49 = vld [vmem:[%s3689_s3 + $0x130] sm:$0xff]   ;;  %v2745_v50 = vld [vmem:[%s3689_s3 + $0x178] sm:$0xff]  }
  0x48   :  { %2511 = vmatprep.subr.bf16.mxu1 %v2737_v22  ;;  %2482 = vmatpush3.bf16.msra.mxu0 %v2738_v10  ;;  %v2743_v10 = vld [vmem:[%s3689_s3 + $0xc0] sm:$0xff]  }
  0x49   :  { %2483 = vmatprep.subr.bf16.mxu0 %v2740_v27 }
  0x4a   :  { %2464 = vmatmul.mubr.bf16.gmra.mxu1 %v3160_v33  ;;  %2436 = vmatmul.mubr.bf16.gmra.mxu0 %v3164_v34 }
  0x4b   :  { %2512 = vmatpush3.bf16.msra.mxu1 %v2737_v22  ;;  %2467 = vmatprep.mubr.bf16.mxu1 %v3170_v38  ;;  %v3211_v22 = vpack.c.bf16 %v3194_v4, %v3192_v0 }
  0x4c   :  { %2513 = vmatprep.subr.bf16.mxu1 %v2739_v39  ;;  %2484 = vmatpush3.bf16.msra.mxu0 %v2740_v27  ;;  %v3215_v27 = vpack.c.bf16 %v3202_v8, %v3196_v5  ;;  %v2769_v8 = vld [vmem:[%s3689_s3 + $0x1d8] sm:$0xff]  }
  0x4d   :  { %2485 = vmatprep.subr.bf16.mxu0 %v2742_v42  ;;  %2487 = vmatprep.mubr.bf16.mxu0 %v580_v43  ;;  %v2748_v43 = vld [vmem:[%s3689_s3 + $0x128] sm:$0xff]  }
  0x4f   :  { %2514 = vmatpush3.bf16.msra.mxu1 %v2739_v39  ;;  %v3228_v39 = vld [vmem:[#allocation2 + $0xb1] sm:$0xff] }
  0x50   :  { %2515 = vmatprep.subr.bf16.mxu1 %v2741_v56  ;;  %2486 = vmatpush3.bf16.msra.mxu0 %v2742_v42  ;;  %v783_v42 = vpack.c.bf16 %v3087_v58, %v3068_v51  ;;  %v3244_v51 = vpack.c.bf16 %v3228_v39, %v3226_v30  ;;  %v3697_v30 = vpack.c.bf16 %v3044_v41, %v3042_v40  ;;  %v2774_v40 = vld [vmem:[%s3689_s3 + $0x180] sm:$0xff]  }
  0x51   :  { %2535 = vmatprep.subr.bf16.mxu0 %v2744_v63  ;;  %v3400_v41 = vld [vmem:[#allocation2 + $0x1b9] sm:$0xff] }
  0x52   :  { %2468 = vmatmul.mubr.bf16.gmra.mxu1 %v3200_v24 }
  0x53   :  { %2516 = vmatpush3.bf16.msra.mxu1 %v2741_v56  ;;  %2519 = vmatprep.mubr.bf16.mxu1 %v782_v9  ;;  %v572_v56 = vld [vmem:[#allocation2 + $0xf9] sm:$0xff]  ;;  %v3235_v9 = vld [vmem:[#allocation2 + $0x111] sm:$0xff] }
  0x54   :  { %2517 = vmatprep.subr.bf16.mxu1 %v2743_v10  ;;  %2488 = vmatmul.mubr.bf16.vlgmr.msra.gmra.mxu0 %v3211_v22  ;;  %v584_v58 = vpack.c.bf16 %v3235_v9, %v572_v56 }
  0x55   :  { %2536 = vmatpush3.bf16.msra.mxu0 %v2744_v63  ;;  %2491 = vmatprep.mubr.bf16.mxu0 %v3215_v27  ;;  %v784_v63 = vpack.c.bf16 %v3110_v2, %v3089_v59  ;;  %v3250_v59 = vld [vmem:[#allocation2 + $0xc7] sm:$0xff] }
  0x56   :  { %2537 = vmatprep.subr.bf16.mxu0 %v2746_v49  ;;  %v2749_v2 = vld [vmem:[%s3689_s3 + $0x168] sm:$0xff]   ;;  %v785_v56 = vpack.c.bf16 %v3250_v59, %v3112_v3 }
  0x57   :  { %2518 = vmatpush3.bf16.msra.mxu1 %v2743_v10  ;;  %v2750_v10 = vld [vmem:[%s3689_s3 + $0x120] sm:$0xff]  }
  0x58   :  { %2567 = vmatprep.subr.bf16.mxu1 %v2745_v50 }
  0x59   :  { %2538 = vmatpush3.bf16.msra.mxu0 %v2746_v49  ;;  %v3256_v49 = vld [vmem:[#allocation2 + $0x129] sm:$0xff] }
  0x5a   :  { %2520 = vmatmul.mubr.bf16.vlgmr.msra.gmra.mxu1 %v783_v42  ;;  %2539 = vmatprep.subr.bf16.mxu0 %v2748_v43  ;;  %v3258_v42 = vld [vmem:[#allocation2 + $0x141] sm:$0xff]  ;;  %v1190_v20 = vpack.c.bf16 %v3256_v49, %v3235_v9 }
  0x5b   :  { %2568 = vmatpush3.bf16.msra.mxu1 %v2745_v50  ;;  %2523 = vmatprep.mubr.bf16.mxu1 %v784_v63  ;;  %v2752_v50 = vld [vmem:[%s3689_s3 + $0x118] sm:$0xff]   ;;  %v3276_v3 = vpack.c.bf16 %v3258_v42, %v3256_v49  ;;  %v2772_v9 = vld [vmem:[%s3689_s3 + $0x188] sm:$0xff]  }
  0x5c   :  { %2569 = vmatprep.subr.bf16.mxu1 %v2747_v62  ;;  %2492 = vmatmul.mubr.bf16.gmra.mxu0 %v3244_v51  ;;  %v3265_v63 = vld [vmem:[#allocation2 + $0x159] sm:$0xff]  ;;  %v2773_v49 = vld [vmem:[%s3689_s3 + $0x1c8] sm:$0xff]  }
  0x5d   :  { %2540 = vmatpush3.bf16.msra.mxu0 %v2748_v43  ;;  %2495 = vmatprep.mubr.bf16.mxu0 %v584_v58  ;;  %v786_v43 = vpack.c.bf16 %v3137_v11, %v3117_v1  ;;  %v2751_v58 = vld [vmem:[%s3689_s3 + $0x160] sm:$0xff]   ;;  %v3280_v48 = vpack.c.bf16 %v3267_v55, %v3265_v63  ;;  %v2753_v1 = vld [vmem:[%s3689_s3 + $0x158] sm:$0xff]   ;;  %v3290_v11 = vld [vmem:[#allocation2 + $0x189] sm:$0xff] }
  0x5e   :  { %2541 = vmatprep.subr.bf16.mxu0 %v2750_v10 }
  0x5f   :  { %2570 = vmatpush3.bf16.msra.mxu1 %v2747_v62  ;;  %v2754_v62 = vld [vmem:[%s3689_s3 + $0x110] sm:$0xff]  }
  0x60   :  { %2571 = vmatprep.subr.bf16.mxu1 %v2749_v2 }
  0x61   :  { %2542 = vmatpush3.bf16.msra.mxu0 %v2750_v10  ;;  %v3292_v10 = vld [vmem:[#allocation2 + $0x1a1] sm:$0xff] }
  0x62   :  { %2524 = vmatmul.mubr.bf16.gmra.mxu1 %v785_v56  ;;  %2543 = vmatprep.subr.bf16.mxu0 %v2752_v50  ;;  %v787_v56 = vpack.c.bf16 %v3150_v26, %v3145_v17  ;;  %v3306_v47 = vpack.c.bf16 %v3292_v10, %v3290_v11  ;;  %v984_v17 = vpack.c.bf16 %v2992_v14, %v2990_v13  ;;  %v2758_v26 = vld [vmem:[%s3689_s3 + $0x100] sm:$0xff]   ;;  %v2760_v14 = vld [vmem:[%s3689_s3 + $0x1b8] sm:$0xff]  }
  0x63   :  { %2572 = vmatpush3.bf16.msra.mxu1 %v2749_v2  ;;  %2527 = vmatprep.mubr.bf16.mxu1 %v786_v43  ;;  %v2756_v2 = vld [vmem:[%s3689_s3 + $0x108] sm:$0xff]   ;;  %v788_v43 = vpack.c.bf16 %v3181_v44, %v3155_v28  ;;  %v3313_v28 = vld [vmem:[#allocation2 + $0x1b7] sm:$0xff] }
  0x64   :  { %2573 = vmatprep.subr.bf16.mxu1 %v2751_v58  ;;  %2496 = vmatmul.mubr.bf16.gmra.mxu0 %v3276_v3  ;;  %v2757_v44 = vld [vmem:[%s3689_s3 + $0x148] sm:$0xff]   ;;  %v789_v13 = vpack.c.bf16 %v3313_v28, %v3187_v60  ;;  %v2762_v60 = vld [vmem:[%s3689_s3 + $0x1b0] sm:$0xff]  }
  0x65   :  { %2544 = vmatpush3.bf16.msra.mxu0 %v2752_v50  ;;  %2499 = vmatprep.mubr.bf16.mxu0 %v3280_v48  ;;  %v2755_v50 = vld [vmem:[%s3689_s3 + $0x150] sm:$0xff]  }
  0x66   :  { %2545 = vmatprep.subr.bf16.mxu0 %v2754_v62 }
  0x67   :  { %2574 = vmatpush3.bf16.msra.mxu1 %v2751_v58  ;;  %v1186_v58 = vpack.c.bf16 %v3192_v0, %v3166_v36  ;;  %v2761_v36 = vld [vmem:[%s3689_s3 + $0x1f8] sm:$0xff]   ;;  %v1187_v0 = vpack.c.bf16 %v3196_v5, %v3194_v4  ;;  %v1189_v4 = vpack.c.bf16 %v3354_v19, %v3228_v39  ;;  %v1191_v39 = vpack.c.bf16 %v3265_v63, %v3258_v42 }
  0x68   :  { %2575 = vmatprep.subr.bf16.mxu1 %v2753_v1  ;;  %v2768_v5 = vld [vmem:[%s3689_s3 + $0x198] sm:$0xff]   ;;  %v1193_v42 = vpack.c.bf16 %v3400_v41, %v3292_v10  ;;  %v2778_v10 = vld [vmem:[%s3689_s3 + $0x228] sm:$0xff]  }
  0x69   :  { %2546 = vmatpush3.bf16.msra.mxu0 %v2754_v62  ;;  %v2759_v62 = vld [vmem:[%s3689_s3 + $0x140] sm:$0xff]   ;;  %v2776_v63 = vld [vmem:[%s3689_s3 + $0x238] sm:$0xff]  }
  0x6a   :  { %2528 = vmatmul.mubr.bf16.gmra.mxu1 %v787_v56  ;;  %2547 = vmatprep.subr.bf16.mxu0 %v2756_v2 }
  0x6b   :  { %2576 = vmatpush3.bf16.msra.mxu1 %v2753_v1  ;;  %2531 = vmatprep.mubr.bf16.mxu1 %v788_v43  ;;  %v2764_v1 = vld [vmem:[%s3689_s3 + $0x1a8] sm:$0xff]  }
  0x6c   :  { %2577 = vmatprep.subr.bf16.mxu1 %v2755_v50  ;;  %2500 = vmatmul.mubr.bf16.gmra.mxu0 %v3306_v47 }
  0x6d   :  { %2548 = vmatpush3.bf16.msra.mxu0 %v2756_v2  ;;  %2551 = vmatprep.mubr.bf16.mxu0 %v984_v17 }
  0x6e   :  { %2549 = vmatprep.subr.bf16.mxu0 %v2758_v26 }
  0x6f   :  { %2578 = vmatpush3.bf16.msra.mxu1 %v2755_v50 }
  0x70   :  { %2579 = vmatprep.subr.bf16.mxu1 %v2757_v44 }
  0x71   :  { %2550 = vmatpush3.bf16.msra.mxu0 %v2758_v26 }
  0x72   :  { %2532 = vmatmul.mubr.bf16.gmra.mxu1 %v789_v13  ;;  %2599 = vmatprep.subr.bf16.mxu0 %v2760_v14 }
  0x73   :  { %2580 = vmatpush3.bf16.msra.mxu1 %v2757_v44  ;;  %2583 = vmatprep.mubr.bf16.mxu1 %v1186_v58 }
  0x74   :  { %2581 = vmatprep.subr.bf16.mxu1 %v2759_v62  ;;  %2552 = vmatmul.mubr.bf16.vlgmr.msra.gmra.mxu0 %v985_v45  ;;  %v2765_v45 = vld [vmem:[%s3689_s3 + $0x1e8] sm:$0xff]  }
  0x75   :  { %2600 = vmatpush3.bf16.msra.mxu0 %v2760_v14  ;;  %2555 = vmatprep.mubr.bf16.mxu0 %v986_v46  ;;  %v3695_v46 = vpack.c.bf16 %v3030_v31, %v3007_v21  ;;  %v2770_v21 = vld [vmem:[%s3689_s3 + $0x190] sm:$0xff]   ;;  %v3696_v31 = vpack.c.bf16 %v3035_v35, %v3032_v32  ;;  %v1192_v32 = vpack.c.bf16 %v3290_v11, %v3267_v55  ;;  %v1380_v11 = vld [vmem:[#allocation2 + $0xdf] sm:$0xff] }
  0x76   :  { %2601 = vmatprep.subr.bf16.mxu0 %v2762_v60  ;;  %v2771_v35 = vld [vmem:[%s3689_s3 + $0x1d0] sm:$0xff]   ;;  %v3698_v55 = vpack.c.bf16 %v3076_v53, %v3050_v37  ;;  %v2775_v37 = vld [vmem:[%s3689_s3 + $0x1c0] sm:$0xff]   ;;  %v1392_v56 = vpack.c.bf16 %v1380_v11, %v3250_v59 }
  0x77   :  { %2582 = vmatpush3.bf16.msra.mxu1 %v2759_v62 }
  0x78   :  { %2631 = vmatprep.subr.bf16.mxu1 %v2761_v36 }
  0x79   :  { %2602 = vmatpush3.bf16.msra.mxu0 %v2762_v60 }
  0x7a   :  { %2584 = vmatmul.mubr.bf16.vlgmr.msra.gmra.mxu1 %v1187_v0  ;;  %2603 = vmatprep.subr.bf16.mxu0 %v2764_v1 }
  0x7b   :  { %2632 = vmatpush3.bf16.msra.mxu1 %v2761_v36  ;;  %2587 = vmatprep.mubr.bf16.mxu1 %v1188_v15 }
  0x7c   :  { %2633 = vmatprep.subr.bf16.mxu1 %v2763_v16  ;;  %2556 = vmatmul.mubr.bf16.gmra.mxu0 %v987_v54  ;;  %v2767_v54 = vld [vmem:[%s3689_s3 + $0x1e0] sm:$0xff]  }
  0x7d   :  { %2604 = vmatpush3.bf16.msra.mxu0 %v2764_v1  ;;  %2559 = vmatprep.mubr.bf16.mxu0 %v3695_v46 }
  0x7e   :  { %2605 = vmatprep.subr.bf16.mxu0 %v2766_v18 }
  0x7f   :  { %2634 = vmatpush3.bf16.msra.mxu1 %v2763_v16 }
  0x80   :  { %2635 = vmatprep.subr.bf16.mxu1 %v2765_v45 }
  0x81   :  { %2606 = vmatpush3.bf16.msra.mxu0 %v2766_v18 }
  0x82   :  { %2588 = vmatmul.mubr.bf16.gmra.mxu1 %v1189_v4  ;;  %2607 = vmatprep.subr.bf16.mxu0 %v2768_v5 }
  0x83   :  { %2636 = vmatpush3.bf16.msra.mxu1 %v2765_v45  ;;  %2591 = vmatprep.mubr.bf16.mxu1 %v1190_v20 }
  0x84   :  { %2637 = vmatprep.subr.bf16.mxu1 %v2767_v54  ;;  %2560 = vmatmul.mubr.bf16.gmra.mxu0 %v3696_v31 }
  0x85   :  { %2608 = vmatpush3.bf16.msra.mxu0 %v2768_v5  ;;  %2563 = vmatprep.mubr.bf16.mxu0 %v3697_v30 }
  0x86   :  { %2609 = vmatprep.subr.bf16.mxu0 %v2770_v21 }
  0x87   :  { %2638 = vmatpush3.bf16.msra.mxu1 %v2767_v54 }
  0x88   :  { %2639 = vmatprep.subr.bf16.mxu1 %v2769_v8 }
  0x89   :  { %2610 = vmatpush3.bf16.msra.mxu0 %v2770_v21 }
  0x8a   :  { %2592 = vmatmul.mubr.bf16.gmra.mxu1 %v1191_v39  ;;  %2611 = vmatprep.subr.bf16.mxu0 %v2772_v9 }
  0x8b   :  { %2640 = vmatpush3.bf16.msra.mxu1 %v2769_v8  ;;  %2595 = vmatprep.mubr.bf16.mxu1 %v1192_v32 }
  0x8c   :  { %2641 = vmatprep.subr.bf16.mxu1 %v2771_v35  ;;  %2564 = vmatmul.mubr.bf16.gmra.mxu0 %v3698_v55 }
  0x8d   :  { %2612 = vmatpush3.bf16.msra.mxu0 %v2772_v9  ;;  %2615 = vmatprep.mubr.bf16.mxu0 %v3085_v57  ;;  %v2777_v57 = vld [vmem:[%s3689_s3 + $0x230] sm:$0xff]  }
  0x8e   :  { %2613 = vmatprep.subr.bf16.mxu0 %v2774_v40 }
  0x8f   :  { %2642 = vmatpush3.bf16.msra.mxu1 %v2771_v35 }
  0x90   :  { %2643 = vmatprep.subr.bf16.mxu1 %v2773_v49 }
  0x91   :  { %2614 = vmatpush3.bf16.msra.mxu0 %v2774_v40 }
  0x92   :  { %2596 = vmatmul.mubr.bf16.gmra.mxu1 %v1193_v42  ;;  %2663 = vmatprep.subr.bf16.mxu0 %v2776_v63 }
  0x93   :  { %2644 = vmatpush3.bf16.msra.mxu1 %v2773_v49  ;;  %2647 = vmatprep.mubr.bf16.mxu1 %v3016_v25  ;;  %v2779_v25 = vld [vmem:[%s3689_s3 + $0x220] sm:$0xff]  }
  0x94   :  { %2645 = vmatprep.subr.bf16.mxu1 %v2775_v37  ;;  %2616 = vmatmul.mubr.bf16.vlgmr.msra.gmra.mxu0 %v3096_v61  ;;  %v2786_v61 = vld [vmem:[#allocation2 + $0x8] sm:$0xff] }
  0x95   :  { %2664 = vmatpush3.bf16.msra.mxu0 %v2776_v63  ;;  %2619 = vmatprep.mubr.bf16.mxu0 %v3124_v6  ;;  %v1594_v6 = vpack.c.bf16 %v2786_v61, %v3052_v23  ;;  %v1388_v23 = vld [vmem:[#allocation2 + $0x1cf] sm:$0xff] }
  0x96   :  { %2665 = vmatprep.subr.bf16.mxu0 %v2777_v57  ;;  %v1396_v59 = vpack.c.bf16 %v1388_v23, %v3313_v28 }
  0x97   :  { %2646 = vmatpush3.bf16.msra.mxu1 %v2775_v37 }
  0x98   :  { %2695 = vmatprep.subr.bf16.mxu1 %v2776_v63 }
  0x99   :  { %2666 = vmatpush3.bf16.msra.mxu0 %v2777_v57 }
  0x9a   :  { %2648 = vmatmul.mubr.bf16.vlgmr.msra.gmra.mxu1 %v3025_v29  ;;  %2667 = vmatprep.subr.bf16.mxu0 %v2778_v10  ;;  %v2780_v29 = vld [vmem:[%s3689_s3 + $0x218] sm:$0xff]  }
  0x9b   :  { %2703 = vmatpush3.bf16.msra.mxu1 %v2776_v63  ;;  %2651 = vmatprep.mubr.bf16.mxu1 %v3072_v52  ;;  %v2781_v52 = vld [vmem:[%s3689_s3 + $0x210] sm:$0xff]  }
  0x9c   :  { %2696 = vmatprep.subr.bf16.mxu1 %v2777_v57  ;;  %2620 = vmatmul.mubr.bf16.gmra.mxu0 %v1392_v56 }
  0x9d   :  { %2668 = vmatpush3.bf16.msra.mxu0 %v2778_v10  ;;  %2623 = vmatprep.mubr.bf16.mxu0 %v3160_v33  ;;  %v2782_v33 = vld [vmem:[%s3689_s3 + $0x208] sm:$0xff]  }
  0x9e   :  { %2669 = vmatprep.subr.bf16.mxu0 %v2779_v25 }
  0x9f   :  { %2704 = vmatpush3.bf16.msra.mxu1 %v2777_v57 }
  0xa0   :  { %2697 = vmatprep.subr.bf16.mxu1 %v2778_v10 }
  0xa1   :  { %2670 = vmatpush3.bf16.msra.mxu0 %v2779_v25 }
  0xa2   :  { %2652 = vmatmul.mubr.bf16.gmra.mxu1 %v1594_v6  ;;  %2671 = vmatprep.subr.bf16.mxu0 %v2780_v29 }
  0xa3   :  { %2705 = vmatpush3.bf16.msra.mxu1 %v2778_v10  ;;  %2655 = vmatprep.mubr.bf16.mxu1 %v3128_v7  ;;  %v2783_v7 = vld [vmem:[%s3689_s3 + $0x200] sm:$0xff]  }
  0xa4   :  { %2698 = vmatprep.subr.bf16.mxu1 %v2779_v25  ;;  %2624 = vmatmul.mubr.bf16.gmra.mxu0 %v3170_v38  ;;  %v1598_v38 = vpack.c.bf16 %v2786_v61, %v3076_v53  ;;  %v1792_v53 = vld [vmem:[#allocation2 + $0x1d1] sm:$0xff] }
  0xa5   :  { %2672 = vmatpush3.bf16.msra.mxu0 %v2780_v29  ;;  %2627 = vmatprep.mubr.bf16.mxu0 %v3200_v24  ;;  %v1800_v24 = vpack.c.bf16 %v1792_v53, %v3400_v41 }
  0xa6   :  { %2673 = vmatprep.subr.bf16.mxu0 %v2781_v52 }
  0xa7   :  { %2706 = vmatpush3.bf16.msra.mxu1 %v2779_v25 }
  0xa8   :  { %2699 = vmatprep.subr.bf16.mxu1 %v2780_v29 }
  0xa9   :  { %2674 = vmatpush3.bf16.msra.mxu0 %v2781_v52 }
  0xaa   :  { %2656 = vmatmul.mubr.bf16.gmra.mxu1 %v3141_v12  ;;  %2675 = vmatprep.subr.bf16.mxu0 %v2782_v33  ;;  %v1784_v12 = vld [vmem:[#allocation2 + $0xe1] sm:$0xff] }
  0xab   :  { %2707 = vmatpush3.bf16.msra.mxu1 %v2780_v29  ;;  %2659 = vmatprep.mubr.bf16.mxu1 %v3164_v34  ;;  %v1796_v34 = vpack.c.bf16 %v1784_v12, %v3354_v19 }
  0xac   :  { %2700 = vmatprep.subr.bf16.mxu1 %v2781_v52  ;;  %2628 = vmatmul.mubr.bf16.gmra.mxu0 %v1396_v59 }
  0xad   :  { %2676 = vmatpush3.bf16.msra.mxu0 %v2782_v33  ;;  %2679 = vmatprep.mubr.bf16.mxu0 %v3211_v22 }
  0xae   :  { %2677 = vmatprep.subr.bf16.mxu0 %v2783_v7 }
  0xaf   :  { %2708 = vmatpush3.bf16.msra.mxu1 %v2781_v52 }
  0xb0   :  { %2701 = vmatprep.subr.bf16.mxu1 %v2782_v33 }
  0xb1   :  { %2678 = vmatpush3.bf16.msra.mxu0 %v2783_v7 }
  0xb2   :  { %2660 = vmatmul.mubr.bf16.gmra.mxu1 %v1598_v38 }
  0xb3   :  { %2709 = vmatpush3.bf16.msra.mxu1 %v2782_v33  ;;  %2687 = vmatprep.mubr.bf16.mxu1 %v3276_v3 }
  0xb4   :  { %2702 = vmatprep.subr.bf16.mxu1 %v2783_v7  ;;  %2680 = vmatmul.mubr.bf16.vlgmr.msra.gmra.mxu0 %v3215_v27 }
  0xb5   :  { %2683 = vmatprep.mubr.bf16.mxu0 %v3244_v51 }
  0xb7   :  { %2710 = vmatpush3.bf16.msra.mxu1 %v2783_v7 }
  0xba   :  { %2688 = vmatmul.mubr.bf16.vlgmr.msra.gmra.mxu1 %v3280_v48 }
  0xbb   :  { %2691 = vmatprep.mubr.bf16.mxu1 %v3306_v47 }
  0xbc   :  { %2684 = vmatmul.mubr.bf16.gmra.mxu0 %v1796_v34 }
  0xc2   :  { %2692 = vmatmul.mubr.bf16.gmra.mxu1 %v1800_v24 }
  0xf2   :  { %v2425_v22 = vpop.f32.mrf.mxu0 }
  0xf4   :  { %v356_v3 = vpop.f32.mrf.mxu0 }
  0xf6   :  { %v2426_v2 = vpop.f32.mrf.mxu0 }
  0xf8   :  { %v359_v43 = vpop.f32.mrf.mxu0 }
  0xfa   :  { %v2457_v27 = vpop.f32.mrf.mxu1  ;;  %v2429_v50 = vpop.f32.mrf.mxu0 }
  0xfb   :  { %v510_v51 = vadd.f32 %v2457_v27, %v2425_v22 }
  0xfc   :  { %v501_v17 = vpop.f32.mrf.mxu1  ;;  %v372_v26 = vpop.f32.mrf.mxu0 }
  0xfd   :  { %v502_v28 = vadd.f32 %v501_v17, %v356_v3 }
  0xfe   :  { %v2458_v44 = vpop.f32.mrf.mxu1  ;;  %v2430_v13 = vpop.f32.mrf.mxu0 }
  0xff   :  { %v513_v48 = vadd.f32 %v2458_v44, %v2426_v2 }
 0x100   :  { %v504_v14 = vpop.f32.mrf.mxu1  ;;  %v375_v47 = vpop.f32.mrf.mxu0 }
 0x101   :  { %v505_v58 = vadd.f32 %v504_v14, %v359_v43 }
 0x102   :  { %v2461_v62 = vpop.f32.mrf.mxu1  ;;  %v2433_v60 = vpop.f32.mrf.mxu0 }
 0x103   :  { %v526_v36 = vadd.f32 %v2461_v62, %v2429_v50 }
 0x104   :  { %v517_v0 = vpop.f32.mrf.mxu1  ;;  %v388_v1 = vpop.f32.mrf.mxu0 }
 0x105   :  { %v518_v15 = vadd.f32 %v517_v0, %v372_v26 }
 0x106   :  { %v2462_v16 = vpop.f32.mrf.mxu1  ;;  %v2434_v18 = vpop.f32.mrf.mxu0 }
 0x107   :  { %v529_v19 = vadd.f32 %v2462_v16, %v2430_v13 }
 0x108   :  { %v520_v45 = vpop.f32.mrf.mxu1  ;;  %v391_v46 = vpop.f32.mrf.mxu0 }
 0x109   :  { %v521_v4 = vadd.f32 %v520_v45, %v375_v47 }
 0x10a   :  { %v2465_v5 = vpop.f32.mrf.mxu1  ;;  %v2437_v20 = vpop.f32.mrf.mxu0 }
 0x10b   :  { %v542_v54 = vadd.f32 %v2465_v5, %v2433_v60 }
 0x10c   :  { %v533_v21 = vpop.f32.mrf.mxu1  ;;  %v404_v31 = vpop.f32.mrf.mxu0 }
 0x10d   :  { %v534_v8 = vadd.f32 %v533_v21, %v388_v1 }
 0x10e   :  { %v2466_v30 = vpop.f32.mrf.mxu1  ;;  %v2438_v39 = vpop.f32.mrf.mxu0 }
 0x10f   :  { %v545_v9 = vadd.f32 %v2466_v30, %v2434_v18 }
 0x110   :  { %v536_v32 = vpop.f32.mrf.mxu1  ;;  %v407_v35 = vpop.f32.mrf.mxu0 }
 0x111   :  { %v537_v40 = vadd.f32 %v536_v32, %v391_v46 }
 0x112   :  { %v2469_v41 = vpop.f32.mrf.mxu1 }
 0x113   :  { %v558_v55 = vadd.f32 %v2469_v41, %v2437_v20 }
 0x114   :  { %v549_v49 = vpop.f32.mrf.mxu1  ;;  %v2489_v42 = vpop.f32.mrf.mxu0 }
 0x115   :  { %v550_v63 = vadd.f32 %v549_v49, %v404_v31  ;;  %v752_v37 = vadd.f32 %v2489_v42, %v510_v51 }
 0x116   :  { %v2470_v57 = vpop.f32.mrf.mxu1  ;;  %v687_v11 = vpop.f32.mrf.mxu0 }
 0x117   :  { %v561_v10 = vadd.f32 %v2470_v57, %v2438_v39  ;;  %v750_v56 = vadd.f32 %v687_v11, %v502_v28 }
 0x118   :  { %v552_v25 = vpop.f32.mrf.mxu1  ;;  %v2490_v61 = vpop.f32.mrf.mxu0 }
 0x119   :  { %v553_v6 = vadd.f32 %v552_v25, %v407_v35  ;;  %v753_v29 = vadd.f32 %v2490_v61, %v513_v48 }
 0x11a   :  { %v2521_v52 = vpop.f32.mrf.mxu1  ;;  %v690_v23 = vpop.f32.mrf.mxu0 }
 0x11b   :  { %v3461_v33 = vadd.f32 %v2521_v52, %v752_v37  ;;  %v751_v59 = vadd.f32 %v690_v23, %v505_v58 }
 0x11c   :  { %v889_v7 = vpop.f32.mrf.mxu1  ;;  %v2493_v38 = vpop.f32.mrf.mxu0 }
 0x11d   :  { %v3463_v12 = vadd.f32 %v889_v7, %v750_v56  ;;  %v756_v34 = vadd.f32 %v2493_v38, %v526_v36 }
 0x11e   :  { %v2522_v53 = vpop.f32.mrf.mxu1  ;;  %v703_v24 = vpop.f32.mrf.mxu0 }
 0x11f   :  { %v3465_v22 = vadd.f32 %v2522_v53, %v753_v29  ;;  %v754_v3 = vadd.f32 %v703_v24, %v518_v15 }
 0x120   :  { %v892_v2 = vpop.f32.mrf.mxu1  ;;  %v2494_v43 = vpop.f32.mrf.mxu0 }
 0x121   :  { %v3467_v27 = vadd.f32 %v892_v2, %v751_v59  ;;  %v757_v50 = vadd.f32 %v2494_v43, %v529_v19 }
 0x122   :  { %v2525_v51 = vpop.f32.mrf.mxu1  ;;  %v706_v17 = vpop.f32.mrf.mxu0 }
 0x123   :  { %v3469_v26 = vadd.f32 %v2525_v51, %v756_v34  ;;  %v755_v28 = vadd.f32 %v706_v17, %v521_v4 }
 0x124   :  { %v905_v44 = vpop.f32.mrf.mxu1  ;;  %v2497_v13 = vpop.f32.mrf.mxu0 }
 0x125   :  { %v3471_v48 = vadd.f32 %v905_v44, %v754_v3  ;;  %v760_v14 = vadd.f32 %v2497_v13, %v542_v54 }
 0x126   :  { %v2526_v47 = vpop.f32.mrf.mxu1  ;;  %v719_v58 = vpop.f32.mrf.mxu0 }
 0x127   :  { %v3473_v62 = vadd.f32 %v2526_v47, %v757_v50  ;;  %v758_v60 = vadd.f32 %v719_v58, %v534_v8 }
 0x128   :  { %v908_v36 = vpop.f32.mrf.mxu1  ;;  %v2498_v0 = vpop.f32.mrf.mxu0 }
 0x129   :  { %v3475_v1 = vadd.f32 %v908_v36, %v755_v28  ;;  %v761_v15 = vadd.f32 %v2498_v0, %v545_v9 }
 0x12a   :  { %v2529_v16 = vpop.f32.mrf.mxu1  ;;  %v722_v18 = vpop.f32.mrf.mxu0 }
 0x12b   :  { %v3477_v19 = vadd.f32 %v2529_v16, %v760_v14  ;;  %v759_v45 = vadd.f32 %v722_v18, %v537_v40 }
 0x12c   :  { %v921_v46 = vpop.f32.mrf.mxu1  ;;  %v2501_v4 = vpop.f32.mrf.mxu0 }
 0x12d   :  { %v3479_v5 = vadd.f32 %v921_v46, %v758_v60  ;;  %v764_v20 = vadd.f32 %v2501_v4, %v558_v55 }
 0x12e   :  { %v2530_v54 = vpop.f32.mrf.mxu1  ;;  %v735_v21 = vpop.f32.mrf.mxu0 }
 0x12f   :  { %v3481_v31 = vadd.f32 %v2530_v54, %v761_v15  ;;  %v762_v8 = vadd.f32 %v735_v21, %v550_v63 }
 0x130   :  { %v924_v30 = vpop.f32.mrf.mxu1  ;;  %v2502_v39 = vpop.f32.mrf.mxu0 }
 0x131   :  { %v3483_v32 = vadd.f32 %v924_v30, %v759_v45  ;;  %v765_v9 = vadd.f32 %v2502_v39, %v561_v10 }
 0x132   :  { %v2533_v35 = vpop.f32.mrf.mxu1  ;;  %v738_v41 = vpop.f32.mrf.mxu0 }
 0x133   :  { %v3485_v49 = vadd.f32 %v2533_v35, %v764_v20  ;;  %v763_v40 = vadd.f32 %v738_v41, %v553_v6 }
 0x134   :  { %v937_v42 = vpop.f32.mrf.mxu1  ;;  %v2553_v37 = vpop.f32.mrf.mxu0 }
 0x135   :  { %v3487_v57 = vadd.f32 %v937_v42, %v762_v8 }
 0x136   :  { %v2534_v55 = vpop.f32.mrf.mxu1  ;;  %v1091_v11 = vpop.f32.mrf.mxu0 }
 0x137   :  { %v3489_v56 = vadd.f32 %v2534_v55, %v765_v9 }
 0x138   :  { %v940_v25 = vpop.f32.mrf.mxu1  ;;  %v2554_v63 = vpop.f32.mrf.mxu0 }
 0x139   :  { %v3491_v61 = vadd.f32 %v940_v25, %v763_v40 }
 0x13a   :  { %v2585_v29 = vpop.f32.mrf.mxu1  ;;  %v1094_v52 = vpop.f32.mrf.mxu0 }
 0x13b   :  { %3699 = vst [vmem:[#allocation3_spill] sm:$0xff] %v3491_v61 }
 0x13c   :  { %v1293_v10 = vpop.f32.mrf.mxu1  ;;  %v2557_v23 = vpop.f32.mrf.mxu0 }
 0x13e   :  { %v2586_v59 = vpop.f32.mrf.mxu1  ;;  %v1107_v7 = vpop.f32.mrf.mxu0 }
 0x140   :  { %v1296_v38 = vpop.f32.mrf.mxu1  ;;  %v2558_v6 = vpop.f32.mrf.mxu0 }
 0x142   :  { %v2589_v34 = vpop.f32.mrf.mxu1  ;;  %v1110_v53 = vpop.f32.mrf.mxu0 }
 0x144   :  { %v1309_v24 = vpop.f32.mrf.mxu1  ;;  %v2561_v3 = vpop.f32.mrf.mxu0 }
 0x146   :  { %v3493_v2 = vpop.f32.mrf.mxu1  ;;  %v1123_v43 = vpop.f32.mrf.mxu0 }
 0x148   :  { %v1312_v50 = vpop.f32.mrf.mxu1  ;;  %v3495_v51 = vpop.f32.mrf.mxu0 }
 0x14a   :  { %v3497_v17 = vpop.f32.mrf.mxu1  ;;  %v3499_v28 = vpop.f32.mrf.mxu0 }
 0x14c   :  { %v1325_v44 = vpop.f32.mrf.mxu1  ;;  %v3501_v13 = vpop.f32.mrf.mxu0 }
 0x14e   :  { %v3503_v14 = vpop.f32.mrf.mxu1  ;;  %v3505_v47 = vpop.f32.mrf.mxu0 }
 0x150   :  { %v3507_v58 = vpop.f32.mrf.mxu1  ;;  %v3509_v60 = vpop.f32.mrf.mxu0 }
 0x152   :  { %v3511_v36 = vpop.f32.mrf.mxu1  ;;  %v3513_v0 = vpop.f32.mrf.mxu0 }
 0x153   :  { %3700 = vst [vmem:[#allocation4_spill] sm:$0xff] %v3513_v0 }
 0x154   :  { %v3515_v15 = vpop.f32.mrf.mxu1  ;;  %v2617_v16 = vpop.f32.mrf.mxu0 }
 0x155   :  { %3701 = vst [vmem:[#allocation5_spill] sm:$0xff] %v3515_v15 }
 0x156   :  { %v3517_v18 = vpop.f32.mrf.mxu1  ;;  %v1496_v45 = vpop.f32.mrf.mxu0 }
 0x157   :  { %3702 = vst [vmem:[#allocation6_spill] sm:$0xff] %v3517_v18 }
 0x158   :  { %v3519_v46 = vpop.f32.mrf.mxu1  ;;  %v2618_v4 = vpop.f32.mrf.mxu0 }
 0x159   :  { %3703 = vst [vmem:[#allocation7_spill] sm:$0xff] %v3519_v46 }
 0x15a   :  { %v2649_v20 = vpop.f32.mrf.mxu1  ;;  %v3521_v54 = vpop.f32.mrf.mxu0 }
 0x15c   :  { %v1698_v21 = vpop.f32.mrf.mxu1  ;;  %v3523_v8 = vpop.f32.mrf.mxu0 }
 0x15d   :  { %3704 = vst [vmem:[#allocation8_spill] sm:$0xff] %v3523_v8 }
 0x15e   :  { %v2650_v30 = vpop.f32.mrf.mxu1  ;;  %v3525_v39 = vpop.f32.mrf.mxu0 }
 0x15f   :  { %3705 = vst [vmem:[#allocation9_spill] sm:$0xff] %v3525_v39 }
 0x160   :  { %v3527_v9 = vpop.f32.mrf.mxu1  ;;  %v3529_v35 = vpop.f32.mrf.mxu0 }
 0x161   :  { %3706 = vst [vmem:[#allocation10_spill] sm:$0xff] %v3527_v9  ;;  %3707 = vst [vmem:[#allocation11_spill] sm:$0xff] %v3529_v35 }
 0x162   :  { %v3531_v41 = vpop.f32.mrf.mxu1  ;;  %v3533_v40 = vpop.f32.mrf.mxu0 }
 0x163   :  { %3708 = vst [vmem:[#allocation12_spill] sm:$0xff] %v3531_v41  ;;  %3709 = vst [vmem:[#allocation13_spill] sm:$0xff] %v3533_v40  ;;  %v1156_v40 = vadd.f32 %v2553_v37, %v3461_v33  ;;  %v1157_v41 = vadd.f32 %v2554_v63, %v3465_v22  ;;  %v1161_v22 = vadd.f32 %v2558_v6, %v3473_v62 }
 0x164   :  { %v3535_v42 = vpop.f32.mrf.mxu1  ;;  %v2625_v55 = vpop.f32.mrf.mxu0  ;;  %v1159_v37 = vadd.f32 %v1110_v53, %v3475_v1  ;;  %v1165_v1 = vadd.f32 %v3495_v51, %v3481_v31  ;;  %v1168_v6 = vadd.f32 %v3501_v13, %v3485_v49  ;;  %v1169_v31 = vadd.f32 %v3509_v60, %v3489_v56  ;;  %v3718_v13 = vld [vmem:[#allocation5_spill] sm:$0xff]  ;;  %v3721_v56 = vld [vmem:[#allocation4_spill] sm:$0xff] }
 0x165   :  { %3710 = vst [vmem:[#allocation14_spill] sm:$0xff] %v3535_v42  ;;  %v1154_v42 = vadd.f32 %v1091_v11, %v3463_v12  ;;  %v1359_v15 = vadd.f32 %v2586_v59, %v1157_v41 }
 0x166   :  { %v3537_v25 = vpop.f32.mrf.mxu1  ;;  %v3539_v46 = vpop.f32.mrf.mxu0 }
 0x167   :  { %3711 = vst [vmem:[#allocation15_spill] sm:$0xff] %v3537_v25  ;;  %3712 = vst [vmem:[#allocation16_spill] sm:$0xff] %v3539_v46  ;;  %v1356_v18 = vadd.f32 %v1293_v10, %v1154_v42  ;;  %v1562_v53 = vadd.f32 %v2618_v4, %v1359_v15 }
 0x168   :  { %v3541_v0 = vpop.f32.mrf.mxu1  ;;  %v3543_v8 = vpop.f32.mrf.mxu0 }
 0x169   :  { %3713 = vst [vmem:[#allocation17_spill] sm:$0xff] %v3541_v0  ;;  %3714 = vst [vmem:[#allocation18_spill] sm:$0xff] %v3543_v8  ;;  %v1358_v0 = vadd.f32 %v2585_v29, %v1156_v40  ;;  %v1155_v8 = vadd.f32 %v1094_v52, %v3467_v27  ;;  %v1164_v27 = vadd.f32 %v2561_v3, %v3477_v19 }
 0x16a   :  { %v2657_v39 = vpop.f32.mrf.mxu1  ;;  %v3545_v61 = vpop.f32.mrf.mxu0  ;;  %v1162_v52 = vadd.f32 %v1123_v43, %v3479_v5  ;;  %v1163_v19 = vadd.f32 %v3499_v28, %v3483_v32  ;;  %v1367_v3 = vadd.f32 %v3503_v14, %v1165_v1  ;;  %v1166_v43 = vadd.f32 %v3505_v47, %v3487_v57  ;;  %v3719_v57 = vld [vmem:[#allocation6_spill] sm:$0xff] }
 0x16b   :  { %3715 = vst [vmem:[#allocation19_spill] sm:$0xff] %v3545_v61  ;;  %v1160_v61 = vadd.f32 %v2557_v23, %v3469_v26  ;;  %v1357_v12 = vadd.f32 %v1296_v38, %v1155_v8  ;;  %v1561_v11 = vadd.f32 %v2617_v16, %v1358_v0  ;;  %v1361_v23 = vadd.f32 %v1312_v50, %v1159_v37  ;;  %v3722_v16 = vld [vmem:[#allocation10_spill] sm:$0xff]  ;;  %v3725_v8 = vld [vmem:[#allocation8_spill] sm:$0xff] }
 0x16c   :  { %v3547_v9 = vpop.f32.mrf.mxu1  ;;  %v3549_v35 = vpop.f32.mrf.mxu0  ;;  %v1366_v62 = vadd.f32 %v3497_v17, %v1164_v27  ;;  %v1364_v38 = vadd.f32 %v1325_v44, %v1162_v52  ;;  %v1764_v51 = vadd.f32 %v2650_v30, %v1562_v53  ;;  %v1370_v44 = vadd.f32 %v3511_v36, %v1168_v6  ;;  %v3733_v53 = vld [vmem:[#allocation14_spill] sm:$0xff] }
 0x16d   :  { %3716 = vst [vmem:[#allocation20_spill] sm:$0xff] %v3547_v9  ;;  %3717 = vst [vmem:[#allocation21_spill] sm:$0xff] %v3549_v35  ;;  %v1158_v9 = vadd.f32 %v1107_v7, %v3471_v48  ;;  %v1362_v63 = vadd.f32 %v2589_v34, %v1160_v61  ;;  %v1363_v48 = vadd.f32 %v3493_v2, %v1161_v22  ;;  %v3728_v22 = vld [vmem:[#allocation11_spill] sm:$0xff] }
 0x16e   :  { %v3554_v25 = vpop.f32.mrf.mxu1  ;;  %v3556_v46 = vpop.f32.mrf.mxu0  ;;  %v1763_v59 = vadd.f32 %v2649_v20, %v1561_v11  ;;  %v1559_v7 = vadd.f32 %v1496_v45, %v1356_v18  ;;  %v1365_v2 = vadd.f32 %v3507_v58, %v1163_v19  ;;  %v1560_v17 = vadd.f32 %v3521_v54, %v1357_v12  ;;  %v3720_v58 = vld [vmem:[#allocation3_spill] sm:$0xff]  ;;  %v3723_v4 = vld [vmem:[#allocation16_spill] sm:$0xff] }
 0x16f   :  { %v1360_v29 = vadd.f32 %v1309_v24, %v1158_v9  ;;  %v1569_v49 = vadd.f32 %v2625_v55, %v1366_v62  ;;  %v1368_v14 = vadd.f32 %v3718_v13, %v1166_v43  ;;  %v1371_v47 = vadd.f32 %v3719_v57, %v1169_v31  ;;  %v3724_v54 = vld [vmem:[#allocation7_spill] sm:$0xff]  ;;  %v3726_v9 = vld [vmem:[#allocation9_spill] sm:$0xff] }
 0x170   :  { %v3561_v35 = vpop.f32.mrf.mxu1  ;;  %v3563_v33 = vpop.f32.mrf.mxu0  ;;  %v1761_v34 = vadd.f32 %v1698_v21, %v1559_v7  ;;  %v1167_v60 = vadd.f32 %v3721_v56, %v3720_v58  ;;  %v1762_v18 = vadd.f32 %v3722_v16, %v1560_v17  ;;  %v1567_v20 = vadd.f32 %v3723_v4, %v1364_v38  ;;  %v3727_v40 = vld [vmem:[#allocation18_spill] sm:$0xff]  ;;  %v3736_v4 = vld [vmem:[#allocation17_spill] sm:$0xff] }
 0x171   :  { %v1771_v45 = vadd.f32 %v2657_v39, %v1569_v49  ;;  %v1565_v30 = vadd.f32 %v3725_v8, %v1362_v63  ;;  %v1563_v41 = vadd.f32 %v3726_v9, %v1360_v29  ;;  %v1570_v42 = vadd.f32 %v3727_v40, %v1367_v3  ;;  %v3731_v63 = vld [vmem:[#allocation13_spill] sm:$0xff] }
 0x172   :  { %v3569_v10 = vpop.f32.mrf.mxu1  ;;  %v3571_v26 = vpop.f32.mrf.mxu0  ;;  %v1369_v21 = vadd.f32 %v3724_v54, %v1167_v60  ;;  %v1566_v37 = vadd.f32 %v3728_v22, %v1363_v48  ;;  %v1564_v62 = vadd.f32 %v3731_v63, %v1361_v23  ;;  %v3732_v38 = vld [vmem:[#allocation19_spill] sm:$0xff] }
 0x173   :  { %v1772_v29 = vadd.f32 %v3554_v25, %v1570_v42  ;;  %v1568_v1 = vadd.f32 %v3732_v38, %v1365_v2  ;;  %v1765_v25 = vadd.f32 %v3733_v53, %v1563_v41 }
 0x174   :  { %v3579_v61 = vpop.f32.mrf.mxu1  ;;  %v2681_v5 = vpop.f32.mrf.mxu0  ;;  %v3729_v39 = vld [vmem:[#allocation20_spill] sm:$0xff]  ;;  %v3734_v2 = vld [vmem:[#allocation21_spill] sm:$0xff] }
 0x175   :  { %v1965_v24 = vadd.f32 %v2681_v5, %v1763_v59  ;;  %v1769_v11 = vadd.f32 %v3729_v39, %v1567_v20  ;;  %v3730_v59 = vld [vmem:[#allocation12_spill] sm:$0xff]  ;;  %v1770_v3 = vadd.f32 %v3561_v35, %v1568_v1  ;;  %v1573_v43 = vadd.f32 %v3734_v2, %v1370_v44 }
 0x176   :  { %v3589_v32 = vpop.f32.mrf.mxu1  ;;  %v1900_v50 = vpop.f32.mrf.mxu0  ;;  %v1767_v7 = vadd.f32 %v3730_v59, %v1565_v30  ;;  %v1571_v35 = vadd.f32 %v3556_v46, %v1368_v14  ;;  %v1766_v20 = vadd.f32 %v3736_v4, %v1564_v62  ;;  %v1574_v46 = vadd.f32 %v3563_v33, %v1371_v47 }
 0x177   :  { %1981 = vst [vmem:[%s3693_s4 + $0x10] sm:$0xff] %v1965_v24  ;;  %v1963_v28 = vadd.f32 %v1900_v50, %v1761_v34  ;;  %v2019_v17 = vmul.f32 %v1965_v24, %v1965_v24  ;;  %v1775_v56 = vadd.f32 %v3569_v10, %v1573_v43  ;;  %v1572_v47 = vadd.f32 %v3571_v26, %v1369_v21 }
 0x178   :  { %v3600_v0 = vpop.f32.mrf.mxu1  ;;  %v2682_v15 = vpop.f32.mrf.mxu0  ;;  %v1773_v10 = vadd.f32 %v3579_v61, %v1571_v35  ;;  %v1776_v61 = vadd.f32 %v3589_v32, %v1574_v46 }
 0x179   :  { %1979 = vst [vmem:[%s3693_s4] sm:$0xff] %v1963_v28  ;;  %v1966_v36 = vadd.f32 %v2682_v15, %v1764_v51  ;;  %v2017_v48 = vmul.f32 %v1963_v28, %v1963_v28  ;;  %v1774_v39 = vadd.f32 %v3600_v0, %v1572_v47 }
 0x17a   :  { %v2689_v55 = vpop.f32.mrf.mxu1  ;;  %v1903_v12 = vpop.f32.mrf.mxu0 }
 0x17b   :  { %v3613_v27 = vadd.f32 %v2689_v55, %v1771_v45  ;;  %1982 = vst [vmem:[%s3693_s4 + $0x18] sm:$0xff] %v1966_v36  ;;  %v1964_v52 = vadd.f32 %v1903_v12, %v1762_v18  ;;  %v2020_v16 = vmul.f32 %v1966_v36, %v1966_v36 }
 0x17c   :  { %v1932_v19 = vpop.f32.mrf.mxu1  ;;  %v2685_v5 = vpop.f32.mrf.mxu0 }
 0x17d   :  { %1989 = vst [vmem:[%s3693_s4 + $0x50] sm:$0xff] %v3613_v27  ;;  %v3626_v6 = vadd.f32 %v1932_v19, %v1769_v11  ;;  %1980 = vst [vmem:[%s3693_s4 + $0x8] sm:$0xff] %v1964_v52  ;;  %v1995_v34 = vadd.f32 %v1964_v52, %v1963_v28  ;;  %v2018_v23 = vmul.f32 %v1964_v52, %v1964_v52  ;;  %v3735_v28 = vld [vmem:[#allocation15_spill] sm:$0xff] }
 0x17e   :  { %v2690_v31 = vpop.f32.mrf.mxu1  ;;  %v1969_v50 = vadd.f32 %v2685_v5, %v1767_v7  ;;  %v1916_v51 = vpop.f32.mrf.mxu0  ;;  %v1768_v58 = vadd.f32 %v3735_v28, %v1566_v37 }
 0x17f   :  { %1987 = vst [vmem:[%s3693_s4 + $0x40] sm:$0xff] %v3626_v6  ;;  %v1974_v49 = vadd.f32 %v2690_v31, %v1772_v29  ;;  %v1996_v13 = vadd.f32 %v1995_v34, %v1965_v24  ;;  %v2033_v57 = vadd.f32 %v2018_v23, %v2017_v48  ;;  %v1967_v44 = vadd.f32 %v1916_v51, %v1765_v25 }
 0x180   :  { %v1935_v60 = vpop.f32.mrf.mxu1  ;;  %1985 = vst [vmem:[%s3693_s4 + $0x30] sm:$0xff] %v1969_v50  ;;  %v2686_v15 = vpop.f32.mrf.mxu0  ;;  %v2023_v32 = vmul.f32 %v1969_v50, %v1969_v50  ;;  %v2025_v0 = vmul.f32 %v3626_v6, %v3626_v6  ;;  %v2027_v48 = vmul.f32 %v3613_v27, %v3613_v27 }
 0x181   :  { %1990 = vst [vmem:[%s3693_s4 + $0x58] sm:$0xff] %v1974_v49  ;;  %v2034_v24 = vadd.f32 %v2033_v57, %v2019_v17  ;;  %v1972_v18 = vadd.f32 %v1935_v60, %v1770_v3  ;;  %v1997_v45 = vadd.f32 %v1996_v13, %v1966_v36  ;;  %1983 = vst [vmem:[%s3693_s4 + $0x20] sm:$0xff] %v1967_v44 }
 0x182   :  { %v2693_v14 = vpop.f32.mrf.mxu1  ;;  %v1970_v54 = vadd.f32 %v2686_v15, %v1768_v58  ;;  %v1919_v8 = vpop.f32.mrf.mxu0  ;;  %v2021_v36 = vmul.f32 %v1967_v44, %v1967_v44  ;;  %v2028_v53 = vmul.f32 %v1974_v49, %v1974_v49 }
 0x183   :  { %1988 = vst [vmem:[%s3693_s4 + $0x48] sm:$0xff] %v1972_v18  ;;  %v1977_v30 = vadd.f32 %v2693_v14, %v1775_v56  ;;  %v1998_v9 = vadd.f32 %v1997_v45, %v1967_v44  ;;  %v2035_v41 = vadd.f32 %v2034_v24, %v2020_v16  ;;  %v1968_v33 = vadd.f32 %v1919_v8, %v1766_v20 }
 0x184   :  { %v1948_v40 = vpop.f32.mrf.mxu1  ;;  %1986 = vst [vmem:[%s3693_s4 + $0x38] sm:$0xff] %v1970_v54  ;;  %v2024_v7 = vmul.f32 %v1970_v54, %v1970_v54  ;;  %v2026_v1 = vmul.f32 %v1972_v18, %v1972_v18 }
 0x185   :  { %1993 = vst [vmem:[%s3693_s4 + $0x70] sm:$0xff] %v1977_v30  ;;  %v2036_v42 = vadd.f32 %v2035_v41, %v2021_v36  ;;  %v1975_v55 = vadd.f32 %v1948_v40, %v1773_v10  ;;  %1984 = vst [vmem:[%s3693_s4 + $0x28] sm:$0xff] %v1968_v33  ;;  %v1999_v22 = vadd.f32 %v1998_v9, %v1968_v33 }
 0x186   :  { %v2694_v12 = vpop.f32.mrf.mxu1  ;;  %v2022_v37 = vmul.f32 %v1968_v33, %v1968_v33 }
 0x187   :  { %1991 = vst [vmem:[%s3693_s4 + $0x60] sm:$0xff] %v1975_v55  ;;  %v1978_v26 = vadd.f32 %v2694_v12, %v1776_v61  ;;  %v2000_v21 = vadd.f32 %v1999_v22, %v1969_v50  ;;  %v2029_v2 = vmul.f32 %v1975_v55, %v1975_v55 }
 0x188   :  { %v2037_v11 = vadd.f32 %v2036_v42, %v2022_v37  ;;  %v1951_v52 = vpop.f32.mrf.mxu1 }
 0x189   :  { %1994 = vst [vmem:[%s3693_s4 + $0x78] sm:$0xff] %v1978_v26  ;;  %v1976_v59 = vadd.f32 %v1951_v52, %v1774_v39  ;;  %v2001_v63 = vadd.f32 %v2000_v21, %v1970_v54  ;;  %v2032_v28 = vmul.f32 %v1978_v26, %v1978_v26 }
 0x18a   :  { %v2038_v62 = vadd.f32 %v2037_v11, %v2023_v32 }
 0x18b   :  { %1992 = vst [vmem:[%s3693_s4 + $0x68] sm:$0xff] %v1976_v59  ;;  %v2002_v29 = vadd.f32 %v2001_v63, %v3626_v6  ;;  %v2030_v51 = vmul.f32 %v1976_v59, %v1976_v59  ;;  %v2031_v6 = vmul.f32 %v1977_v30, %v1977_v30 }
 0x18c   :  { %v2039_v38 = vadd.f32 %v2038_v62, %v2024_v7 }
 0x18d   :  { %v2003_v5 = vadd.f32 %v2002_v29, %v1972_v18 }
 0x18e   :  { %v2040_v19 = vadd.f32 %v2039_v38, %v2025_v0 }
 0x18f   :  { %v2004_v34 = vadd.f32 %v2003_v5, %v3613_v27 }
 0x190   :  { %v2041_v23 = vadd.f32 %v2040_v19, %v2026_v1 }
 0x191   :  { %v2005_v25 = vadd.f32 %v2004_v34, %v1974_v49 }
 0x192   :  { %v2042_v3 = vadd.f32 %v2041_v23, %v2027_v48 }
 0x193   :  { %v2006_v43 = vadd.f32 %v2005_v25, %v1975_v55 }
 0x194   :  { %v2043_v31 = vadd.f32 %v2042_v3, %v2028_v53 }
 0x195   :  { %v2007_v50 = vadd.f32 %v2006_v43, %v1976_v59 }
 0x196   :  { %v2044_v17 = vadd.f32 %v2043_v31, %v2029_v2 }
 0x197   :  { %v2008_v13 = vadd.f32 %v2007_v50, %v1977_v30 }
 0x198   :  { %v2045_v57 = vadd.f32 %v2044_v17, %v2030_v51 }
 0x199   :  { %v2009_v58 = vadd.f32 %v2008_v13, %v1978_v26 }
 0x19a   :  { %v2046_v56 = vadd.f32 %v2045_v57, %v2031_v6 }
 0x19b   :  { %v2010_v35 = vrot.slane %v2009_v58, 4 }
 0x19c   :  { %v2047_v60 = vadd.f32 %v2046_v56, %v2032_v28 }
 0x19d   :  { %v2011_v44 = vadd.f32 %v2010_v35, %v2009_v58 }
 0x19e   :  { %v2048_v27 = vrot.slane %v2047_v60, 4 }
 0x19f   :  { %v2012_v15 = vrot.slane %v2011_v44, 2 }
 0x1a0   :  { %v2049_v16 = vadd.f32 %v2048_v27, %v2047_v60 }
 0x1a1   :  { %v2013_v49 = vadd.f32 %v2012_v15, %v2011_v44 }
 0x1a2   :  { %v2050_v24 = vrot.slane %v2049_v16, 2 }
 0x1a3   :  { %v2014_v18 = vrot.slane %v2013_v49, 1 }
 0x1a4   :  { %v2051_v45 = vadd.f32 %v2050_v24, %v2049_v16 }
 0x1a5   :  { %v2015_v4 = vadd.f32 %v2014_v18, %v2013_v49 }
 0x1a6   :  { %v2052_v20 = vrot.slane %v2051_v45, 1 }
 0x1a7   :  { %2016 = vst [vmem:[%s3694_s5] sm:$0x1] %v2015_v4 }
 0x1a8   :  { %v2053_v10 = vadd.f32 %v2052_v20, %v2051_v45 }
 0x1aa   :  { %2054 = vst [vmem:[%s3694_s5 + $0x1] sm:$0x1] %v2053_v10 }

// kernel: down_forward.2
= control target key start
LH: loop header
LB: loop body
LE: loop exit
PB: predicated region body
PF: predicated region fallthrough
CT: control target
= control target key end

     0   :  { %v2799_v1 = vmov 0.0   ;;  %s3780_s1 = inlined_call_operand.vmem [shape: bf16[9,128,128], index: 1, kind: input, shape index: {}]   ;;  %s3781_s0 = inlined_call_operand.vmem [shape: f32[2,8,2,8,256], index: 0, kind: input, shape index: {}]   ;;  %s3782_s2 = inlined_call_operand.vmem [shape: f32[2,8,8,128], index: 2, kind: output, shape index: {0}]   ;;  %s3783_s3 = inlined_call_operand.vmem [shape: f32[1,2,128], index: 3, kind: output, shape index: {1}]  }
   0x1   :  { %v2726_v0 = vld [vmem:[%s3780_s1 + $0x78] sm:$0xff]   ;;  %19 = vst [vmem:[#allocation2 + $0x8] sm:$0xff] %v2799_v1  ;;  %18 = vst [vmem:[#allocation2] sm:$0xff] %v2799_v1  ;;  %v2728_v3 = vld [vmem:[%s3780_s1 + $0x70] sm:$0xff]  }
   0x2   :  { %20 = vst [vmem:[#allocation2 + $0x10] sm:$0xff] %v2799_v1  ;;  %21 = vst [vmem:[#allocation2 + $0x18] sm:$0xff] %v2799_v1  ;;  %v2727_v2 = vld [vmem:[%s3780_s1 + $0x38] sm:$0xff]   ;;  %2421 = vmatprep.subr.bf16.mxu0 %v2726_v0  ;;  %v2729_v4 = vld [vmem:[%s3780_s1 + $0x30] sm:$0xff]  }
   0x3   :  { %23 = vst [vmem:[#allocation2 + $0x28] sm:$0xff] %v2799_v1  ;;  %24 = vst [vmem:[#allocation2 + $0x30] sm:$0xff] %v2799_v1  ;;  %2453 = vmatprep.subr.bf16.mxu1 %v2727_v2  ;;  %2422 = vmatpush3.bf16.msra.mxu0 %v2726_v0  ;;  %v2730_v5 = vld [vmem:[%s3780_s1 + $0x68] sm:$0xff]   ;;  %v2732_v7 = vld [vmem:[%s3780_s1 + $0x60] sm:$0xff]  }
   0x4   :  { %26 = vst [vmem:[#allocation2 + $0x40] sm:$0xff] %v2799_v1  ;;  %27 = vst [vmem:[#allocation2 + $0x48] sm:$0xff] %v2799_v1  ;;  %2454 = vmatpush3.bf16.msra.mxu1 %v2727_v2  ;;  %2423 = vmatprep.subr.bf16.mxu0 %v2728_v3  ;;  %v2731_v6 = vld [vmem:[%s3780_s1 + $0x28] sm:$0xff]   ;;  %v2733_v8 = vld [vmem:[%s3780_s1 + $0x20] sm:$0xff]  }
   0x5   :  { %29 = vst [vmem:[#allocation2 + $0x58] sm:$0xff] %v2799_v1  ;;  %30 = vst [vmem:[#allocation2 + $0x60] sm:$0xff] %v2799_v1  ;;  %2455 = vmatprep.subr.bf16.mxu1 %v2729_v4  ;;  %v2734_v9 = vld [vmem:[%s3780_s1 + $0x58] sm:$0xff]   ;;  %v2736_v11 = vld [vmem:[%s3780_s1 + $0x50] sm:$0xff]  }
   0x6   :  { %32 = vst [vmem:[#allocation2 + $0x70] sm:$0xff] %v2799_v1  ;;  %33 = vst [vmem:[#allocation2 + $0x78] sm:$0xff] %v2799_v1  ;;  %v2735_v10 = vld [vmem:[%s3780_s1 + $0x18] sm:$0xff]   ;;  %v78_v12 = vld [vmem:[%s3781_s0] sm:$0xff] }
   0x7   :  { %35 = vst [vmem:[#allocation2 + $0x88] sm:$0xff] %v2799_v1  ;;  %36 = vst [vmem:[#allocation2 + $0x90] sm:$0xff] %v2799_v1  ;;  %2424 = vmatpush3.bf16.msra.mxu0 %v2728_v3  ;;  %v79_v13 = vld [vmem:[%s3781_s0 + $0x8] sm:$0xff]  ;;  %v80_v14 = vld [vmem:[%s3781_s0 + $0x10] sm:$0xff] }
   0x8   :  { %38 = vst [vmem:[#allocation2 + $0xa0] sm:$0xff] %v2799_v1  ;;  %39 = vst [vmem:[#allocation2 + $0xa8] sm:$0xff] %v2799_v1  ;;  %2456 = vmatpush3.bf16.msra.mxu1 %v2729_v4  ;;  %2425 = vmatprep.subr.bf16.mxu0 %v2730_v5  ;;  %v2737_v15 = vld [vmem:[%s3780_s1 + $0x10] sm:$0xff]   ;;  %v81_v16 = vld [vmem:[%s3781_s0 + $0x18] sm:$0xff]  ;;  %v142_v17 = vmax.f32 %v78_v12, %v80_v14 }
   0x9   :  { %41 = vst [vmem:[#allocation2 + $0xb8] sm:$0xff] %v2799_v1  ;;  %42 = vst [vmem:[#allocation2 + $0xc0] sm:$0xff] %v2799_v1  ;;  %2457 = vmatprep.subr.bf16.mxu1 %v2731_v6  ;;  %v82_v18 = vld [vmem:[%s3781_s0 + $0x20] sm:$0xff]  ;;  %v2738_v19 = vld [vmem:[%s3780_s1 + $0x48] sm:$0xff]   ;;  %v143_v20 = vmax.f32 %v79_v13, %v81_v16 }
   0xa   :  { %44 = vst [vmem:[#allocation2 + $0xd0] sm:$0xff] %v2799_v1  ;;  %45 = vst [vmem:[#allocation2 + $0xd8] sm:$0xff] %v2799_v1  ;;  %v83_v21 = vld [vmem:[%s3781_s0 + $0x28] sm:$0xff]  ;;  %v84_v22 = vld [vmem:[%s3781_s0 + $0x30] sm:$0xff] }
   0xb   :  { %46 = vst [vmem:[#allocation2 + $0xe0] sm:$0xff] %v2799_v1  ;;  %47 = vst [vmem:[#allocation2 + $0xe8] sm:$0xff] %v2799_v1  ;;  %2426 = vmatpush3.bf16.msra.mxu0 %v2730_v5  ;;  %v85_v23 = vld [vmem:[%s3781_s0 + $0x38] sm:$0xff]  ;;  %v86_v24 = vld [vmem:[%s3781_s0 + $0x40] sm:$0xff]  ;;  %v144_v27 = vmax.f32 %v82_v18, %v84_v22  ;;  %v2936_v29 = vmax.f32 %v142_v17, %v143_v20 }
   0xc   :  { %48 = vst [vmem:[#allocation2 + $0xf0] sm:$0xff] %v2799_v1  ;;  %49 = vst [vmem:[#allocation2 + $0xf8] sm:$0xff] %v2799_v1  ;;  %2458 = vmatpush3.bf16.msra.mxu1 %v2731_v6  ;;  %2427 = vmatprep.subr.bf16.mxu0 %v2732_v7  ;;  %v87_v25 = vld [vmem:[%s3781_s0 + $0x48] sm:$0xff]  ;;  %v88_v26 = vld [vmem:[%s3781_s0 + $0x50] sm:$0xff]  ;;  %v145_v28 = vmax.f32 %v83_v21, %v85_v23 }
   0xd   :  { %50 = vst [vmem:[#allocation2 + $0x100] sm:$0xff] %v2799_v1  ;;  %51 = vst [vmem:[#allocation2 + $0x108] sm:$0xff] %v2799_v1  ;;  %2459 = vmatprep.subr.bf16.mxu1 %v2733_v8  ;;  %v89_v30 = vld [vmem:[%s3781_s0 + $0x58] sm:$0xff]  ;;  %v146_v31 = vmax.f32 %v86_v24, %v88_v26  ;;  %v2739_v32 = vld [vmem:[%s3780_s1 + $0x8] sm:$0xff]   ;;  %v263_v35 = vpack.c.bf16 %v2936_v29, %v2799_v1 }
   0xe   :  { %53 = vst [vmem:[#allocation2 + $0x118] sm:$0xff] %v2799_v1  ;;  %54 = vst [vmem:[#allocation2 + $0x120] sm:$0xff] %v2799_v1  ;;  %v147_v33 = vmax.f32 %v87_v25, %v89_v30  ;;  %v2944_v34 = vmax.f32 %v144_v27, %v145_v28  ;;  %v2740_v36 = vld [vmem:[%s3780_s1 + $0x40] sm:$0xff]   ;;  %v91_v41 = vld [vmem:[%s3781_s0 + $0x68] sm:$0xff] }
   0xf   :  { %56 = vst [vmem:[#allocation2 + $0x130] sm:$0xff] %v2799_v1  ;;  %57 = vst [vmem:[#allocation2 + $0x138] sm:$0xff] %v2799_v1  ;;  %2428 = vmatpush3.bf16.msra.mxu0 %v2732_v7  ;;  %v2741_v39 = vld [vmem:[%s3780_s1] sm:$0xff]   ;;  %2437 = vmatprep.mubr.bf16.mxu0 %v263_v35  ;;  %v92_v43 = vld [vmem:[%s3781_s0 + $0x70] sm:$0xff] }
  0x10   :  { %59 = vst [vmem:[#allocation2 + $0x148] sm:$0xff] %v2799_v1  ;;  %60 = vst [vmem:[#allocation2 + $0x150] sm:$0xff] %v2799_v1  ;;  %2460 = vmatpush3.bf16.msra.mxu1 %v2733_v8  ;;  %2429 = vmatprep.subr.bf16.mxu0 %v2734_v9  ;;  %v2952_v37 = vmax.f32 %v146_v31, %v147_v33  ;;  %v998_v38 = vpack.c.bf16 %v2944_v34, %v2936_v29  ;;  %v90_v40 = vld [vmem:[%s3781_s0 + $0x60] sm:$0xff]  ;;  %v93_v44 = vld [vmem:[%s3781_s0 + $0x78] sm:$0xff] }
  0x11   :  { %62 = vst [vmem:[#allocation2 + $0x160] sm:$0xff] %v2799_v1  ;;  %63 = vst [vmem:[#allocation2 + $0x168] sm:$0xff] %v2799_v1  ;;  %2461 = vmatprep.subr.bf16.mxu1 %v2735_v10  ;;  %v207_v42 = vld [vmem:[#allocation2 + $0x7] sm:$0xff]  ;;  %v96_v47 = vld [vmem:[%s3781_s0 + $0x90] sm:$0xff]  ;;  %v148_v49 = vmax.f32 %v90_v40, %v92_v43  ;;  %v149_v50 = vmax.f32 %v91_v41, %v93_v44 }
  0x12   :  { %65 = vst [vmem:[#allocation2 + $0x178] sm:$0xff] %v2799_v1  ;;  %66 = vst [vmem:[#allocation2 + $0x180] sm:$0xff] %v2799_v1  ;;  %v94_v45 = vld [vmem:[%s3781_s0 + $0x80] sm:$0xff]  ;;  %v95_v46 = vld [vmem:[%s3781_s0 + $0x88] sm:$0xff]  ;;  %v264_v0 = vpack.c.bf16 %v2952_v37, %v2944_v34 }
  0x13   :  { %68 = vst [vmem:[#allocation2 + $0x190] sm:$0xff] %v2799_v1  ;;  %69 = vst [vmem:[#allocation2 + $0x198] sm:$0xff] %v2799_v1  ;;  %2430 = vmatpush3.bf16.msra.mxu0 %v2734_v9  ;;  %v97_v48 = vld [vmem:[%s3781_s0 + $0x98] sm:$0xff]  ;;  %v150_v53 = vmax.f32 %v94_v45, %v96_v47  ;;  %v98_v55 = vld [vmem:[%s3781_s0 + $0xa0] sm:$0xff]  ;;  %v3000_v58 = vmax.f32 %v148_v49, %v149_v50 }
  0x14   :  { %71 = vst [vmem:[#allocation2 + $0x1a8] sm:$0xff] %v2799_v1  ;;  %72 = vst [vmem:[#allocation2 + $0x1b0] sm:$0xff] %v2799_v1  ;;  %2462 = vmatpush3.bf16.msra.mxu1 %v2735_v10  ;;  %2431 = vmatprep.subr.bf16.mxu0 %v2736_v11  ;;  %v2742_v51 = vld [vmem:[%s3780_s1 + $0xb8] sm:$0xff]   ;;  %v151_v54 = vmax.f32 %v95_v46, %v97_v48  ;;  %v99_v56 = vld [vmem:[%s3781_s0 + $0xa8] sm:$0xff] }
  0x15   :  { %74 = vst [vmem:[#allocation2 + $0x1c0] sm:$0xff] %v2799_v1  ;;  %75 = vst [vmem:[#allocation2 + $0x1c8] sm:$0xff] %v2799_v1  ;;  %2463 = vmatprep.subr.bf16.mxu1 %v2737_v15  ;;  %v2743_v52 = vld [vmem:[%s3780_s1 + $0xf8] sm:$0xff]   ;;  %v100_v57 = vld [vmem:[%s3781_s0 + $0xb0] sm:$0xff] }
  0x16   :  { %76 = vst [vmem:[#allocation2 + $0x1d0] sm:$0xff] %v2799_v1  ;;  %77 = vst [vmem:[#allocation2 + $0x1d8] sm:$0xff] %v2799_v1  ;;  %v101_v59 = vld [vmem:[%s3781_s0 + $0xb8] sm:$0xff]  ;;  %v102_v60 = vld [vmem:[%s3781_s0 + $0xc0] sm:$0xff]  ;;  %v152_v62 = vmax.f32 %v98_v55, %v100_v57  ;;  %v3015_v2 = vmax.f32 %v150_v53, %v151_v54 }
  0x17   :  { %191 = vst [vmem:[#allocation2 + $0x20] sm:$0xff] %v2936_v29  ;;  %2432 = vmatpush3.bf16.msra.mxu0 %v2736_v11  ;;  %192 = vst [vmem:[#allocation2 + $0x38] sm:$0xff] %v2944_v34  ;;  %v103_v61 = vld [vmem:[%s3781_s0 + $0xc8] sm:$0xff]  ;;  %v104_v3 = vld [vmem:[%s3781_s0 + $0xd0] sm:$0xff]  ;;  %v153_v5 = vmax.f32 %v99_v56, %v101_v59  ;;  %v3784_v34 = vpack.c.bf16 %v3000_v58, %v2952_v37 }
  0x18   :  { %2464 = vmatpush3.bf16.msra.mxu1 %v2737_v15  ;;  %2433 = vmatprep.subr.bf16.mxu0 %v2738_v19  ;;  %193 = vst [vmem:[#allocation2 + $0x50] sm:$0xff] %v2952_v37  ;;  %v105_v4 = vld [vmem:[%s3781_s0 + $0xd8] sm:$0xff]  ;;  %194 = vst [vmem:[#allocation2 + $0x68] sm:$0xff] %v3000_v58  ;;  %v154_v8 = vmax.f32 %v102_v60, %v104_v3  ;;  %v2744_v13 = vld [vmem:[%s3780_s1 + $0xb0] sm:$0xff]   ;;  %v3046_v17 = vpack.c.bf16 %v3015_v2, %v3000_v58 }
  0x19   :  { %2465 = vmatprep.subr.bf16.mxu1 %v2739_v32  ;;  %v155_v9 = vmax.f32 %v103_v61, %v105_v4  ;;  %195 = vst [vmem:[#allocation2 + $0x80] sm:$0xff] %v3015_v2  ;;  %v3030_v11 = vmax.f32 %v152_v62, %v153_v5  ;;  %v2745_v16 = vld [vmem:[%s3780_s1 + $0xf0] sm:$0xff]   ;;  %v110_v20 = vld [vmem:[%s3781_s0 + $0x100] sm:$0xff]  ;;  %v111_v21 = vld [vmem:[%s3781_s0 + $0x108] sm:$0xff] }
  0x1a   :  { %v112_v22 = vld [vmem:[%s3781_s0 + $0x110] sm:$0xff]  ;;  %v113_v23 = vld [vmem:[%s3781_s0 + $0x118] sm:$0xff]  ;;  %v2747_v24 = vld [vmem:[%s3780_s1 + $0xe8] sm:$0xff]  }
  0x1b   :  { %2434 = vmatpush3.bf16.msra.mxu0 %v2738_v19  ;;  %v3037_v14 = vmax.f32 %v154_v8, %v155_v9  ;;  %196 = vst [vmem:[#allocation2 + $0x98] sm:$0xff] %v3030_v11  ;;  %v2746_v19 = vld [vmem:[%s3780_s1 + $0xa8] sm:$0xff]   ;;  %v158_v25 = vmax.f32 %v110_v20, %v112_v22  ;;  %v159_v26 = vmax.f32 %v111_v21, %v113_v23  ;;  %v114_v27 = vld [vmem:[%s3781_s0 + $0x120] sm:$0xff]  ;;  %v116_v31 = vld [vmem:[%s3781_s0 + $0x130] sm:$0xff] }
  0x1c   :  { %2466 = vmatpush3.bf16.msra.mxu1 %v2739_v32  ;;  %2435 = vmatprep.subr.bf16.mxu0 %v2740_v36  ;;  %v115_v28 = vld [vmem:[%s3781_s0 + $0x128] sm:$0xff]  ;;  %v117_v32 = vld [vmem:[%s3781_s0 + $0x138] sm:$0xff]  ;;  %v160_v41 = vmax.f32 %v114_v27, %v116_v31  ;;  %v120_v44 = vld [vmem:[%s3781_s0 + $0x150] sm:$0xff] }
  0x1d   :  { %2467 = vmatprep.subr.bf16.mxu1 %v2741_v39  ;;  %197 = vst [vmem:[#allocation2 + $0xb0] sm:$0xff] %v3037_v14  ;;  %v3089_v35 = vpack.c.bf16 %v3037_v14, %v3030_v11  ;;  %v119_v40 = vld [vmem:[%s3781_s0 + $0x148] sm:$0xff]  ;;  %v121_v45 = vld [vmem:[%s3781_s0 + $0x158] sm:$0xff]  ;;  %v2748_v47 = vld [vmem:[%s3780_s1 + $0xa0] sm:$0xff]  }
  0x1e   :  { %v3011_v63 = vld [vmem:[#allocation2 + $0x1f] sm:$0xff]  ;;  %v3024_v7 = vld [vmem:[#allocation2 + $0x37] sm:$0xff]  ;;  %v163_v50 = vmax.f32 %v119_v40, %v121_v45  ;;  %v123_v59 = vld [vmem:[%s3781_s0 + $0x168] sm:$0xff] }
  0x1f   :  { %v223_v6 = vpack.c.bf16 %v3011_v63, %v207_v42  ;;  %2436 = vmatpush3.bf16.msra.mxu0 %v2740_v36  ;;  %v3032_v12 = vld [vmem:[#allocation2 + $0x4f] sm:$0xff]  ;;  %v3077_v30 = vld [vmem:[#allocation2 + $0x67] sm:$0xff]  ;;  %v3091_v36 = vmax.f32 %v158_v25, %v159_v26  ;;  %v161_v42 = vmax.f32 %v115_v28, %v117_v32  ;;  %v215_v55 = vld [vmem:[#allocation2 + $0xf7] sm:$0xff] }
  0x20   :  { %2468 = vmatpush3.bf16.msra.mxu1 %v2741_v39  ;;  %v224_v15 = vpack.c.bf16 %v3032_v12, %v3024_v7  ;;  %2485 = vmatprep.subr.bf16.mxu0 %v2742_v51  ;;  %v3085_v33 = vld [vmem:[#allocation2 + $0x7f] sm:$0xff]  ;;  %v124_v61 = vld [vmem:[%s3781_s0 + $0x170] sm:$0xff]  ;;  %v127_v5 = vld [vmem:[%s3781_s0 + $0x188] sm:$0xff] }
  0x21   :  { %2469 = vmatprep.mubr.bf16.mxu1 %v223_v6  ;;  %2517 = vmatprep.subr.bf16.mxu1 %v2743_v52  ;;  %v118_v39 = vld [vmem:[%s3781_s0 + $0x140] sm:$0xff]  ;;  %v3101_v43 = vpack.c.bf16 %v3085_v33, %v3077_v30  ;;  %199 = vst [vmem:[#allocation2 + $0x110] sm:$0xff] %v3091_v36  ;;  %v267_v48 = vpack.c.bf16 %v3091_v36, %v2799_v1  ;;  %v2750_v56 = vld [vmem:[%s3780_s1 + $0x98] sm:$0xff]   ;;  %v2752_v4 = vld [vmem:[%s3780_s1 + $0x90] sm:$0xff]  }
  0x22   :  { %2438 = vmatmul.mubr.bf16.vlgmr.msra.gmra.mxu0 %v264_v0  ;;  %v3109_v46 = vld [vmem:[#allocation2 + $0x97] sm:$0xff]  ;;  %v162_v49 = vmax.f32 %v118_v39, %v120_v44  ;;  %v2749_v54 = vld [vmem:[%s3780_s1 + $0xe0] sm:$0xff]   ;;  %v131_v21 = vld [vmem:[%s3781_s0 + $0x1a8] sm:$0xff] }
  0x23   :  { %2470 = vmatmul.mubr.bf16.vlgmr.msra.gmra.mxu1 %v224_v15  ;;  %2486 = vmatpush3.bf16.msra.mxu0 %v2742_v51  ;;  %v122_v57 = vld [vmem:[%s3781_s0 + $0x160] sm:$0xff]  ;;  %v2751_v60 = vld [vmem:[%s3780_s1 + $0xd8] sm:$0xff]   ;;  %v128_v6 = vld [vmem:[%s3781_s0 + $0x190] sm:$0xff] }
  0x24   :  { %2518 = vmatpush3.bf16.msra.mxu1 %v2743_v52  ;;  %2487 = vmatprep.subr.bf16.mxu0 %v2744_v13  ;;  %v3118_v51 = vld [vmem:[#allocation2 + $0xaf] sm:$0xff]  ;;  %v3120_v52 = vmax.f32 %v160_v41, %v161_v42  ;;  %v3130_v1 = vmax.f32 %v162_v49, %v163_v50  ;;  %v125_v62 = vld [vmem:[%s3781_s0 + $0x178] sm:$0xff]  ;;  %v126_v0 = vld [vmem:[%s3781_s0 + $0x180] sm:$0xff]  ;;  %v164_v9 = vmax.f32 %v122_v57, %v124_v61 }
  0x25   :  { %2519 = vmatprep.subr.bf16.mxu1 %v2745_v16  ;;  %2441 = vmatprep.mubr.bf16.mxu0 %v3046_v17  ;;  %v3125_v53 = vpack.c.bf16 %v3118_v51, %v3109_v46  ;;  %v129_v8 = vld [vmem:[%s3781_s0 + $0x198] sm:$0xff]  ;;  %v130_v20 = vld [vmem:[%s3781_s0 + $0x1a0] sm:$0xff]  ;;  %v2753_v23 = vld [vmem:[%s3780_s1 + $0xd0] sm:$0xff]  }
  0x26   :  { %2473 = vmatprep.mubr.bf16.mxu1 %v3101_v43  ;;  %200 = vst [vmem:[#allocation2 + $0x128] sm:$0xff] %v3120_v52  ;;  %201 = vst [vmem:[#allocation2 + $0x140] sm:$0xff] %v3130_v1  ;;  %v3158_v3 = vpack.c.bf16 %v3130_v1, %v3120_v52  ;;  %v132_v25 = vld [vmem:[%s3781_s0 + $0x1b0] sm:$0xff]  ;;  %v133_v26 = vld [vmem:[%s3781_s0 + $0x1b8] sm:$0xff] }
  0x27   :  { %2488 = vmatpush3.bf16.msra.mxu0 %v2744_v13  ;;  %v165_v13 = vmax.f32 %v123_v59, %v125_v62  ;;  %v134_v27 = vld [vmem:[%s3781_s0 + $0x1c0] sm:$0xff]  ;;  %v135_v31 = vld [vmem:[%s3781_s0 + $0x1c8] sm:$0xff]  ;;  %v136_v32 = vld [vmem:[%s3781_s0 + $0x1d0] sm:$0xff]  ;;  %v168_v40 = vmax.f32 %v130_v20, %v132_v25  ;;  %v169_v41 = vmax.f32 %v131_v21, %v133_v26  ;;  %v796_v20 = vpack.c.bf16 %v3024_v7, %v3011_v63 }
  0x28   :  { %2520 = vmatpush3.bf16.msra.mxu1 %v2745_v16  ;;  %2489 = vmatprep.subr.bf16.mxu0 %v2746_v19  ;;  %v3172_v15 = vld [vmem:[#allocation2 + $0x10f] sm:$0xff]  ;;  %v166_v16 = vmax.f32 %v126_v0, %v128_v6  ;;  %v137_v39 = vld [vmem:[%s3781_s0 + $0x1d8] sm:$0xff]  ;;  %v170_v44 = vmax.f32 %v134_v27, %v136_v32  ;;  %v3242_v61 = vld [vmem:[#allocation2 + $0x21] sm:$0xff] }
  0x29   :  { %2521 = vmatprep.subr.bf16.mxu1 %v2747_v24  ;;  %v227_v22 = vpack.c.bf16 %v3172_v15, %v215_v55  ;;  %v171_v45 = vmax.f32 %v135_v31, %v137_v39  ;;  %v3217_v49 = vmax.f32 %v168_v40, %v169_v41  ;;  %v2754_v55 = vld [vmem:[%s3780_s1 + $0x88] sm:$0xff]   ;;  %v2757_v62 = vld [vmem:[%s3780_s1 + $0xc0] sm:$0xff]   ;;  %v2759_v26 = vld [vmem:[%s3780_s1 + $0x178] sm:$0xff]  }
  0x2a   :  { %2442 = vmatmul.mubr.bf16.gmra.mxu0 %v3089_v35  ;;  %v2755_v57 = vld [vmem:[%s3780_s1 + $0xc8] sm:$0xff]   ;;  %v106_v63 = vld [vmem:[%s3781_s0 + $0xe0] sm:$0xff]  ;;  %v108_v31 = vld [vmem:[%s3781_s0 + $0xf0] sm:$0xff] }
  0x2b   :  { %2490 = vmatpush3.bf16.msra.mxu0 %v2746_v19  ;;  %2445 = vmatprep.mubr.bf16.mxu0 %v267_v48  ;;  %v167_v19 = vmax.f32 %v127_v5, %v129_v8  ;;  %204 = vst [vmem:[#allocation2 + $0x188] sm:$0xff] %v3217_v49  ;;  %v578_v59 = vld [vmem:[#allocation2 + $0x9] sm:$0xff]  ;;  %v109_v32 = vld [vmem:[%s3781_s0 + $0xf8] sm:$0xff]  ;;  %v156_v40 = vmax.f32 %v106_v63, %v108_v31  ;;  %v2765_v18 = vld [vmem:[%s3780_s1 + $0x160] sm:$0xff]  }
  0x2c   :  { %2474 = vmatmul.mubr.bf16.gmra.mxu1 %v3125_v53  ;;  %2491 = vmatprep.subr.bf16.mxu0 %v2748_v47  ;;  %v594_v0 = vpack.c.bf16 %v3242_v61, %v578_v59  ;;  %v3271_v21 = vld [vmem:[#allocation2 + $0x69] sm:$0xff] }
  0x2d   :  { %2522 = vmatpush3.bf16.msra.mxu1 %v2747_v24  ;;  %v3184_v24 = vmax.f32 %v164_v9, %v165_v13  ;;  %v3195_v28 = vmax.f32 %v166_v16, %v167_v19  ;;  %2477 = vmatprep.mubr.bf16.mxu1 %v227_v22  ;;  %v3207_v42 = vld [vmem:[#allocation2 + $0x127] sm:$0xff]  ;;  %v3259_v9 = vld [vmem:[#allocation2 + $0x51] sm:$0xff] }
  0x2e   :  { %2523 = vmatprep.subr.bf16.mxu1 %v2749_v54  ;;  %v2758_v16 = vld [vmem:[%s3780_s1 + $0x138] sm:$0xff]   ;;  %v3273_v22 = vld [vmem:[#allocation2 + $0x81] sm:$0xff]  ;;  %v2760_v39 = vld [vmem:[%s3780_s1 + $0x130] sm:$0xff]  }
  0x2f   :  { %2492 = vmatpush3.bf16.msra.mxu0 %v2748_v47  ;;  %202 = vst [vmem:[#allocation2 + $0x158] sm:$0xff] %v3184_v24  ;;  %v3210_v47 = vld [vmem:[#allocation2 + $0x13f] sm:$0xff]  ;;  %203 = vst [vmem:[#allocation2 + $0x170] sm:$0xff] %v3195_v28  ;;  %v3215_v48 = vpack.c.bf16 %v3195_v28, %v3184_v24  ;;  %v3291_v7 = vpack.c.bf16 %v3273_v22, %v3271_v21  ;;  %v107_v27 = vld [vmem:[%s3781_s0 + $0xe8] sm:$0xff] }
  0x30   :  { %2493 = vmatprep.subr.bf16.mxu0 %v2750_v56  ;;  %v3221_v50 = vpack.c.bf16 %v3210_v47, %v3207_v42  ;;  %v157_v41 = vmax.f32 %v107_v27, %v109_v32  ;;  %v2762_v59 = vld [vmem:[%s3780_s1 + $0x128] sm:$0xff]   ;;  %v2766_v27 = vld [vmem:[%s3780_s1 + $0x118] sm:$0xff]   ;;  %v2776_v29 = vld [vmem:[%s3780_s1 + $0x1b0] sm:$0xff]  }
  0x31   :  { %2524 = vmatpush3.bf16.msra.mxu1 %v2749_v54  ;;  %v3223_v54 = vmax.f32 %v170_v44, %v171_v45  ;;  %v3307_v44 = vld [vmem:[#allocation2 + $0x99] sm:$0xff]  ;;  %v3340_v63 = vld [vmem:[#allocation2 + $0x141] sm:$0xff]  ;;  %v2777_v58 = vld [vmem:[%s3780_s1 + $0x1f0] sm:$0xff]  }
  0x32   :  { %2446 = vmatmul.mubr.bf16.gmra.mxu0 %v3158_v3  ;;  %2525 = vmatprep.subr.bf16.mxu1 %v2751_v60  ;;  %v3261_v13 = vld [vmem:[#allocation2 + $0x187] sm:$0xff]  ;;  %v3309_v45 = vmax.f32 %v156_v40, %v157_v41  ;;  %v140_v41 = vld [vmem:[%s3781_s0 + $0x1f0] sm:$0xff]  ;;  %v1202_v37 = vpack.c.bf16 %v3307_v44, %v3273_v22 }
  0x33   :  { %2494 = vmatpush3.bf16.msra.mxu0 %v2750_v56  ;;  %2449 = vmatprep.mubr.bf16.mxu0 %v3215_v48  ;;  %205 = vst [vmem:[#allocation2 + $0x1a0] sm:$0xff] %v3223_v54  ;;  %v3234_v56 = vpack.c.bf16 %v3223_v54, %v3217_v49  ;;  %v139_v40 = vld [vmem:[%s3781_s0 + $0x1e8] sm:$0xff] }
  0x34   :  { %2495 = vmatprep.subr.bf16.mxu0 %v2752_v4  ;;  %2478 = vmatmul.mubr.bf16.gmra.mxu1 %v3221_v50  ;;  %198 = vst [vmem:[#allocation2 + $0xc8] sm:$0xff] %v3309_v45 }
  0x35   :  { %2526 = vmatpush3.bf16.msra.mxu1 %v2751_v60  ;;  %v2756_v60 = vld [vmem:[%s3780_s1 + $0x80] sm:$0xff]  }
  0x36   :  { %2527 = vmatprep.subr.bf16.mxu1 %v2753_v23  ;;  %v3248_v5 = vld [vmem:[#allocation2 + $0x157] sm:$0xff]  ;;  %v3250_v6 = vld [vmem:[#allocation2 + $0x16f] sm:$0xff] }
  0x37   :  { %2496 = vmatpush3.bf16.msra.mxu0 %v2752_v4  ;;  %v3253_v4 = vld [vmem:[#allocation2 + $0x39] sm:$0xff]  ;;  %v3257_v8 = vpack.c.bf16 %v3250_v6, %v3248_v5  ;;  %v3348_v32 = vld [vmem:[#allocation2 + $0x171] sm:$0xff] }
  0x38   :  { %2497 = vmatprep.subr.bf16.mxu0 %v2754_v55  ;;  %v3281_v25 = vpack.c.bf16 %v3259_v9, %v3253_v4  ;;  %v3346_v31 = vld [vmem:[#allocation2 + $0x159] sm:$0xff] }
  0x39   :  { %2528 = vmatpush3.bf16.msra.mxu1 %v2753_v23  ;;  %2481 = vmatprep.mubr.bf16.mxu1 %v3257_v8 }
  0x3a   :  { %2450 = vmatmul.mubr.bf16.gmra.mxu0 %v3234_v56  ;;  %2529 = vmatprep.subr.bf16.mxu1 %v2755_v57  ;;  %v3267_v19 = vld [vmem:[#allocation2 + $0x19f] sm:$0xff] }
  0x3b   :  { %2498 = vmatpush3.bf16.msra.mxu0 %v2754_v55  ;;  %2501 = vmatprep.mubr.bf16.mxu0 %v594_v0  ;;  %v3277_v23 = vpack.c.bf16 %v3267_v19, %v3261_v13  ;;  %v3312_v55 = vld [vmem:[#allocation2 + $0xb1] sm:$0xff]  ;;  %v798_v0 = vpack.c.bf16 %v3109_v46, %v3085_v33  ;;  %v2763_v33 = vld [vmem:[%s3780_s1 + $0x168] sm:$0xff]  }
  0x3c   :  { %2499 = vmatprep.subr.bf16.mxu0 %v2756_v60  ;;  %v3338_v46 = vld [vmem:[#allocation2 + $0x129] sm:$0xff] }
  0x3d   :  { %2530 = vmatpush3.bf16.msra.mxu1 %v2755_v57  ;;  %v797_v57 = vpack.c.bf16 %v3077_v30, %v3032_v12  ;;  %v3329_v12 = vpack.c.bf16 %v3312_v55, %v3307_v44  ;;  %v3373_v10 = vpack.c.bf16 %v3340_v63, %v3338_v46  ;;  %v2781_v44 = vld [vmem:[%s3780_s1 + $0x1e0] sm:$0xff]  }
  0x3e   :  { %2531 = vmatprep.subr.bf16.mxu1 %v2757_v62  ;;  %2482 = vmatmul.mubr.bf16.gmra.mxu1 %v3277_v23 }
  0x3f   :  { %2500 = vmatpush3.bf16.msra.mxu0 %v2756_v60  ;;  %2533 = vmatprep.mubr.bf16.mxu1 %v796_v20  ;;  %v586_v60 = vld [vmem:[#allocation2 + $0xf9] sm:$0xff] }
  0x40   :  { %2549 = vmatprep.subr.bf16.mxu0 %v2758_v16  ;;  %v2764_v20 = vld [vmem:[%s3780_s1 + $0x120] sm:$0xff]  }
  0x41   :  { %2532 = vmatpush3.bf16.msra.mxu1 %v2757_v62  ;;  %v3320_v62 = vld [vmem:[#allocation2 + $0x111] sm:$0xff] }
  0x42   :  { %2502 = vmatmul.mubr.bf16.vlgmr.msra.gmra.mxu0 %v3281_v25  ;;  %2581 = vmatprep.subr.bf16.mxu1 %v2759_v26  ;;  %v598_v30 = vpack.c.bf16 %v3320_v62, %v586_v60  ;;  %v141_v60 = vld [vmem:[%s3781_s0 + $0x1f8] sm:$0xff]  ;;  %v1204_v22 = vpack.c.bf16 %v3338_v46, %v3320_v62 }
  0x43   :  { %2550 = vmatpush3.bf16.msra.mxu0 %v2758_v16  ;;  %2505 = vmatprep.mubr.bf16.mxu0 %v3291_v7  ;;  %v2761_v16 = vld [vmem:[%s3780_s1 + $0x170] sm:$0xff]   ;;  %v2783_v62 = vld [vmem:[%s3780_s1 + $0x1d8] sm:$0xff]  }
  0x44   :  { %2551 = vmatprep.subr.bf16.mxu0 %v2760_v39 }
  0x46   :  { %2534 = vmatmul.mubr.bf16.vlgmr.msra.gmra.mxu1 %v797_v57 }
  0x47   :  { %2552 = vmatpush3.bf16.msra.mxu0 %v2760_v39  ;;  %2582 = vmatpush3.bf16.msra.mxu1 %v2759_v26  ;;  %v138_v26 = vld [vmem:[%s3781_s0 + $0x1e0] sm:$0xff] }
  0x48   :  { %2553 = vmatprep.subr.bf16.mxu0 %v2762_v59  ;;  %2537 = vmatprep.mubr.bf16.mxu1 %v798_v0  ;;  %v3353_v39 = vld [vmem:[#allocation2 + $0xc7] sm:$0xff]  ;;  %v172_v0 = vmax.f32 %v138_v26, %v140_v41  ;;  %v802_v41 = vpack.c.bf16 %v3261_v13, %v3250_v6  ;;  %v2774_v13 = vld [vmem:[%s3780_s1 + $0x1b8] sm:$0xff]  }
  0x49   :  { %2583 = vmatprep.subr.bf16.mxu1 %v2761_v16  ;;  %v799_v57 = vpack.c.bf16 %v3353_v39, %v3118_v51  ;;  %v3377_v51 = vpack.c.bf16 %v3348_v32, %v3346_v31 }
  0x4a   :  { %2506 = vmatmul.mubr.bf16.gmra.mxu0 %v3329_v12 }
  0x4b   :  { %2554 = vmatpush3.bf16.msra.mxu0 %v2762_v59  ;;  %2509 = vmatprep.mubr.bf16.mxu0 %v598_v30  ;;  %v800_v59 = vpack.c.bf16 %v3207_v42, %v3172_v15  ;;  %v173_v30 = vmax.f32 %v139_v40, %v141_v60  ;;  %v2768_v15 = vld [vmem:[%s3780_s1 + $0x110] sm:$0xff]   ;;  %v2767_v42 = vld [vmem:[%s3780_s1 + $0x158] sm:$0xff]   ;;  %v2770_v40 = vld [vmem:[%s3780_s1 + $0x108] sm:$0xff]   ;;  %v1200_v60 = vpack.c.bf16 %v3253_v4, %v3242_v61 }
  0x4c   :  { %2555 = vmatprep.subr.bf16.mxu0 %v2764_v20  ;;  %2584 = vmatpush3.bf16.msra.mxu1 %v2761_v16  ;;  %v3389_v16 = vld [vmem:[#allocation2 + $0x189] sm:$0xff]  ;;  %v3785_v61 = vpack.c.bf16 %v3030_v11, %v3015_v2  ;;  %v1201_v4 = vpack.c.bf16 %v3271_v21, %v3259_v9  ;;  %v1001_v2 = vpack.c.bf16 %v3309_v45, %v3037_v14  ;;  %v2780_v9 = vld [vmem:[%s3780_s1 + $0x1a0] sm:$0xff]  }
  0x4d   :  { %2585 = vmatprep.subr.bf16.mxu1 %v2763_v33  ;;  %v3379_v26 = vmax.f32 %v172_v0, %v173_v30  ;;  %v2773_v0 = vld [vmem:[%s3780_s1 + $0x140] sm:$0xff]   ;;  %v1002_v11 = vpack.c.bf16 %v3120_v52, %v3091_v36  ;;  %v3459_v21 = vld [vmem:[#allocation2 + $0xc9] sm:$0xff]  ;;  %v2782_v52 = vld [vmem:[%s3780_s1 + $0x198] sm:$0xff]   ;;  %v1206_v46 = vpack.c.bf16 %v3389_v16, %v3348_v32 }
  0x4e   :  { %2538 = vmatmul.mubr.bf16.gmra.mxu1 %v799_v57  ;;  %v2779_v14 = vld [vmem:[%s3780_s1 + $0x1e8] sm:$0xff]   ;;  %v1203_v36 = vpack.c.bf16 %v3459_v21, %v3312_v55  ;;  %v1004_v55 = vpack.c.bf16 %v3217_v49, %v3195_v28  ;;  %v2784_v30 = vld [vmem:[%s3780_s1 + $0x190] sm:$0xff]  }
  0x4f   :  { %2556 = vmatpush3.bf16.msra.mxu0 %v2764_v20  ;;  %2541 = vmatprep.mubr.bf16.mxu1 %v800_v59  ;;  %206 = vst [vmem:[#allocation2 + $0x1b8] sm:$0xff] %v3379_v26  ;;  %v3392_v20 = vld [vmem:[#allocation2 + $0x1a1] sm:$0xff]  ;;  %v1003_v59 = vpack.c.bf16 %v3184_v24, %v3130_v1  ;;  %v1205_v1 = vpack.c.bf16 %v3346_v31, %v3340_v63  ;;  %v1387_v28 = vld [vmem:[#allocation2 + $0x37] sm:$0xff]  ;;  %v1388_v49 = vld [vmem:[#allocation2 + $0x4f] sm:$0xff] }
  0x50   :  { %2557 = vmatprep.subr.bf16.mxu0 %v2766_v27  ;;  %2586 = vmatpush3.bf16.msra.mxu1 %v2763_v33  ;;  %v801_v33 = vpack.c.bf16 %v3248_v5, %v3210_v47  ;;  %v3406_v57 = vpack.c.bf16 %v3392_v20, %v3389_v16  ;;  %v2772_v47 = vld [vmem:[%s3780_s1 + $0x100] sm:$0xff]   ;;  %v2771_v5 = vld [vmem:[%s3780_s1 + $0x148] sm:$0xff]   ;;  %v1403_v63 = vpack.c.bf16 %v1388_v49, %v1387_v28  ;;  %v1589_v16 = vld [vmem:[#allocation2 + $0x38] sm:$0xff] }
  0x51   :  { %2587 = vmatprep.subr.bf16.mxu1 %v2765_v18  ;;  %v2786_v24 = vld [vmem:[%s3780_s1 + $0x188] sm:$0xff]   ;;  %v2788_v31 = vld [vmem:[%s3780_s1 + $0x180] sm:$0xff]  }
  0x52   :  { %2510 = vmatmul.mubr.bf16.gmra.mxu0 %v3373_v10  ;;  %v2787_v32 = vld [vmem:[%s3780_s1 + $0x1c8] sm:$0xff]  }
  0x53   :  { %2558 = vmatpush3.bf16.msra.mxu0 %v2766_v27  ;;  %2513 = vmatprep.mubr.bf16.mxu0 %v3377_v51  ;;  %v2769_v27 = vld [vmem:[%s3780_s1 + $0x150] sm:$0xff]  }
  0x54   :  { %2559 = vmatprep.subr.bf16.mxu0 %v2768_v15  ;;  %2588 = vmatpush3.bf16.msra.mxu1 %v2765_v18 }
  0x55   :  { %2589 = vmatprep.subr.bf16.mxu1 %v2767_v42 }
  0x56   :  { %2542 = vmatmul.mubr.bf16.gmra.mxu1 %v801_v33  ;;  %v3411_v18 = vld [vmem:[#allocation2 + $0x1b7] sm:$0xff] }
  0x57   :  { %2560 = vmatpush3.bf16.msra.mxu0 %v2768_v15  ;;  %2545 = vmatprep.mubr.bf16.mxu1 %v802_v41  ;;  %v803_v6 = vpack.c.bf16 %v3411_v18, %v3267_v19  ;;  %v2778_v19 = vld [vmem:[%s3780_s1 + $0x1a8] sm:$0xff]   ;;  %v2785_v15 = vld [vmem:[%s3780_s1 + $0x1d0] sm:$0xff]   ;;  %v3499_v33 = vld [vmem:[#allocation2 + $0x1b9] sm:$0xff] }
  0x58   :  { %2561 = vmatprep.subr.bf16.mxu0 %v2770_v40  ;;  %2590 = vmatpush3.bf16.msra.mxu1 %v2767_v42  ;;  %v1005_v42 = vpack.c.bf16 %v3379_v26, %v3223_v54  ;;  %v1590_v54 = vld [vmem:[#allocation2 + $0x50] sm:$0xff]  ;;  %v2790_v41 = vld [vmem:[%s3780_s1 + $0x238] sm:$0xff]  }
  0x59   :  { %2591 = vmatprep.subr.bf16.mxu1 %v2769_v27 }
  0x5a   :  { %2514 = vmatmul.mubr.bf16.gmra.mxu0 %v3406_v57 }
  0x5b   :  { %2562 = vmatpush3.bf16.msra.mxu0 %v2770_v40  ;;  %2565 = vmatprep.mubr.bf16.mxu0 %v998_v38  ;;  %v2775_v38 = vld [vmem:[%s3780_s1 + $0x1f8] sm:$0xff]   ;;  %v1207_v40 = vpack.c.bf16 %v3499_v33, %v3392_v20 }
  0x5c   :  { %2563 = vmatprep.subr.bf16.mxu0 %v2772_v47  ;;  %2592 = vmatpush3.bf16.msra.mxu1 %v2769_v27  ;;  %v1605_v27 = vpack.c.bf16 %v1590_v54, %v1589_v16  ;;  %v1394_v20 = vld [vmem:[#allocation2 + $0xdf] sm:$0xff] }
  0x5d   :  { %2593 = vmatprep.subr.bf16.mxu1 %v2771_v5 }
  0x5e   :  { %2546 = vmatmul.mubr.bf16.gmra.mxu1 %v803_v6  ;;  %v2792_v6 = vld [vmem:[%s3780_s1 + $0x228] sm:$0xff]  }
  0x5f   :  { %2564 = vmatpush3.bf16.msra.mxu0 %v2772_v47  ;;  %2597 = vmatprep.mubr.bf16.mxu1 %v1200_v60  ;;  %v2789_v47 = vld [vmem:[%s3780_s1 + $0x1c0] sm:$0xff]  }
  0x60   :  { %2613 = vmatprep.subr.bf16.mxu0 %v2774_v13  ;;  %2594 = vmatpush3.bf16.msra.mxu1 %v2771_v5  ;;  %v2791_v5 = vld [vmem:[%s3780_s1 + $0x230] sm:$0xff]  }
  0x61   :  { %2595 = vmatprep.subr.bf16.mxu1 %v2773_v0 }
  0x62   :  { %2566 = vmatmul.mubr.bf16.vlgmr.msra.gmra.mxu0 %v3784_v34 }
  0x63   :  { %2614 = vmatpush3.bf16.msra.mxu0 %v2774_v13  ;;  %2569 = vmatprep.mubr.bf16.mxu0 %v3785_v61  ;;  %v1406_v13 = vpack.c.bf16 %v1394_v20, %v3353_v39 }
  0x64   :  { %2615 = vmatprep.subr.bf16.mxu0 %v2776_v29  ;;  %2596 = vmatpush3.bf16.msra.mxu1 %v2773_v0 }
  0x65   :  { %2645 = vmatprep.subr.bf16.mxu1 %v2775_v38 }
  0x67   :  { %2616 = vmatpush3.bf16.msra.mxu0 %v2776_v29  ;;  %2598 = vmatmul.mubr.bf16.vlgmr.msra.gmra.mxu1 %v1201_v4 }
  0x68   :  { %2617 = vmatprep.subr.bf16.mxu0 %v2778_v19  ;;  %2646 = vmatpush3.bf16.msra.mxu1 %v2775_v38 }
  0x69   :  { %2601 = vmatprep.mubr.bf16.mxu1 %v1202_v37  ;;  %2647 = vmatprep.subr.bf16.mxu1 %v2777_v58 }
  0x6a   :  { %2570 = vmatmul.mubr.bf16.gmra.mxu0 %v1001_v2 }
  0x6b   :  { %2618 = vmatpush3.bf16.msra.mxu0 %v2778_v19  ;;  %2573 = vmatprep.mubr.bf16.mxu0 %v1002_v11 }
  0x6c   :  { %2619 = vmatprep.subr.bf16.mxu0 %v2780_v9  ;;  %2648 = vmatpush3.bf16.msra.mxu1 %v2777_v58 }
  0x6d   :  { %2649 = vmatprep.subr.bf16.mxu1 %v2779_v14 }
  0x6f   :  { %2620 = vmatpush3.bf16.msra.mxu0 %v2780_v9  ;;  %2602 = vmatmul.mubr.bf16.gmra.mxu1 %v1203_v36 }
  0x70   :  { %2621 = vmatprep.subr.bf16.mxu0 %v2782_v52  ;;  %2650 = vmatpush3.bf16.msra.mxu1 %v2779_v14 }
  0x71   :  { %2605 = vmatprep.mubr.bf16.mxu1 %v1204_v22  ;;  %2651 = vmatprep.subr.bf16.mxu1 %v2781_v44 }
  0x72   :  { %2574 = vmatmul.mubr.bf16.gmra.mxu0 %v1003_v59 }
  0x73   :  { %2622 = vmatpush3.bf16.msra.mxu0 %v2782_v52  ;;  %2577 = vmatprep.mubr.bf16.mxu0 %v1004_v55 }
  0x74   :  { %2623 = vmatprep.subr.bf16.mxu0 %v2784_v30  ;;  %2652 = vmatpush3.bf16.msra.mxu1 %v2781_v44 }
  0x75   :  { %2653 = vmatprep.subr.bf16.mxu1 %v2783_v62 }
  0x77   :  { %2624 = vmatpush3.bf16.msra.mxu0 %v2784_v30  ;;  %2606 = vmatmul.mubr.bf16.gmra.mxu1 %v1205_v1 }
  0x78   :  { %2625 = vmatprep.subr.bf16.mxu0 %v2786_v24  ;;  %2654 = vmatpush3.bf16.msra.mxu1 %v2783_v62 }
  0x79   :  { %2609 = vmatprep.mubr.bf16.mxu1 %v1206_v46  ;;  %2655 = vmatprep.subr.bf16.mxu1 %v2785_v15 }
  0x7a   :  { %2578 = vmatmul.mubr.bf16.gmra.mxu0 %v1005_v42 }
  0x7b   :  { %2626 = vmatpush3.bf16.msra.mxu0 %v2786_v24  ;;  %2629 = vmatprep.mubr.bf16.mxu0 %v1403_v63 }
  0x7c   :  { %2627 = vmatprep.subr.bf16.mxu0 %v2788_v31  ;;  %2656 = vmatpush3.bf16.msra.mxu1 %v2785_v15 }
  0x7d   :  { %2657 = vmatprep.subr.bf16.mxu1 %v2787_v32 }
  0x7f   :  { %2628 = vmatpush3.bf16.msra.mxu0 %v2788_v31  ;;  %2610 = vmatmul.mubr.bf16.gmra.mxu1 %v1207_v40 }
  0x80   :  { %2677 = vmatprep.subr.bf16.mxu0 %v2790_v41  ;;  %2658 = vmatpush3.bf16.msra.mxu1 %v2787_v32 }
  0x81   :  { %2661 = vmatprep.mubr.bf16.mxu1 %v1605_v27  ;;  %2659 = vmatprep.subr.bf16.mxu1 %v2789_v47 }
  0x82   :  { %2630 = vmatmul.mubr.bf16.vlgmr.msra.gmra.mxu0 %v3101_v43  ;;  %v2793_v43 = vld [vmem:[%s3780_s1 + $0x220] sm:$0xff]  }
  0x83   :  { %2678 = vmatpush3.bf16.msra.mxu0 %v2790_v41  ;;  %2633 = vmatprep.mubr.bf16.mxu0 %v3125_v53  ;;  %v2798_v53 = vld [vmem:[#allocation2 + $0x8] sm:$0xff] }
  0x84   :  { %2679 = vmatprep.subr.bf16.mxu0 %v2791_v5  ;;  %2660 = vmatpush3.bf16.msra.mxu1 %v2789_v47  ;;  %v1608_v60 = vpack.c.bf16 %v2798_v53, %v3309_v45  ;;  %v2796_v45 = vld [vmem:[%s3780_s1 + $0x208] sm:$0xff]  }
  0x85   :  { %2709 = vmatprep.subr.bf16.mxu1 %v2790_v41 }
  0x87   :  { %2680 = vmatpush3.bf16.msra.mxu0 %v2791_v5  ;;  %2662 = vmatmul.mubr.bf16.vlgmr.msra.gmra.mxu1 %v3046_v17  ;;  %v2794_v17 = vld [vmem:[%s3780_s1 + $0x218] sm:$0xff]  }
  0x88   :  { %2681 = vmatprep.subr.bf16.mxu0 %v2792_v6  ;;  %2717 = vmatpush3.bf16.msra.mxu1 %v2790_v41 }
  0x89   :  { %2665 = vmatprep.mubr.bf16.mxu1 %v3089_v35  ;;  %2710 = vmatprep.subr.bf16.mxu1 %v2791_v5  ;;  %v2795_v35 = vld [vmem:[%s3780_s1 + $0x210] sm:$0xff]  }
  0x8a   :  { %2634 = vmatmul.mubr.bf16.gmra.mxu0 %v1406_v13 }
  0x8b   :  { %2682 = vmatpush3.bf16.msra.mxu0 %v2792_v6  ;;  %2637 = vmatprep.mubr.bf16.mxu0 %v3221_v50  ;;  %v1402_v50 = vld [vmem:[#allocation2 + $0x1cf] sm:$0xff] }
  0x8c   :  { %2683 = vmatprep.subr.bf16.mxu0 %v2793_v43  ;;  %2718 = vmatpush3.bf16.msra.mxu1 %v2791_v5  ;;  %v1410_v39 = vpack.c.bf16 %v1402_v50, %v3411_v18 }
  0x8d   :  { %2711 = vmatprep.subr.bf16.mxu1 %v2792_v6 }
  0x8f   :  { %2684 = vmatpush3.bf16.msra.mxu0 %v2793_v43  ;;  %2666 = vmatmul.mubr.bf16.gmra.mxu1 %v1608_v60 }
  0x90   :  { %2685 = vmatprep.subr.bf16.mxu0 %v2794_v17  ;;  %2719 = vmatpush3.bf16.msra.mxu1 %v2792_v6 }
  0x91   :  { %2669 = vmatprep.mubr.bf16.mxu1 %v3158_v3  ;;  %2712 = vmatprep.subr.bf16.mxu1 %v2793_v43  ;;  %v2797_v3 = vld [vmem:[%s3780_s1 + $0x200] sm:$0xff]  }
  0x92   :  { %2638 = vmatmul.mubr.bf16.gmra.mxu0 %v3257_v8  ;;  %v1612_v8 = vpack.c.bf16 %v2798_v53, %v3379_v26 }
  0x93   :  { %2686 = vmatpush3.bf16.msra.mxu0 %v2794_v17  ;;  %2641 = vmatprep.mubr.bf16.mxu0 %v3277_v23  ;;  %v1806_v23 = vld [vmem:[#allocation2 + $0x1d1] sm:$0xff] }
  0x94   :  { %2687 = vmatprep.subr.bf16.mxu0 %v2795_v35  ;;  %2720 = vmatpush3.bf16.msra.mxu1 %v2793_v43 }
  0x95   :  { %2713 = vmatprep.subr.bf16.mxu1 %v2794_v17 }
  0x97   :  { %2688 = vmatpush3.bf16.msra.mxu0 %v2795_v35  ;;  %2670 = vmatmul.mubr.bf16.gmra.mxu1 %v3215_v48  ;;  %v1798_v48 = vld [vmem:[#allocation2 + $0xe1] sm:$0xff] }
  0x98   :  { %2689 = vmatprep.subr.bf16.mxu0 %v2796_v45  ;;  %2721 = vmatpush3.bf16.msra.mxu1 %v2794_v17 }
  0x99   :  { %2673 = vmatprep.mubr.bf16.mxu1 %v3234_v56  ;;  %2714 = vmatprep.subr.bf16.mxu1 %v2795_v35  ;;  %v1810_v56 = vpack.c.bf16 %v1798_v48, %v3459_v21 }
  0x9a   :  { %2642 = vmatmul.mubr.bf16.gmra.mxu0 %v1410_v39 }
  0x9b   :  { %2690 = vmatpush3.bf16.msra.mxu0 %v2796_v45  ;;  %2693 = vmatprep.mubr.bf16.mxu0 %v3281_v25  ;;  %v1814_v25 = vpack.c.bf16 %v1806_v23, %v3499_v33 }
  0x9c   :  { %2691 = vmatprep.subr.bf16.mxu0 %v2797_v3  ;;  %2722 = vmatpush3.bf16.msra.mxu1 %v2795_v35 }
  0x9d   :  { %2715 = vmatprep.subr.bf16.mxu1 %v2796_v45 }
  0x9f   :  { %2692 = vmatpush3.bf16.msra.mxu0 %v2797_v3  ;;  %2674 = vmatmul.mubr.bf16.gmra.mxu1 %v1612_v8 }
  0xa0   :  { %2723 = vmatpush3.bf16.msra.mxu1 %v2796_v45  ;;  %2701 = vmatprep.mubr.bf16.mxu1 %v3373_v10 }
  0xa1   :  { %2716 = vmatprep.subr.bf16.mxu1 %v2797_v3 }
  0xa2   :  { %2694 = vmatmul.mubr.bf16.vlgmr.msra.gmra.mxu0 %v3291_v7 }
  0xa3   :  { %2697 = vmatprep.mubr.bf16.mxu0 %v3329_v12 }
  0xa4   :  { %2724 = vmatpush3.bf16.msra.mxu1 %v2797_v3 }
  0xa7   :  { %2702 = vmatmul.mubr.bf16.vlgmr.msra.gmra.mxu1 %v3377_v51 }
  0xa8   :  { %2705 = vmatprep.mubr.bf16.mxu1 %v3406_v57 }
  0xaa   :  { %2698 = vmatmul.mubr.bf16.gmra.mxu0 %v1810_v56 }
  0xaf   :  { %2706 = vmatmul.mubr.bf16.gmra.mxu1 %v1814_v25 }
  0xe2   :  { %v2439_v26 = vpop.f32.mrf.mxu0 }
  0xe3   :  { %v2471_v10 = vpop.f32.mrf.mxu1 }
  0xe4   :  { %v524_v18 = vadd.f32 %v2471_v10, %v2439_v26  ;;  %v370_v0 = vpop.f32.mrf.mxu0 }
  0xe5   :  { %v515_v7 = vpop.f32.mrf.mxu1 }
  0xe6   :  { %v516_v29 = vadd.f32 %v515_v7, %v370_v0  ;;  %v2440_v12 = vpop.f32.mrf.mxu0 }
  0xe7   :  { %v2472_v34 = vpop.f32.mrf.mxu1 }
  0xe8   :  { %v527_v38 = vadd.f32 %v2472_v34, %v2440_v12  ;;  %v373_v61 = vpop.f32.mrf.mxu0 }
  0xe9   :  { %v518_v4 = vpop.f32.mrf.mxu1 }
  0xea   :  { %v519_v19 = vadd.f32 %v518_v4, %v373_v61  ;;  %v2443_v51 = vpop.f32.mrf.mxu0 }
  0xec   :  { %v2475_v37 = vpop.f32.mrf.mxu1  ;;  %v386_v57 = vpop.f32.mrf.mxu0 }
  0xed   :  { %v540_v58 = vadd.f32 %v2475_v37, %v2443_v51 }
  0xee   :  { %v531_v2 = vpop.f32.mrf.mxu1  ;;  %v2444_v11 = vpop.f32.mrf.mxu0 }
  0xef   :  { %v532_v9 = vadd.f32 %v531_v2, %v386_v57 }
  0xf0   :  { %v2476_v21 = vpop.f32.mrf.mxu1  ;;  %v389_v14 = vpop.f32.mrf.mxu0 }
  0xf1   :  { %v543_v36 = vadd.f32 %v2476_v21, %v2444_v11 }
  0xf2   :  { %v534_v52 = vpop.f32.mrf.mxu1  ;;  %v2447_v22 = vpop.f32.mrf.mxu0 }
  0xf3   :  { %v535_v44 = vadd.f32 %v534_v52, %v389_v14 }
  0xf4   :  { %v402_v59 = vpop.f32.mrf.mxu0  ;;  %v2479_v55 = vpop.f32.mrf.mxu1 }
  0xf5   :  { %v556_v62 = vadd.f32 %v2479_v55, %v2447_v22 }
  0xf6   :  { %v2448_v30 = vpop.f32.mrf.mxu0  ;;  %v547_v1 = vpop.f32.mrf.mxu1 }
  0xf7   :  { %v548_v28 = vadd.f32 %v547_v1, %v402_v59 }
  0xf8   :  { %v405_v24 = vpop.f32.mrf.mxu0  ;;  %v2480_v49 = vpop.f32.mrf.mxu1 }
  0xf9   :  { %v559_v15 = vadd.f32 %v2480_v49, %v2448_v30 }
  0xfa   :  { %v2451_v46 = vpop.f32.mrf.mxu0  ;;  %v550_v42 = vpop.f32.mrf.mxu1 }
  0xfb   :  { %v551_v31 = vadd.f32 %v550_v42, %v405_v24 }
  0xfc   :  { %v418_v63 = vpop.f32.mrf.mxu0 }
  0xfe   :  { %v2452_v33 = vpop.f32.mrf.mxu0  ;;  %v2483_v32 = vpop.f32.mrf.mxu1 }
  0xff   :  { %v572_v54 = vadd.f32 %v2483_v32, %v2451_v46 }
 0x100   :  { %v421_v16 = vpop.f32.mrf.mxu0  ;;  %v563_v40 = vpop.f32.mrf.mxu1 }
 0x101   :  { %v564_v27 = vadd.f32 %v563_v40, %v418_v63 }
 0x102   :  { %v2503_v41 = vpop.f32.mrf.mxu0  ;;  %v2484_v5 = vpop.f32.mrf.mxu1 }
 0x103   :  { %v766_v47 = vadd.f32 %v2503_v41, %v524_v18  ;;  %v575_v6 = vadd.f32 %v2484_v5, %v2452_v33 }
 0x104   :  { %v701_v20 = vpop.f32.mrf.mxu0  ;;  %v566_v43 = vpop.f32.mrf.mxu1 }
 0x105   :  { %v764_v13 = vadd.f32 %v701_v20, %v516_v29  ;;  %v567_v60 = vadd.f32 %v566_v43, %v421_v16 }
 0x106   :  { %v2504_v53 = vpop.f32.mrf.mxu0  ;;  %v2535_v35 = vpop.f32.mrf.mxu1 }
 0x107   :  { %v767_v17 = vadd.f32 %v2504_v53, %v527_v38  ;;  %v3555_v45 = vadd.f32 %v2535_v35, %v766_v47 }
 0x108   :  { %v704_v50 = vpop.f32.mrf.mxu0  ;;  %v903_v3 = vpop.f32.mrf.mxu1 }
 0x109   :  { %v765_v39 = vadd.f32 %v704_v50, %v519_v19  ;;  %v3557_v48 = vadd.f32 %v903_v3, %v764_v13 }
 0x10a   :  { %v2507_v8 = vpop.f32.mrf.mxu0  ;;  %v2536_v23 = vpop.f32.mrf.mxu1 }
 0x10b   :  { %v770_v56 = vadd.f32 %v2507_v8, %v540_v58  ;;  %v3559_v26 = vadd.f32 %v2536_v23, %v767_v17 }
 0x10c   :  { %v717_v25 = vpop.f32.mrf.mxu0  ;;  %v906_v18 = vpop.f32.mrf.mxu1 }
 0x10d   :  { %v768_v10 = vadd.f32 %v717_v25, %v532_v9  ;;  %v3561_v7 = vadd.f32 %v906_v18, %v765_v39 }
 0x10e   :  { %v2508_v0 = vpop.f32.mrf.mxu0  ;;  %v2539_v12 = vpop.f32.mrf.mxu1 }
 0x10f   :  { %v771_v29 = vadd.f32 %v2508_v0, %v543_v36  ;;  %v3563_v38 = vadd.f32 %v2539_v12, %v770_v56 }
 0x110   :  { %v720_v34 = vpop.f32.mrf.mxu0  ;;  %v919_v4 = vpop.f32.mrf.mxu1 }
 0x111   :  { %v769_v61 = vadd.f32 %v720_v34, %v535_v44  ;;  %v3565_v51 = vadd.f32 %v919_v4, %v768_v10 }
 0x112   :  { %v2511_v19 = vpop.f32.mrf.mxu0  ;;  %v2540_v57 = vpop.f32.mrf.mxu1 }
 0x113   :  { %v774_v37 = vadd.f32 %v2511_v19, %v556_v62  ;;  %v3567_v2 = vadd.f32 %v2540_v57, %v771_v29 }
 0x114   :  { %v733_v58 = vpop.f32.mrf.mxu0  ;;  %v922_v9 = vpop.f32.mrf.mxu1 }
 0x115   :  { %v772_v11 = vadd.f32 %v733_v58, %v548_v28  ;;  %v3569_v14 = vadd.f32 %v922_v9, %v769_v61 }
 0x116   :  { %v2512_v21 = vpop.f32.mrf.mxu0  ;;  %v2543_v52 = vpop.f32.mrf.mxu1 }
 0x117   :  { %v775_v36 = vadd.f32 %v2512_v21, %v559_v15  ;;  %v3571_v59 = vadd.f32 %v2543_v52, %v774_v37 }
 0x118   :  { %v736_v22 = vpop.f32.mrf.mxu0  ;;  %v935_v55 = vpop.f32.mrf.mxu1 }
 0x119   :  { %v773_v44 = vadd.f32 %v736_v22, %v551_v31  ;;  %v3573_v1 = vadd.f32 %v935_v55, %v772_v11 }
 0x11a   :  { %v2515_v30 = vpop.f32.mrf.mxu0  ;;  %v2544_v24 = vpop.f32.mrf.mxu1 }
 0x11b   :  { %v778_v62 = vadd.f32 %v2515_v30, %v572_v54  ;;  %v3575_v46 = vadd.f32 %v2544_v24, %v775_v36 }
 0x11c   :  { %v749_v49 = vpop.f32.mrf.mxu0  ;;  %v938_v42 = vpop.f32.mrf.mxu1 }
 0x11d   :  { %v776_v28 = vadd.f32 %v749_v49, %v564_v27  ;;  %v3577_v33 = vadd.f32 %v938_v42, %v773_v44 }
 0x11e   :  { %v2516_v63 = vpop.f32.mrf.mxu0  ;;  %v2547_v32 = vpop.f32.mrf.mxu1 }
 0x11f   :  { %v779_v15 = vadd.f32 %v2516_v63, %v575_v6  ;;  %v3579_v40 = vadd.f32 %v2547_v32, %v778_v62 }
 0x120   :  { %v752_v16 = vpop.f32.mrf.mxu0  ;;  %v951_v41 = vpop.f32.mrf.mxu1 }
 0x121   :  { %v777_v31 = vadd.f32 %v752_v16, %v567_v60  ;;  %v3581_v5 = vadd.f32 %v951_v41, %v776_v28 }
 0x122   :  { %v2567_v47 = vpop.f32.mrf.mxu0  ;;  %v2548_v54 = vpop.f32.mrf.mxu1 }
 0x123   :  { %v3583_v13 = vadd.f32 %v2548_v54, %v779_v15 }
 0x124   :  { %v1105_v20 = vpop.f32.mrf.mxu0  ;;  %v954_v43 = vpop.f32.mrf.mxu1 }
 0x125   :  { %v3585_v53 = vadd.f32 %v954_v43, %v777_v31 }
 0x126   :  { %v2568_v27 = vpop.f32.mrf.mxu0 }
 0x127   :  { %v2599_v17 = vpop.f32.mrf.mxu1 }
 0x128   :  { %v1108_v35 = vpop.f32.mrf.mxu0 }
 0x129   :  { %v1307_v6 = vpop.f32.mrf.mxu1 }
 0x12a   :  { %v2571_v50 = vpop.f32.mrf.mxu0 }
 0x12b   :  { %v3587_v39 = vpop.f32.mrf.mxu1 }
 0x12c   :  { %v1121_v3 = vpop.f32.mrf.mxu0 }
 0x12d   :  { %v1310_v60 = vpop.f32.mrf.mxu1 }
 0x12e   :  { %v3589_v8 = vpop.f32.mrf.mxu0 }
 0x12f   :  { %v2603_v56 = vpop.f32.mrf.mxu1 }
 0x130   :  { %v3591_v23 = vpop.f32.mrf.mxu0 }
 0x131   :  { %v3593_v25 = vpop.f32.mrf.mxu1 }
 0x132   :  { %v2575_v10 = vpop.f32.mrf.mxu0 }
 0x133   :  { %v3595_v18 = vpop.f32.mrf.mxu1 }
 0x134   :  { %v1137_v0 = vpop.f32.mrf.mxu0 }
 0x135   :  { %v3597_v29 = vpop.f32.mrf.mxu1 }
 0x136   :  { %3786 = vst [vmem:[#allocation3_spill] sm:$0xff] %v3597_v29  ;;  %v2576_v12 = vpop.f32.mrf.mxu0 }
 0x137   :  { %v2607_v34 = vpop.f32.mrf.mxu1 }
 0x138   :  { %v3599_v61 = vpop.f32.mrf.mxu0 }
 0x139   :  { %v1339_v4 = vpop.f32.mrf.mxu1 }
 0x13a   :  { %v3601_v19 = vpop.f32.mrf.mxu0 }
 0x13b   :  { %v3603_v37 = vpop.f32.mrf.mxu1 }
 0x13c   :  { %v1153_v57 = vpop.f32.mrf.mxu0 }
 0x13d   :  { %v3605_v58 = vpop.f32.mrf.mxu1 }
 0x13e   :  { %3787 = vst [vmem:[#allocation4_spill] sm:$0xff] %v3605_v58  ;;  %v3607_v11 = vpop.f32.mrf.mxu0  ;;  %v1174_v58 = vadd.f32 %v2571_v50, %v3563_v38 }
 0x13f   :  { %v3609_v9 = vpop.f32.mrf.mxu1 }
 0x140   :  { %3788 = vst [vmem:[#allocation5_spill] sm:$0xff] %v3609_v9  ;;  %v3611_v21 = vpop.f32.mrf.mxu0 }
 0x141   :  { %v3613_v36 = vpop.f32.mrf.mxu1 }
 0x142   :  { %3789 = vst [vmem:[#allocation6_spill] sm:$0xff] %v3613_v36  ;;  %v2631_v52 = vpop.f32.mrf.mxu0 }
 0x143   :  { %v3615_v22 = vpop.f32.mrf.mxu1 }
 0x144   :  { %3790 = vst [vmem:[#allocation7_spill] sm:$0xff] %v3615_v22  ;;  %v1510_v44 = vpop.f32.mrf.mxu0 }
 0x145   :  { %v3617_v55 = vpop.f32.mrf.mxu1 }
 0x146   :  { %3791 = vst [vmem:[#allocation8_spill] sm:$0xff] %v3617_v55  ;;  %v2632_v30 = vpop.f32.mrf.mxu0 }
 0x147   :  { %v2663_v62 = vpop.f32.mrf.mxu1 }
 0x148   :  { %v1513_v24 = vpop.f32.mrf.mxu0 }
 0x149   :  { %v1712_v49 = vpop.f32.mrf.mxu1 }
 0x14a   :  { %v3619_v28 = vpop.f32.mrf.mxu0 }
 0x14b   :  { %3792 = vst [vmem:[#allocation9_spill] sm:$0xff] %v3619_v28  ;;  %v2664_v42 = vpop.f32.mrf.mxu1  ;;  %v1170_v28 = vadd.f32 %v2567_v47, %v3555_v45  ;;  %v1172_v47 = vadd.f32 %v1121_v3, %v3565_v51  ;;  %v1173_v51 = vadd.f32 %v3591_v23, %v3569_v14  ;;  %v1180_v14 = vadd.f32 %v1153_v57, %v3581_v5 }
 0x14c   :  { %v3621_v63 = vpop.f32.mrf.mxu0 }
 0x14d   :  { %3793 = vst [vmem:[#allocation10_spill] sm:$0xff] %v3621_v63  ;;  %v3623_v15 = vpop.f32.mrf.mxu1  ;;  %v1374_v50 = vadd.f32 %v3593_v25, %v1172_v47 }
 0x14e   :  { %3794 = vst [vmem:[#allocation11_spill] sm:$0xff] %v3623_v15  ;;  %v3625_v32 = vpop.f32.mrf.mxu0 }
 0x14f   :  { %3795 = vst [vmem:[#allocation12_spill] sm:$0xff] %v3625_v32  ;;  %v3627_v16 = vpop.f32.mrf.mxu1  ;;  %v1168_v32 = vadd.f32 %v1105_v20, %v3557_v48  ;;  %v1178_v48 = vadd.f32 %v2575_v10, %v3571_v59  ;;  %v1179_v59 = vadd.f32 %v2576_v12, %v3575_v46 }
 0x150   :  { %3796 = vst [vmem:[#allocation13_spill] sm:$0xff] %v3627_v16  ;;  %v3629_v31 = vpop.f32.mrf.mxu0 }
 0x151   :  { %3797 = vst [vmem:[#allocation14_spill] sm:$0xff] %v3629_v31  ;;  %v3631_v41 = vpop.f32.mrf.mxu1  ;;  %v1372_v31 = vadd.f32 %v2599_v17, %v1170_v28  ;;  %v1370_v45 = vadd.f32 %v1307_v6, %v1168_v32  ;;  %v1380_v3 = vadd.f32 %v2607_v34, %v1178_v48  ;;  %v1381_v34 = vadd.f32 %v3603_v37, %v1179_v59 }
 0x152   :  { %3798 = vst [vmem:[#allocation15_spill] sm:$0xff] %v3631_v41  ;;  %v2639_v54 = vpop.f32.mrf.mxu0  ;;  %v1171_v41 = vadd.f32 %v2568_v27, %v3559_v26  ;;  %v1376_v27 = vadd.f32 %v2603_v56, %v1174_v58  ;;  %v1177_v56 = vadd.f32 %v3599_v61, %v3577_v33  ;;  %v1181_v33 = vadd.f32 %v3611_v21, %v3585_v53  ;;  %v3803_v61 = vld [vmem:[#allocation3_spill] sm:$0xff] }
 0x153   :  { %v3633_v43 = vpop.f32.mrf.mxu1  ;;  %v1575_v20 = vadd.f32 %v2631_v52, %v1372_v31  ;;  %v1573_v38 = vadd.f32 %v1510_v44, %v1370_v45  ;;  %v1583_v12 = vadd.f32 %v2639_v54, %v1380_v3  ;;  %v3804_v44 = vld [vmem:[#allocation4_spill] sm:$0xff]  ;;  %v3809_v31 = vld [vmem:[#allocation7_spill] sm:$0xff] }
 0x154   :  { %3799 = vst [vmem:[#allocation16_spill] sm:$0xff] %v3633_v43  ;;  %v1542_v55 = vpop.f32.mrf.mxu0  ;;  %v1169_v43 = vadd.f32 %v1108_v35, %v3561_v7  ;;  %v1373_v26 = vadd.f32 %v3587_v39, %v1171_v41  ;;  %v1175_v35 = vadd.f32 %v3589_v8, %v3567_v2  ;;  %v1182_v2 = vadd.f32 %v3601_v19, %v3579_v40  ;;  %v3810_v54 = vld [vmem:[#allocation8_spill] sm:$0xff]  ;;  %v3811_v45 = vld [vmem:[#allocation10_spill] sm:$0xff] }
 0x155   :  { %v3635_v22 = vpop.f32.mrf.mxu1  ;;  %v1777_v10 = vadd.f32 %v2663_v62, %v1575_v20  ;;  %v1775_v23 = vadd.f32 %v1712_v49, %v1573_v38  ;;  %v1375_v19 = vadd.f32 %v3803_v61, %v1173_v51  ;;  %v1379_v37 = vadd.f32 %v3804_v44, %v1177_v56  ;;  %v3807_v49 = vld [vmem:[#allocation6_spill] sm:$0xff] }
 0x156   :  { %3800 = vst [vmem:[#allocation17_spill] sm:$0xff] %v3635_v22  ;;  %v2640_v36 = vpop.f32.mrf.mxu0  ;;  %v1371_v7 = vadd.f32 %v1310_v60, %v1169_v43  ;;  %v1576_v39 = vadd.f32 %v2632_v30, %v1373_v26  ;;  %v1377_v25 = vadd.f32 %v3595_v18, %v1175_v35  ;;  %v3805_v30 = vld [vmem:[#allocation5_spill] sm:$0xff]  ;;  %v1382_v28 = vadd.f32 %v3807_v49, %v1180_v14  ;;  %v3812_v26 = vld [vmem:[#allocation12_spill] sm:$0xff] }
 0x157   :  { %v2671_v63 = vpop.f32.mrf.mxu1  ;;  %v1384_v62 = vadd.f32 %v3805_v30, %v1182_v2  ;;  %v1383_v43 = vadd.f32 %v3810_v54, %v1181_v33  ;;  %v1577_v47 = vadd.f32 %v3811_v45, %v1374_v50  ;;  %v3814_v51 = vld [vmem:[#allocation13_spill] sm:$0xff] }
 0x158   :  { %v3638_v9 = vpop.f32.mrf.mxu0  ;;  %v1778_v57 = vadd.f32 %v2664_v42, %v1576_v39  ;;  %v3815_v3 = vld [vmem:[#allocation14_spill] sm:$0xff] }
 0x159   :  { %v3641_v15 = vpop.f32.mrf.mxu1 }
 0x15a   :  { %3801 = vst [vmem:[#allocation18_spill] sm:$0xff] %v3641_v15  ;;  %v3643_v16 = vpop.f32.mrf.mxu0  ;;  %v1176_v15 = vadd.f32 %v1137_v0, %v3573_v1  ;;  %v1574_v0 = vadd.f32 %v1513_v24, %v1371_v7  ;;  %v1584_v24 = vadd.f32 %v2640_v36, %v1381_v34  ;;  %v1582_v36 = vadd.f32 %v3638_v9, %v1379_v37 }
 0x15b   :  { %3802 = vst [vmem:[#allocation19_spill] sm:$0xff] %v3643_v16  ;;  %v3648_v22 = vpop.f32.mrf.mxu1  ;;  %v1580_v7 = vadd.f32 %v3812_v26, %v1377_v25 }
 0x15c   :  { %v3650_v29 = vpop.f32.mrf.mxu0  ;;  %v1378_v60 = vadd.f32 %v1339_v4, %v1176_v15  ;;  %v1183_v4 = vadd.f32 %v3607_v11, %v3583_v13  ;;  %v3806_v13 = vld [vmem:[#allocation9_spill] sm:$0xff]  ;;  %v3808_v15 = vld [vmem:[#allocation11_spill] sm:$0xff]  ;;  %v1786_v50 = vadd.f32 %v3648_v22, %v1584_v24 }
 0x15d   :  { %v3655_v16 = vpop.f32.mrf.mxu1  ;;  %v1579_v11 = vadd.f32 %v3806_v13, %v1376_v27  ;;  %v1776_v42 = vadd.f32 %v3808_v15, %v1574_v0  ;;  %v3817_v0 = vld [vmem:[#allocation15_spill] sm:$0xff]  ;;  %v1585_v25 = vadd.f32 %v3650_v29, %v1382_v28  ;;  %v3819_v24 = vld [vmem:[#allocation17_spill] sm:$0xff] }
 0x15e   :  { %v3657_v17 = vpop.f32.mrf.mxu0  ;;  %v1581_v52 = vadd.f32 %v1542_v55, %v1378_v60  ;;  %v1785_v55 = vadd.f32 %v2671_v63, %v1583_v12  ;;  %v1385_v41 = vadd.f32 %v3809_v31, %v1183_v4  ;;  %v1779_v22 = vadd.f32 %v3817_v0, %v1577_v47 }
 0x15f   :  { %v3665_v6 = vpop.f32.mrf.mxu1  ;;  %v1781_v59 = vadd.f32 %v3814_v51, %v1579_v11  ;;  %v1784_v12 = vadd.f32 %v3655_v16, %v1582_v36 }
 0x160   :  { %v3667_v1 = vpop.f32.mrf.mxu0  ;;  %v1588_v16 = vadd.f32 %v3657_v17, %v1385_v41 }
 0x161   :  { %v3675_v8 = vpop.f32.mrf.mxu1  ;;  %v3813_v38 = vld [vmem:[#allocation18_spill] sm:$0xff]  ;;  %v1586_v17 = vadd.f32 %v3667_v1, %v1383_v43 }
 0x162   :  { %v2695_v46 = vpop.f32.mrf.mxu0  ;;  %v1783_v27 = vadd.f32 %v3813_v38, %v1581_v52  ;;  %v3816_v9 = vld [vmem:[#allocation19_spill] sm:$0xff]  ;;  %v3818_v52 = vld [vmem:[#allocation16_spill] sm:$0xff] }
 0x163   :  { %v1979_v58 = vadd.f32 %v2695_v46, %v1777_v10  ;;  %v3683_v40 = vpop.f32.mrf.mxu1  ;;  %v1578_v10 = vadd.f32 %v3815_v3, %v1375_v19  ;;  %v1587_v39 = vadd.f32 %v3816_v9, %v1384_v62 }
 0x164   :  { %v1914_v5 = vpop.f32.mrf.mxu0 }
 0x165   :  { %1995 = vst [vmem:[%s3782_s2 + $0x10] sm:$0xff] %v1979_v58  ;;  %v1977_v18 = vadd.f32 %v1914_v5, %v1775_v23  ;;  %v3692_v53 = vpop.f32.mrf.mxu1  ;;  %v2033_v5 = vmul.f32 %v1979_v58, %v1979_v58  ;;  %v1789_v44 = vadd.f32 %v3665_v6, %v1587_v39  ;;  %v1787_v6 = vadd.f32 %v3675_v8, %v1585_v25 }
 0x166   :  { %v2696_v21 = vpop.f32.mrf.mxu0  ;;  %v1790_v8 = vadd.f32 %v3683_v40, %v1588_v16 }
 0x167   :  { %1993 = vst [vmem:[%s3782_s2] sm:$0xff] %v1977_v18  ;;  %v1980_v32 = vadd.f32 %v2696_v21, %v1778_v57  ;;  %v2703_v48 = vpop.f32.mrf.mxu1  ;;  %v2031_v2 = vmul.f32 %v1977_v18, %v1977_v18  ;;  %v1780_v21 = vadd.f32 %v3819_v24, %v1578_v10 }
 0x168   :  { %v1917_v20 = vpop.f32.mrf.mxu0  ;;  %v3705_v63 = vadd.f32 %v2703_v48, %v1785_v55  ;;  %v1788_v48 = vadd.f32 %v3692_v53, %v1586_v17 }
 0x169   :  { %1996 = vst [vmem:[%s3782_s2 + $0x18] sm:$0xff] %v1980_v32  ;;  %v1978_v35 = vadd.f32 %v1917_v20, %v1776_v42  ;;  %v1946_v60 = vpop.f32.mrf.mxu1  ;;  %v2034_v62 = vmul.f32 %v1980_v32, %v1980_v32 }
 0x16a   :  { %v2699_v56 = vpop.f32.mrf.mxu0  ;;  %2003 = vst [vmem:[%s3782_s2 + $0x50] sm:$0xff] %v3705_v63  ;;  %v3718_v14 = vadd.f32 %v1946_v60, %v1783_v27  ;;  %v2041_v60 = vmul.f32 %v3705_v63, %v3705_v63 }
 0x16b   :  { %1994 = vst [vmem:[%s3782_s2 + $0x8] sm:$0xff] %v1978_v35  ;;  %v2009_v46 = vadd.f32 %v1978_v35, %v1977_v18  ;;  %v2032_v23 = vmul.f32 %v1978_v35, %v1978_v35  ;;  %v2704_v34 = vpop.f32.mrf.mxu1  ;;  %v1983_v4 = vadd.f32 %v2699_v56, %v1781_v59  ;;  %v1782_v18 = vadd.f32 %v3818_v52, %v1580_v7 }
 0x16c   :  { %v1930_v33 = vpop.f32.mrf.mxu0  ;;  %2001 = vst [vmem:[%s3782_s2 + $0x40] sm:$0xff] %v3718_v14  ;;  %v1988_v61 = vadd.f32 %v2704_v34, %v1786_v50  ;;  %v2039_v53 = vmul.f32 %v3718_v14, %v3718_v14 }
 0x16d   :  { %v2010_v19 = vadd.f32 %v2009_v46, %v1979_v58  ;;  %v2047_v57 = vadd.f32 %v2032_v23, %v2031_v2  ;;  %v1949_v37 = vpop.f32.mrf.mxu1  ;;  %1999 = vst [vmem:[%s3782_s2 + $0x30] sm:$0xff] %v1983_v4  ;;  %v1981_v29 = vadd.f32 %v1930_v33, %v1779_v22  ;;  %v2037_v20 = vmul.f32 %v1983_v4, %v1983_v4 }
 0x16e   :  { %v2700_v30 = vpop.f32.mrf.mxu0  ;;  %2004 = vst [vmem:[%s3782_s2 + $0x58] sm:$0xff] %v1988_v61  ;;  %v1986_v13 = vadd.f32 %v1949_v37, %v1784_v12  ;;  %v2042_v46 = vmul.f32 %v1988_v61, %v1988_v61 }
 0x16f   :  { %v2048_v58 = vadd.f32 %v2047_v57, %v2033_v5  ;;  %v2011_v11 = vadd.f32 %v2010_v19, %v1980_v32  ;;  %v2707_v49 = vpop.f32.mrf.mxu1  ;;  %1997 = vst [vmem:[%s3782_s2 + $0x20] sm:$0xff] %v1981_v29  ;;  %v1984_v28 = vadd.f32 %v2700_v30, %v1782_v18  ;;  %v2035_v32 = vmul.f32 %v1981_v29, %v1981_v29 }
 0x170   :  { %v1933_v15 = vpop.f32.mrf.mxu0  ;;  %2002 = vst [vmem:[%s3782_s2 + $0x48] sm:$0xff] %v1986_v13  ;;  %v1991_v42 = vadd.f32 %v2707_v49, %v1789_v44  ;;  %v2040_v50 = vmul.f32 %v1986_v13, %v1986_v13 }
 0x171   :  { %v2012_v55 = vadd.f32 %v2011_v11, %v1981_v29  ;;  %v2049_v31 = vadd.f32 %v2048_v58, %v2034_v62  ;;  %v1962_v41 = vpop.f32.mrf.mxu1  ;;  %2000 = vst [vmem:[%s3782_s2 + $0x38] sm:$0xff] %v1984_v28  ;;  %v1982_v1 = vadd.f32 %v1933_v15, %v1780_v21  ;;  %v2038_v35 = vmul.f32 %v1984_v28, %v1984_v28 }
 0x172   :  { %2007 = vst [vmem:[%s3782_s2 + $0x70] sm:$0xff] %v1991_v42  ;;  %v1989_v43 = vadd.f32 %v1962_v41, %v1787_v6 }
 0x173   :  { %v2050_v54 = vadd.f32 %v2049_v31, %v2035_v32  ;;  %v2708_v45 = vpop.f32.mrf.mxu1  ;;  %1998 = vst [vmem:[%s3782_s2 + $0x28] sm:$0xff] %v1982_v1  ;;  %v2013_v47 = vadd.f32 %v2012_v55, %v1982_v1  ;;  %v2036_v36 = vmul.f32 %v1982_v1, %v1982_v1 }
 0x174   :  { %2005 = vst [vmem:[%s3782_s2 + $0x60] sm:$0xff] %v1989_v43  ;;  %v1992_v40 = vadd.f32 %v2708_v45, %v1790_v8  ;;  %v2043_v22 = vmul.f32 %v1989_v43, %v1989_v43 }
 0x175   :  { %v2014_v26 = vadd.f32 %v2013_v47, %v1983_v4  ;;  %v2051_v7 = vadd.f32 %v2050_v54, %v2036_v36  ;;  %v1965_v38 = vpop.f32.mrf.mxu1 }
 0x176   :  { %2008 = vst [vmem:[%s3782_s2 + $0x78] sm:$0xff] %v1992_v40  ;;  %v1990_v27 = vadd.f32 %v1965_v38, %v1788_v48  ;;  %v2046_v57 = vmul.f32 %v1992_v40, %v1992_v40 }
 0x177   :  { %v2015_v51 = vadd.f32 %v2014_v26, %v1984_v28  ;;  %v2052_v59 = vadd.f32 %v2051_v7, %v2037_v20 }
 0x178   :  { %2006 = vst [vmem:[%s3782_s2 + $0x68] sm:$0xff] %v1990_v27  ;;  %v2044_v4 = vmul.f32 %v1990_v27, %v1990_v27 }
 0x179   :  { %v2016_v3 = vadd.f32 %v2015_v51, %v3718_v14  ;;  %v2053_v10 = vadd.f32 %v2052_v59, %v2038_v35  ;;  %v2045_v14 = vmul.f32 %v1991_v42, %v1991_v42 }
 0x17b   :  { %v2054_v9 = vadd.f32 %v2053_v10, %v2039_v53  ;;  %v2017_v39 = vadd.f32 %v2016_v3, %v1986_v13 }
 0x17d   :  { %v2018_v56 = vadd.f32 %v2017_v39, %v3705_v63  ;;  %v2055_v2 = vadd.f32 %v2054_v9, %v2040_v50 }
 0x17f   :  { %v2019_v23 = vadd.f32 %v2018_v56, %v1988_v61  ;;  %v2056_v0 = vadd.f32 %v2055_v2, %v2041_v60 }
 0x181   :  { %v2020_v12 = vadd.f32 %v2019_v23, %v1989_v43  ;;  %v2057_v25 = vadd.f32 %v2056_v0, %v2042_v46 }
 0x183   :  { %v2021_v34 = vadd.f32 %v2020_v12, %v1990_v27  ;;  %v2058_v33 = vadd.f32 %v2057_v25, %v2043_v22 }
 0x185   :  { %v2022_v5 = vadd.f32 %v2021_v34, %v1991_v42  ;;  %v2059_v19 = vadd.f32 %v2058_v33, %v2044_v4 }
 0x187   :  { %v2023_v52 = vadd.f32 %v2022_v5, %v1992_v40  ;;  %v2060_v18 = vadd.f32 %v2059_v19, %v2045_v14 }
 0x189   :  { %v2024_v44 = vrot.slane %v2023_v52, 4  ;;  %v2061_v16 = vadd.f32 %v2060_v18, %v2046_v57 }
 0x18b   :  { %v2025_v37 = vadd.f32 %v2024_v44, %v2023_v52  ;;  %v2062_v63 = vrot.slane %v2061_v16, 4 }
 0x18d   :  { %v2026_v29 = vrot.slane %v2025_v37, 2  ;;  %v2063_v30 = vadd.f32 %v2062_v63, %v2061_v16 }
 0x18f   :  { %v2027_v61 = vadd.f32 %v2026_v29, %v2025_v37  ;;  %v2064_v62 = vrot.slane %v2063_v30, 2 }
 0x191   :  { %v2028_v58 = vrot.slane %v2027_v61, 1  ;;  %v2065_v13 = vadd.f32 %v2064_v62, %v2063_v30 }
 0x193   :  { %v2029_v11 = vadd.f32 %v2028_v58, %v2027_v61  ;;  %v2066_v24 = vrot.slane %v2065_v13, 1 }
 0x195   :  { %2030 = vst [vmem:[%s3783_s3] sm:$0x1] %v2029_v11  ;;  %v2067_v21 = vadd.f32 %v2066_v24, %v2065_v13 }
 0x197   :  { %2068 = vst [vmem:[%s3783_s3 + $0x1] sm:$0x1] %v2067_v21 }

</bundles_post_ra>
